<compile_context>
chip_gen: v6e
topology: v6e:2x2x1
jax: 0.10.0
libtpu: 0.0.40
codegen_flags: <defaults>
</compile_context>

<pallas_src>
import numpy as np
import jax
import jax.numpy as jnp
from jax.experimental import pallas as pl


# ----------------------------- config helpers ------------------------------

def _int2tuple(v):
    return (v, v) if isinstance(v, int) else tuple(v)


def build_config(indims, f_nums, f_sizs, strides, c_nlay, c_laydim, c_out,
                 first_fnum=1):
    indims = _int2tuple(indims)
    f_nums = [first_fnum] + list(f_nums)
    f_sizs = [_int2tuple(f) for f in f_sizs]
    strides = [_int2tuple(s) for s in strides]
    pads = [tuple(f[j] // 2 for j in range(2)) for f in f_sizs]
    ndims = [indims]
    for i in range(len(f_sizs)):
        ndims.append(tuple(
            (ndims[i][j] + 2 * pads[i][j] - f_sizs[i][j]) // strides[i][j] + 1
            for j in range(2)))
    c_indim = f_nums[-1]
    for d in ndims[-1]:
        c_indim *= d
    cls_dims = [c_indim] + [c_laydim] * c_nlay + [c_out]
    return dict(f_nums=f_nums, f_sizs=f_sizs, strides=strides, pads=pads,
                ndims=ndims, cls_dims=cls_dims)


def init_params(key, cfg):
    """PyTorch-layout parameters (Conv2d: (Cout,Cin,kh,kw), Linear: (in,out))."""
    params = {"conv": [], "fc": []}
    n_conv = len(cfg["f_sizs"])
    keys = jax.random.split(key, 2 * (n_conv + len(cfg["cls_dims"]) - 1))
    ki = 0
    for i in range(n_conv):
        cin, cout = cfg["f_nums"][i], cfg["f_nums"][i + 1]
        kh, kw = cfg["f_sizs"][i]
        bound = 1.0 / jnp.sqrt(cin * kh * kw)
        w = jax.random.uniform(keys[ki], (cout, cin, kh, kw),
                               minval=-bound, maxval=bound, dtype=jnp.float32)
        b = jax.random.uniform(keys[ki + 1], (cout,),
                               minval=-bound, maxval=bound, dtype=jnp.float32)
        ki += 2
        params["conv"].append((w, b))
    dims = cfg["cls_dims"]
    for i in range(len(dims) - 1):
        bound = 1.0 / jnp.sqrt(dims[i])
        w = jax.random.uniform(keys[ki], (dims[i], dims[i + 1]),
                               minval=-bound, maxval=bound, dtype=jnp.float32)
        b = jax.random.uniform(keys[ki + 1], (dims[i + 1],),
                               minval=-bound, maxval=bound, dtype=jnp.float32)
        ki += 2
        params["fc"].append((w, b))
    return params


# ---------------------- one-time host-side weight packing -------------------

def _conv_as_dense(w_oihw, in_hw, out_hw, stride, pad):
    """Densify a zero-padded Conv2d (OIHW weight) into a
    (Hin*Win*Cin, Hout*Wout*Cout) matrix acting on NHWC-flattened samples.
    Rows ordered (h_in, w_in, c_in); cols ordered (h_out, w_out, c_out)."""
    w = np.asarray(w_oihw, dtype=np.float32)
    cout, cin, kh, kw = w.shape
    ih, iw = in_hw
    oh, ow = out_hw
    dense = np.zeros((ih * iw * cin, oh * ow * cout), np.float32)
    for ho in range(oh):
        for wo in range(ow):
            c0 = (ho * ow + wo) * cout
            for i in range(kh):
                hi = ho * stride[0] - pad[0] + i
                if hi < 0 or hi >= ih:
                    continue
                for j in range(kw):
                    wi = wo * stride[1] - pad[1] + j
                    if wi < 0 or wi >= iw:
                        continue
                    r0 = (hi * iw + wi) * cin
                    dense[r0:r0 + cin, c0:c0 + cout] += w[:, :, i, j].T
    return dense


def pack_params(params, cfg):
    """Pack-time repacking so the kernel is a pure chain of dense 2-D matmuls:
       * each Conv2d becomes ONE (flat_in, flat_out) matrix (K = 512 / 1024),
         its bias tiled over the spatial positions of the NHWC-flat output;
       * the first Linear's rows are permuted from PyTorch's NCHW flatten order
         (c*S + s) to the kernel's NHWC order (s*C + c), so fc1 consumes the
         conv2 matmul output directly as one K=512 matmul."""
    conv = []
    for i, (w, b) in enumerate(params["conv"]):
        dense = _conv_as_dense(w, cfg["ndims"][i], cfg["ndims"][i + 1],
                               cfg["strides"][i], cfg["pads"][i])
        oh, ow = cfg["ndims"][i + 1]
        bflat = np.tile(np.asarray(b, np.float32), oh * ow).reshape(1, -1)
        conv.append((jnp.asarray(dense), jnp.asarray(bflat)))

    fcs = params["fc"]
    wf1, bf1 = fcs[0]
    c_last = cfg["f_nums"][-1]
    hh, wh = cfg["ndims"][-1]
    s = hh * wh
    d1 = wf1.shape[1]
    assert wf1.shape[0] == c_last * s
    wf1r = jnp.transpose(wf1.reshape(c_last, s, d1), (1, 0, 2)).reshape(s * c_last, d1)
    fc = [(wf1r, bf1.reshape(1, -1))] + [(w, b.reshape(1, -1)) for (w, b) in fcs[1:]]
    return dict(conv=conv, fc=fc)


# ------------------------------ fused kernel --------------------------------

def _zero_index_map(ndim):
    return lambda: (0,) * ndim


def _make_kernel(n_conv, n_fc, slope=0.01):
    """Fully fused forward: conv chain (LeakyReLU) + Linear chain (ReLU) +
    LogSoftmax(dim=0). Every layer is a single K-fat MXU matmul on a
    lane-dense (N, features) activation that never leaves VMEM."""

    def kernel(*refs):
        x_ref = refs[0]
        conv_refs = refs[1:1 + 2 * n_conv]
        fc_refs = refs[1 + 2 * n_conv:1 + 2 * (n_conv + n_fc)]
        o_ref = refs[1 + 2 * (n_conv + n_fc)]
        f32 = jnp.float32

        a = x_ref[...]                                   # (N, H*W*Cin)
        for l in range(n_conv):
            w = conv_refs[2 * l][...]
            b = conv_refs[2 * l + 1][...]
            a = jnp.dot(a, w, preferred_element_type=f32) + b
            a = jnp.where(a >= 0.0, a, slope * a)        # LeakyReLU(0.01)

        for l in range(n_fc):
            w = fc_refs[2 * l][...]
            b = fc_refs[2 * l + 1][...]
            a = jnp.maximum(jnp.dot(a, w, preferred_element_type=f32) + b, 0.0)

        # LogSoftmax over dim 0 (batch), as in NN_classifier.
        m = jnp.max(a, axis=0, keepdims=True)
        lse = m + jnp.log(jnp.sum(jnp.exp(a - m), axis=0, keepdims=True))
        o_ref[...] = (a - lse).astype(o_ref.dtype)

    return kernel


def forward_fused(kp, cfg, x):
    """Full CNN2d_classifier forward in a single pallas_call."""
    n = x.shape[0]
    h, w = cfg["ndims"][0]
    cin = cfg["f_nums"][0]
    nclass = cfg["cls_dims"][-1]
    n_conv = len(kp["conv"])
    n_fc = len(kp["fc"])
    assert n_fc >= 1

    # Only XLA glue: NCHW -> one lane-dense (N, H*W*Cin) slab (a single clean DMA).
    xflat = jnp.transpose(x, (0, 2, 3, 1)).astype(jnp.float32).reshape(n, h * w * cin)

    inputs = [xflat]
    for wd, bd in kp["conv"]:
        inputs += [wd, bd]
    for wl, bl in kp["fc"]:
        inputs += [wl, bl]

    kernel = _make_kernel(n_conv, n_fc)
    in_specs = [pl.BlockSpec(a.shape, _zero_index_map(a.ndim)) for a in inputs]

    return pl.pallas_call(
        kernel,
        out_shape=jax.ShapeDtypeStruct((n, nclass), jnp.float32),
        in_specs=in_specs,
        out_specs=pl.BlockSpec((n, nclass), _zero_index_map(2)),
    )(*inputs)


# ------------------------- pure-JAX reference path --------------------------

def forward_ref(params, cfg, x):
    for (w, b), stride, pad in zip(params["conv"], cfg["strides"], cfg["pads"]):
        y = jax.lax.conv_general_dilated(
            x, w, window_strides=stride,
            padding=[(pad[0], pad[0]), (pad[1], pad[1])],
            dimension_numbers=("NCHW", "OIHW", "NCHW"))
        y = y + b.reshape(1, -1, 1, 1)
        x = jnp.where(y >= 0.0, y, 0.01 * y)
    x = x.reshape(x.shape[0], -1)
    for (w, b) in params["fc"]:
        x = jnp.maximum(x @ w + b, 0.0)
    return jax.nn.log_softmax(x, axis=0)


# ---------------------------------- main ------------------------------------

if __name__ == "__main__":
    # 16x16 inputs, 2 input channels, two 3x3 convs (stride 1 then 2),
    # classifier with 2 hidden layers of 32 and 10 classes.
    cfg = build_config(indims=16, f_nums=[4, 8], f_sizs=[3, 3], strides=[1, 2],
                       c_nlay=2, c_laydim=32, c_out=10, first_fnum=2)

    key = jax.random.PRNGKey(0)
    pkey, xkey = jax.random.split(key)
    params = init_params(pkey, cfg)
    kparams = pack_params(params, cfg)      # one-time weight densification/repack

    batch = 2
    x = jax.random.normal(xkey, (batch, cfg["f_nums"][0], 16, 16),
                          dtype=jnp.float32)

    fwd = jax.jit(lambda kp, xx: forward_fused(kp, cfg, xx))
    out = jax.block_until_ready(fwd(kparams, x))

    # sanity checks
    assert out.shape == (batch, cfg["cls_dims"][-1]), out.shape
    lse = jax.scipy.special.logsumexp(out, axis=0)   # LogSoftmax(dim=0) => ~0
    assert jnp.allclose(lse, 0.0, atol=1e-4), lse
    ref = jax.block_until_ready(forward_ref(params, cfg, x))
    assert jnp.allclose(out, ref, rtol=2e-3, atol=2e-3), \
        float(jnp.max(jnp.abs(out - ref)))

    print("KERNEL_OK")
</pallas_src>

<mosaic_0001>
module attributes {stable_mosaic.version = 11 : i64} {
  func.func @kernel(%arg0: memref<2x512xf32, #tpu.memory_space<vmem>>, %arg1: memref<512x1024xf32, #tpu.memory_space<vmem>>, %arg2: memref<1x1024xf32, #tpu.memory_space<vmem>>, %arg3: memref<1024x512xf32, #tpu.memory_space<vmem>>, %arg4: memref<1x512xf32, #tpu.memory_space<vmem>>, %arg5: memref<512x32xf32, #tpu.memory_space<vmem>>, %arg6: memref<1x32xf32, #tpu.memory_space<vmem>>, %arg7: memref<32x32xf32, #tpu.memory_space<vmem>>, %arg8: memref<1x32xf32, #tpu.memory_space<vmem>>, %arg9: memref<32x10xf32, #tpu.memory_space<vmem>>, %arg10: memref<1x10xf32, #tpu.memory_space<vmem>>, %arg11: memref<2x10xf32, #tpu.memory_space<vmem>>) attributes {dimension_semantics = [], scalar_prefetch = 0 : i64, scratch_operands = 0 : i64, tpu.core_type = #tpu.core_type<tc>} {
    %c0 = arith.constant 0 : index
    %c0_0 = arith.constant 0 : index
    %0 = vector.load %arg0[%c0, %c0_0] : memref<2x512xf32, #tpu.memory_space<vmem>>, vector<2x512xf32>
    %c0_1 = arith.constant 0 : index
    %c0_2 = arith.constant 0 : index
    %1 = vector.load %arg1[%c0_1, %c0_2] : memref<512x1024xf32, #tpu.memory_space<vmem>>, vector<512x1024xf32>
    %c0_3 = arith.constant 0 : index
    %c0_4 = arith.constant 0 : index
    %2 = vector.load %arg2[%c0_3, %c0_4] : memref<1x1024xf32, #tpu.memory_space<vmem>>, vector<1x1024xf32>
    %cst = arith.constant dense<0.000000e+00> : vector<2x1024xf32>
    %3 = tpu.matmul %0, %1, %cst {dimension_numbers = #tpu.dot_dimension_numbers<[1], [0], [0], [1], [0, 0, 1, 1], [], []>} : vector<2x512xf32>, vector<512x1024xf32>, vector<2x1024xf32> -> vector<2x1024xf32>
    %4 = vector.broadcast %2 : vector<1x1024xf32> to vector<2x1024xf32>
    %5 = arith.addf %3, %4 : vector<2x1024xf32>
    %cst_5 = arith.constant 0.000000e+00 : f32
    %6 = vector.broadcast %cst_5 : f32 to vector<2x1024xf32>
    %7 = arith.cmpf oge, %5, %6 : vector<2x1024xf32>
    %cst_6 = arith.constant 0.00999999977 : f32
    %8 = vector.broadcast %cst_6 : f32 to vector<2x1024xf32>
    %9 = arith.mulf %8, %5 : vector<2x1024xf32>
    %10 = arith.select %7, %5, %9 : vector<2x1024xi1>, vector<2x1024xf32>
    %c0_7 = arith.constant 0 : index
    %c0_8 = arith.constant 0 : index
    %11 = vector.load %arg3[%c0_7, %c0_8] : memref<1024x512xf32, #tpu.memory_space<vmem>>, vector<1024x512xf32>
    %c0_9 = arith.constant 0 : index
    %c0_10 = arith.constant 0 : index
    %12 = vector.load %arg4[%c0_9, %c0_10] : memref<1x512xf32, #tpu.memory_space<vmem>>, vector<1x512xf32>
    %cst_11 = arith.constant dense<0.000000e+00> : vector<2x512xf32>
    %13 = tpu.matmul %10, %11, %cst_11 {dimension_numbers = #tpu.dot_dimension_numbers<[1], [0], [0], [1], [0, 0, 1, 1], [], []>} : vector<2x1024xf32>, vector<1024x512xf32>, vector<2x512xf32> -> vector<2x512xf32>
    %14 = vector.broadcast %12 : vector<1x512xf32> to vector<2x512xf32>
    %15 = arith.addf %13, %14 : vector<2x512xf32>
    %cst_12 = arith.constant 0.000000e+00 : f32
    %16 = vector.broadcast %cst_12 : f32 to vector<2x512xf32>
    %17 = arith.cmpf oge, %15, %16 : vector<2x512xf32>
    %cst_13 = arith.constant 0.00999999977 : f32
    %18 = vector.broadcast %cst_13 : f32 to vector<2x512xf32>
    %19 = arith.mulf %18, %15 : vector<2x512xf32>
    %20 = arith.select %17, %15, %19 : vector<2x512xi1>, vector<2x512xf32>
    %c0_14 = arith.constant 0 : index
    %c0_15 = arith.constant 0 : index
    %21 = vector.load %arg5[%c0_14, %c0_15] : memref<512x32xf32, #tpu.memory_space<vmem>>, vector<512x32xf32>
    %c0_16 = arith.constant 0 : index
    %c0_17 = arith.constant 0 : index
    %22 = vector.load %arg6[%c0_16, %c0_17] : memref<1x32xf32, #tpu.memory_space<vmem>>, vector<1x32xf32>
    %cst_18 = arith.constant dense<0.000000e+00> : vector<2x32xf32>
    %23 = tpu.matmul %20, %21, %cst_18 {dimension_numbers = #tpu.dot_dimension_numbers<[1], [0], [0], [1], [0, 0, 1, 1], [], []>} : vector<2x512xf32>, vector<512x32xf32>, vector<2x32xf32> -> vector<2x32xf32>
    %24 = vector.broadcast %22 : vector<1x32xf32> to vector<2x32xf32>
    %25 = arith.addf %23, %24 : vector<2x32xf32>
    %cst_19 = arith.constant 0.000000e+00 : f32
    %26 = vector.broadcast %cst_19 : f32 to vector<2x32xf32>
    %27 = arith.maximumf %25, %26 : vector<2x32xf32>
    %c0_20 = arith.constant 0 : index
    %c0_21 = arith.constant 0 : index
    %28 = vector.load %arg7[%c0_20, %c0_21] : memref<32x32xf32, #tpu.memory_space<vmem>>, vector<32x32xf32>
    %c0_22 = arith.constant 0 : index
    %c0_23 = arith.constant 0 : index
    %29 = vector.load %arg8[%c0_22, %c0_23] : memref<1x32xf32, #tpu.memory_space<vmem>>, vector<1x32xf32>
    %cst_24 = arith.constant dense<0.000000e+00> : vector<2x32xf32>
    %30 = tpu.matmul %27, %28, %cst_24 {dimension_numbers = #tpu.dot_dimension_numbers<[1], [0], [0], [1], [0, 0, 1, 1], [], []>} : vector<2x32xf32>, vector<32x32xf32>, vector<2x32xf32> -> vector<2x32xf32>
    %31 = vector.broadcast %29 : vector<1x32xf32> to vector<2x32xf32>
    %32 = arith.addf %30, %31 : vector<2x32xf32>
    %cst_25 = arith.constant 0.000000e+00 : f32
    %33 = vector.broadcast %cst_25 : f32 to vector<2x32xf32>
    %34 = arith.maximumf %32, %33 : vector<2x32xf32>
    %c0_26 = arith.constant 0 : index
    %c0_27 = arith.constant 0 : index
    %35 = vector.load %arg9[%c0_26, %c0_27] : memref<32x10xf32, #tpu.memory_space<vmem>>, vector<32x10xf32>
    %c0_28 = arith.constant 0 : index
    %c0_29 = arith.constant 0 : index
    %36 = vector.load %arg10[%c0_28, %c0_29] : memref<1x10xf32, #tpu.memory_space<vmem>>, vector<1x10xf32>
    %cst_30 = arith.constant dense<0.000000e+00> : vector<2x10xf32>
    %37 = tpu.matmul %34, %35, %cst_30 {dimension_numbers = #tpu.dot_dimension_numbers<[1], [0], [0], [1], [0, 0, 1, 1], [], []>} : vector<2x32xf32>, vector<32x10xf32>, vector<2x10xf32> -> vector<2x10xf32>
    %38 = vector.broadcast %36 : vector<1x10xf32> to vector<2x10xf32>
    %39 = arith.addf %37, %38 : vector<2x10xf32>
    %cst_31 = arith.constant 0.000000e+00 : f32
    %40 = vector.broadcast %cst_31 : f32 to vector<2x10xf32>
    %41 = arith.maximumf %39, %40 : vector<2x10xf32>
    %cst_32 = arith.constant dense<0xFF800000> : vector<10xf32>
    %42 = vector.multi_reduction <maximumf>, %41, %cst_32 [0] : vector<2x10xf32> to vector<10xf32>
    %43 = vector.shape_cast %42 : vector<10xf32> to vector<1x10xf32>
    %44 = vector.broadcast %43 : vector<1x10xf32> to vector<2x10xf32>
    %45 = arith.subf %41, %44 : vector<2x10xf32>
    %46 = math.exp %45 : vector<2x10xf32>
    %cst_33 = arith.constant dense<0.000000e+00> : vector<10xf32>
    %47 = vector.multi_reduction <add>, %46, %cst_33 [0] : vector<2x10xf32> to vector<10xf32>
    %48 = vector.shape_cast %47 : vector<10xf32> to vector<1x10xf32>
    %49 = math.log %48 : vector<1x10xf32>
    %50 = arith.addf %43, %49 : vector<1x10xf32>
    %51 = vector.broadcast %50 : vector<1x10xf32> to vector<2x10xf32>
    %52 = arith.subf %41, %51 : vector<2x10xf32>
    %c0_34 = arith.constant 0 : index
    %c0_35 = arith.constant 0 : index
    %53 = vector.load %arg11[%c0_34, %c0_35] : memref<2x10xf32, #tpu.memory_space<vmem>>, vector<2x10xf32>
    tpu.vector_store %arg11[%c0_34, %c0_35], %52 {strides = array<i32>} : memref<2x10xf32, #tpu.memory_space<vmem>>, vector<2x10xf32>,
    return
  }
}

</mosaic_0001>

<bundles_post_ra>
// kernel: _lambda_.1
= control target key start
LH: loop header
LB: loop body
LE: loop exit
PB: predicated region body
PF: predicated region fallthrough
CT: control target
= control target key end

     0   :  { %16 = vsyncpa [#allocation3], 0  ;;  %s3592_s0 = inlined_call_operand.vmem [shape: f32[2,512], index: 0, kind: input, shape index: {}]   ;;  %s3593_s1 = inlined_call_operand.hbm [shape: f32[512,1024], index: 1, kind: input, shape index: {}]   ;;  %s3594_s2 = inlined_call_operand.hbm [shape: f32[1,1024], index: 2, kind: input, shape index: {}]   ;;  %s3595_s3 = inlined_call_operand.hbm [shape: f32[1024,512], index: 3, kind: input, shape index: {}]   ;;  %s3596_s4 = inlined_call_operand.hbm [shape: f32[1,512], index: 4, kind: input, shape index: {}]   ;;  %s3597_s5 = inlined_call_operand.vmem [shape: f32[512,32], index: 5, kind: input, shape index: {}]   ;;  %s3598_s6 = inlined_call_operand.hbm [shape: f32[1,32], index: 6, kind: input, shape index: {}]   ;;  %s3599_s7 = inlined_call_operand.hbm [shape: f32[32,32], index: 7, kind: input, shape index: {}]   ;;  %s3600_s8 = inlined_call_operand.hbm [shape: f32[1,32], index: 8, kind: input, shape index: {}]   ;;  %s3601_s9 = inlined_call_operand.vmem [shape: f32[32,10], index: 9, kind: input, shape index: {}]   ;;  %s3602_s10 = inlined_call_operand.hbm [shape: f32[1,10], index: 10, kind: input, shape index: {}]   ;;  %s3603_s11 = inlined_call_operand.hbm [shape: f32[2,10], index: 11, kind: output, shape index: {}]  }
   0x1   :  { %17 = vsyncpa [#allocation6], 0 }
   0x2   :  { %18 = vsyncpa [#allocation9], 0 }
   0x3   :  { %19 = vsyncpa [#allocation12], 0 }
   0x4   :  { %20 = vsyncpa [#allocation15], 0 }
   0x5   :  { %21 = vsyncpa [#allocation4], 0  ;;  %s3169_s17 = smov [#allocation5]   ;;  %s3170_s19 = smov [#allocation8]  }
   0x6   :  { %s42_s18 = sshll.u32 %s3169_s17, 4  ;;  %s64_s20 = sshll.u32 %s3170_s19, 4  ;;  %s43_s18 = int_to_ptr.vmem [resolvable:$true] %s42_s18  ;;  %s65_s20 = int_to_ptr.vmem [resolvable:$true] %s64_s20 }
   0x7   :  { %s2985_s21 = scalar_lea.vmem %s43_s18, 128  ;;  %p2990_p1 = scmp.lt.s32.totalorder %s43_s18, %s43_s18 }
   0x8   :  { %p2986_p0 = scmp.ne.s32.totalorder %s43_s18, %s2985_s21  ;;  %p2991_p2 = scmp.lt.s32.totalorder %s2985_s21, %s2985_s21 }
   0xa   :  { %p2992_p3 = por %p2991_p2, %p2990_p1 }
   0xc   :  { %p2993_p4 = pnand %p2992_p3, %p2986_p0 }
   0xe   :  { %2996 = shalt.err (!%p2993_p4)
}
   0xf   :  { %45 = dma.hbm_to_vmem [thread:$0]  %s3594_s2, 128, %s43_s18, [#allocation6]  }
  0x10   :  { %s3005_s24 = scalar_lea.vmem %s65_s20, 64  ;;  %p3010_p6 = scmp.lt.s32.totalorder %s65_s20, %s65_s20 }
  0x11   :  { %p3006_p5 = scmp.ne.s32.totalorder %s65_s20, %s3005_s24  ;;  %p3011_p7 = scmp.lt.s32.totalorder %s3005_s24, %s3005_s24 }
  0x13   :  { %p3012_p8 = por %p3011_p7, %p3010_p6 }
  0x15   :  { %p3013_p9 = pnand %p3012_p8, %p3006_p5 }
  0x17   :  { %3016 = shalt.err (!%p3013_p9)
}
  0x18   :  { %67 = dma.hbm_to_vmem [thread:$0]  %s3596_s4, 64, %s65_s20, [#allocation9]  }
  0x19   :  { %s3171_s27 = smov [#allocation11]  }
  0x1a   :  { %s85_s28 = sshll.u32 %s3171_s27, 4  ;;  %s86_s28 = int_to_ptr.vmem [resolvable:$true] %s85_s28 }
  0x1b   :  { %s3025_s29 = scalar_lea.vmem %s86_s28, 512  ;;  %p3030_p11 = scmp.lt.s32.totalorder %s86_s28, %s86_s28 }
  0x1c   :  { %p3026_p10 = scmp.ne.s32.totalorder %s86_s28, %s3025_s29  ;;  %p3031_p12 = scmp.lt.s32.totalorder %s3025_s29, %s3025_s29 }
  0x1e   :  { %p3032_p13 = por %p3031_p12, %p3030_p11 }
  0x20   :  { %p3033_p0 = pnand %p3032_p13, %p3026_p10 }
  0x22   :  { %3036 = shalt.err (!%p3033_p0)
}
  0x23   :  { %s3172_s2 = smov 128   ;;  %s3173_s30 = smov 8  }
  0x24   :  { %91 = dma.hbm_to_vmem [thread:$0]  %s3599_s7, 512, %s86_s28, [#allocation12], %s3172_s2, %s3172_s2, %s3173_s30  }
  0x25   :  { %s3174_s14 = smov [#allocation2]  }
  0x26   :  { %s29_s15 = sshll.u32 %s3174_s14, 4  ;;  %s30_s15 = int_to_ptr.vmem [resolvable:$true] %s29_s15 }
  0x27   :  { %s3045_s4 = scalar_lea.vmem %s30_s15, 65536  ;;  %p3050_p2 = scmp.lt.s32.totalorder %s30_s15, %s30_s15 }
  0x28   :  { %p3046_p1 = scmp.ne.s32.totalorder %s30_s15, %s3045_s4  ;;  %p3051_p3 = scmp.lt.s32.totalorder %s3045_s4, %s3045_s4 }
  0x2a   :  { %p3052_p4 = por %p3051_p3, %p3050_p2 }
  0x2c   :  { %p3053_p5 = pnand %p3052_p4, %p3046_p1 }
  0x2e   :  { %3056 = shalt.err (!%p3053_p5)
}
  0x2f   :  { %s3175_s16 = smov 1024   ;;  %s3176_s17 = smov 64  }
  0x30   :  { %35 = dma.hbm_to_vmem [thread:$0]  %s3593_s1, 65536, %s30_s15, [#allocation3], %s3175_s16, %s3175_s16, %s3176_s17  }
  0x31   :  { %s3177_s20 = smov [#allocation7]  }
  0x32   :  { %s51_s21 = sshll.u32 %s3177_s20, 4  ;;  %s52_s21 = int_to_ptr.vmem [resolvable:$true] %s51_s21 }
  0x33   :  { %s3065_s7 = scalar_lea.vmem %s52_s21, 65536  ;;  %p3070_p7 = scmp.lt.s32.totalorder %s52_s21, %s52_s21 }
  0x34   :  { %p3066_p6 = scmp.ne.s32.totalorder %s52_s21, %s3065_s7  ;;  %p3071_p8 = scmp.lt.s32.totalorder %s3065_s7, %s3065_s7 }
  0x36   :  { %p3072_p9 = por %p3071_p8, %p3070_p7 }
  0x38   :  { %p3073_p10 = pnand %p3072_p9, %p3066_p6 }
  0x3a   :  { %3076 = shalt.err (!%p3073_p10)
}
  0x3b   :  { %s3178_s22 = smov 512   ;;  %s3179_s23 = smov 32  }
  0x3c   :  { %57 = dma.hbm_to_vmem [thread:$0]  %s3595_s3, 65536, %s52_s21, [#allocation6], %s3178_s22, %s3178_s22, %s3179_s23  }
  0x3d   :  { %s3180_s26 = smov [#allocation10]   ;;  %s3181_s1 = smov [#allocation13]  }
  0x3e   :  { %s76_s27 = sshll.u32 %s3180_s26, 4  ;;  %s98_s28 = sshll.u32 %s3181_s1, 4  ;;  %s77_s27 = int_to_ptr.vmem [resolvable:$true] %s76_s27  ;;  %s99_s28 = int_to_ptr.vmem [resolvable:$true] %s98_s28 }
  0x3f   :  { %s3085_s29 = scalar_lea.vmem %s77_s27, 16  ;;  %s3089_s2 = scalar_lea.vmem %s77_s27, 32 }
  0x40   :  { %p3086_p11 = scmp.ne.s32.totalorder %s77_s27, %s3085_s29  ;;  %p3090_p12 = scmp.lt.s32.totalorder %s77_s27, %s77_s27 }
  0x41   :  { %p3091_p13 = scmp.lt.s32.totalorder %s3089_s2, %s3085_s29 }
  0x43   :  { %p3092_p0 = por %p3091_p13, %p3090_p12 }
  0x45   :  { %p3093_p1 = pnand %p3092_p0, %p3086_p11 }
  0x47   :  { %3096 = shalt.err (!%p3093_p1)
}
  0x48   :  { %79 = dma.hbm_to_vmem [thread:$0]  %s3598_s6, 16, %s77_s27, [#allocation9]  }
  0x49   :  { %s3105_s13 = scalar_lea.vmem %s99_s28, 16  ;;  %s3109_s3 = scalar_lea.vmem %s99_s28, 32 }
  0x4a   :  { %p3106_p2 = scmp.ne.s32.totalorder %s99_s28, %s3105_s13  ;;  %p3110_p3 = scmp.lt.s32.totalorder %s99_s28, %s99_s28 }
  0x4b   :  { %p3111_p4 = scmp.lt.s32.totalorder %s3109_s3, %s3105_s13 }
  0x4d   :  { %p3112_p5 = por %p3111_p4, %p3110_p3 }
  0x4f   :  { %p3113_p6 = pnand %p3112_p5, %p3106_p2 }
  0x51   :  { %3116 = shalt.err (!%p3113_p6)
}
  0x52   :  { %101 = dma.hbm_to_vmem [thread:$0]  %s3600_s8, 16, %s99_s28, [#allocation12]  }
  0x53   :  { %s3182_s4 = smov [#allocation14]  }
  0x54   :  { %s110_s16 = sshll.u32 %s3182_s4, 4  ;;  %s111_s16 = int_to_ptr.vmem [resolvable:$true] %s110_s16 }
  0x55   :  { %s3125_s17 = scalar_lea.vmem %s111_s16, 16  ;;  %s3129_s18 = scalar_lea.vmem %s111_s16, 32 }
  0x56   :  { %p3126_p7 = scmp.ne.s32.totalorder %s111_s16, %s3125_s17  ;;  %p3130_p8 = scmp.lt.s32.totalorder %s111_s16, %s111_s16 }
  0x57   :  { %p3131_p9 = scmp.lt.s32.totalorder %s3129_s18, %s3125_s17 }
  0x59   :  { %p3132_p10 = por %p3131_p9, %p3130_p8 }
  0x5b   :  { %p3133_p11 = pnand %p3132_p10, %p3126_p7 }
  0x5d   :  { %3136 = shalt.err (!%p3133_p11)
}
  0x5e   :  { %113 = dma.hbm_to_vmem [thread:$0]  %s3602_s10, 16, %s111_s16, [#allocation15]  }
  0x5f   :  { %3157 = dma.done.wait [#allocation3], 65536  }
  0x60   :  { %3158 = vsyncadd [#allocation3], 4294901760 }
  0x61   :  { %3159 = dma.done.wait [#allocation6], 65664  }
  0x62   :  { %3160 = vsyncadd [#allocation6], 4294901632 }
  0x63   :  { %3161 = dma.done.wait [#allocation9], 80  }
  0x64   :  { %3162 = vsyncadd [#allocation9], 4294967216 }
  0x65   :  { %3163 = dma.done.wait [#allocation12], 528  }
  0x66   :  { %3164 = vsyncadd [#allocation12], 4294966768 }
  0x67   :  { %3165 = dma.done.wait [#allocation15], 16  }
  0x68   :  { %3166 = vsyncadd [#allocation15], 4294967280  ;;  %v260_v0 = vld [vmem:[#allocation2 + $0x3c8] sm:$0xff]  ;;  %v259_v2 = vld [vmem:[#allocation2 + $0x3c0] sm:$0xff]  ;;  %vm3185_vm12 = vmmov 0   ;;  %vm2644_vm13 = vcmask 261120  }
  0x69   :  { %v516_v1 = vld [vmem:[#allocation2 + $0xbc8] sm:$0xff]  ;;  %715 = vmatprep.subr.mxu0 %v260_v0  ;;  %v515_v3 = vld [vmem:[#allocation2 + $0xbc0] sm:$0xff]  ;;  %vm2804_vm14 = vcmask 74752  }
  0x6a   :  { %786 = vmatprep.subr.mxu1 %v516_v1  ;;  %v252_v4 = vld [vmem:[#allocation2 + $0x388] sm:$0xff]  ;;  %716 = vmatpush1.msra.mxu0 %v259_v2  ;;  %v251_v6 = vld [vmem:[#allocation2 + $0x380] sm:$0xff] }
  0x6b   :  { %v508_v5 = vld [vmem:[#allocation2 + $0xb88] sm:$0xff]  ;;  %787 = vmatpush1.msra.mxu1 %v515_v3  ;;  %v507_v7 = vld [vmem:[#allocation2 + $0xb80] sm:$0xff]  ;;  %717 = vmatprep.subr.mxu0 %v252_v4 }
  0x6c   :  { %v244_v8 = vld [vmem:[#allocation2 + $0x348] sm:$0xff]  ;;  %788 = vmatprep.subr.mxu1 %v508_v5  ;;  %v243_v10 = vld [vmem:[#allocation2 + $0x340] sm:$0xff]  ;;  %718 = vmatpush1.msra.mxu0 %v251_v6 }
  0x6d   :  { %v500_v9 = vld [vmem:[#allocation2 + $0xb48] sm:$0xff]  ;;  %v499_v11 = vld [vmem:[#allocation2 + $0xb40] sm:$0xff]  ;;  %789 = vmatpush1.msra.mxu1 %v507_v7  ;;  %719 = vmatprep.subr.mxu0 %v244_v8 }
  0x6e   :  { %v236_v12 = vld [vmem:[#allocation2 + $0x308] sm:$0xff]  ;;  %790 = vmatprep.subr.mxu1 %v500_v9  ;;  %v235_v14 = vld [vmem:[#allocation2 + $0x300] sm:$0xff]  ;;  %720 = vmatpush1.msra.mxu0 %v243_v10 }
  0x6f   :  { %v492_v13 = vld [vmem:[#allocation2 + $0xb08] sm:$0xff]  ;;  %v491_v15 = vld [vmem:[#allocation2 + $0xb00] sm:$0xff]  ;;  %791 = vmatpush1.msra.mxu1 %v499_v11  ;;  %721 = vmatprep.subr.mxu0 %v236_v12 }
  0x70   :  { %v228_v16 = vld [vmem:[#allocation2 + $0x2c8] sm:$0xff]  ;;  %792 = vmatprep.subr.mxu1 %v492_v13  ;;  %v227_v18 = vld [vmem:[#allocation2 + $0x2c0] sm:$0xff]  ;;  %722 = vmatpush1.msra.mxu0 %v235_v14 }
  0x71   :  { %v484_v17 = vld [vmem:[#allocation2 + $0xac8] sm:$0xff]  ;;  %v483_v19 = vld [vmem:[#allocation2 + $0xac0] sm:$0xff]  ;;  %793 = vmatpush1.msra.mxu1 %v491_v15  ;;  %723 = vmatprep.subr.mxu0 %v228_v16 }
  0x72   :  { %v220_v20 = vld [vmem:[#allocation2 + $0x288] sm:$0xff]  ;;  %794 = vmatprep.subr.mxu1 %v484_v17  ;;  %v219_v22 = vld [vmem:[#allocation2 + $0x280] sm:$0xff]  ;;  %724 = vmatpush1.msra.mxu0 %v227_v18 }
  0x73   :  { %v476_v21 = vld [vmem:[#allocation2 + $0xa88] sm:$0xff]  ;;  %v475_v23 = vld [vmem:[#allocation2 + $0xa80] sm:$0xff]  ;;  %795 = vmatpush1.msra.mxu1 %v483_v19  ;;  %725 = vmatprep.subr.mxu0 %v220_v20 }
  0x74   :  { %v212_v24 = vld [vmem:[#allocation2 + $0x248] sm:$0xff]  ;;  %796 = vmatprep.subr.mxu1 %v476_v21  ;;  %v211_v26 = vld [vmem:[#allocation2 + $0x240] sm:$0xff]  ;;  %726 = vmatpush1.msra.mxu0 %v219_v22 }
  0x75   :  { %v468_v25 = vld [vmem:[#allocation2 + $0xa48] sm:$0xff]  ;;  %v467_v27 = vld [vmem:[#allocation2 + $0xa40] sm:$0xff]  ;;  %797 = vmatpush1.msra.mxu1 %v475_v23  ;;  %727 = vmatprep.subr.mxu0 %v212_v24 }
  0x76   :  { %v204_v28 = vld [vmem:[#allocation2 + $0x208] sm:$0xff]  ;;  %798 = vmatprep.subr.mxu1 %v468_v25  ;;  %v203_v30 = vld [vmem:[#allocation2 + $0x200] sm:$0xff]  ;;  %728 = vmatpush1.msra.mxu0 %v211_v26 }
  0x77   :  { %v460_v29 = vld [vmem:[#allocation2 + $0xa08] sm:$0xff]  ;;  %v459_v31 = vld [vmem:[#allocation2 + $0xa00] sm:$0xff]  ;;  %799 = vmatpush1.msra.mxu1 %v467_v27  ;;  %729 = vmatprep.subr.mxu0 %v204_v28 }
  0x78   :  { %v196_v32 = vld [vmem:[#allocation2 + $0x1c8] sm:$0xff]  ;;  %800 = vmatprep.subr.mxu1 %v460_v29  ;;  %v195_v34 = vld [vmem:[#allocation2 + $0x1c0] sm:$0xff]  ;;  %730 = vmatpush1.msra.mxu0 %v203_v30  ;;  %v653_v30 = vlaneseq }
  0x79   :  { %v452_v33 = vld [vmem:[#allocation2 + $0x9c8] sm:$0xff]  ;;  %v451_v35 = vld [vmem:[#allocation2 + $0x9c0] sm:$0xff]  ;;  %801 = vmatpush1.msra.mxu1 %v459_v31  ;;  %731 = vmatprep.subr.mxu0 %v196_v32  ;;  %v3183_v31 = vmov 1983009808  }
  0x7a   :  { %v188_v36 = vld [vmem:[#allocation2 + $0x188] sm:$0xff]  ;;  %802 = vmatprep.subr.mxu1 %v452_v33  ;;  %v187_v38 = vld [vmem:[#allocation2 + $0x180] sm:$0xff]  ;;  %732 = vmatpush1.msra.mxu0 %v195_v34  ;;  %v696_v32 = vunpack.c.l.s4 %v3183_v31  ;;  %v485_v31 = vld [vmem:[#allocation2 + $0xad0] sm:$0xff] }
  0x7b   :  { %v444_v37 = vld [vmem:[#allocation2 + $0x988] sm:$0xff]  ;;  %v443_v39 = vld [vmem:[#allocation2 + $0x980] sm:$0xff]  ;;  %803 = vmatpush1.msra.mxu1 %v451_v35  ;;  %733 = vmatprep.subr.mxu0 %v188_v36 }
  0x7c   :  { %v180_v40 = vld [vmem:[#allocation2 + $0x148] sm:$0xff]  ;;  %804 = vmatprep.subr.mxu1 %v444_v37  ;;  %v179_v42 = vld [vmem:[#allocation2 + $0x140] sm:$0xff]  ;;  %734 = vmatpush1.msra.mxu0 %v187_v38 }
  0x7d   :  { %v436_v41 = vld [vmem:[#allocation2 + $0x948] sm:$0xff]  ;;  %v435_v43 = vld [vmem:[#allocation2 + $0x940] sm:$0xff]  ;;  %805 = vmatpush1.msra.mxu1 %v443_v39  ;;  %735 = vmatprep.subr.mxu0 %v180_v40 }
  0x7e   :  { %v172_v44 = vld [vmem:[#allocation2 + $0x108] sm:$0xff]  ;;  %806 = vmatprep.subr.mxu1 %v436_v41  ;;  %v171_v46 = vld [vmem:[#allocation2 + $0x100] sm:$0xff]  ;;  %736 = vmatpush1.msra.mxu0 %v179_v42  ;;  %v3271_v41 = vshrl.u32 %v653_v30, 7  ;;  %v697_v42 = vunpack.c.0.s8 %v696_v32  ;;  %v229_v30 = vld [vmem:[#allocation2 + $0x2d0] sm:$0xff] }
  0x7f   :  { %v428_v45 = vld [vmem:[#allocation2 + $0x908] sm:$0xff]  ;;  %v427_v47 = vld [vmem:[#allocation2 + $0x900] sm:$0xff]  ;;  %807 = vmatpush1.msra.mxu1 %v435_v43  ;;  %737 = vmatprep.subr.mxu0 %v172_v44  ;;  %v222_v32 = vld [vmem:[#allocation2 + $0x298] sm:$0xff] }
  0x80   :  { %v164_v48 = vld [vmem:[#allocation2 + $0xc8] sm:$0xff]  ;;  %808 = vmatprep.subr.mxu1 %v428_v45  ;;  %v163_v50 = vld [vmem:[#allocation2 + $0xc0] sm:$0xff]  ;;  %738 = vmatpush1.msra.mxu0 %v171_v46 }
  0x81   :  { %v420_v49 = vld [vmem:[#allocation2 + $0x8c8] sm:$0xff]  ;;  %v419_v51 = vld [vmem:[#allocation2 + $0x8c0] sm:$0xff]  ;;  %809 = vmatpush1.msra.mxu1 %v427_v47  ;;  %739 = vmatprep.subr.mxu0 %v164_v48 }
  0x82   :  { %v156_v52 = vld [vmem:[#allocation2 + $0x88] sm:$0xff]  ;;  %810 = vmatprep.subr.mxu1 %v420_v49  ;;  %v155_v54 = vld [vmem:[#allocation2 + $0x80] sm:$0xff]  ;;  %740 = vmatpush1.msra.mxu0 %v163_v50 }
  0x83   :  { %v412_v53 = vld [vmem:[#allocation2 + $0x888] sm:$0xff]  ;;  %v411_v55 = vld [vmem:[#allocation2 + $0x880] sm:$0xff]  ;;  %811 = vmatpush1.msra.mxu1 %v419_v51  ;;  %741 = vmatprep.subr.mxu0 %v156_v52  ;;  %v700_v52 = vsub.s32 %v697_v42, %v3271_v41  ;;  %v462_v42 = vld [vmem:[#allocation2 + $0xa18] sm:$0xff] }
  0x84   :  { %v148_v56 = vld [vmem:[#allocation2 + $0x48] sm:$0xff]  ;;  %812 = vmatprep.subr.mxu1 %v412_v53  ;;  %v147_v58 = vld [vmem:[#allocation2 + $0x40] sm:$0xff]  ;;  %742 = vmatpush1.msra.mxu0 %v155_v54 }
  0x85   :  { %v404_v57 = vld [vmem:[#allocation2 + $0x848] sm:$0xff]  ;;  %v403_v59 = vld [vmem:[#allocation2 + $0x840] sm:$0xff]  ;;  %813 = vmatpush1.msra.mxu1 %v411_v55  ;;  %743 = vmatprep.subr.mxu0 %v148_v56 }
  0x86   :  { %v140_v60 = vld [vmem:[#allocation2 + $0x8] sm:$0xff]  ;;  %814 = vmatprep.subr.mxu1 %v404_v57  ;;  %v139_v62 = vld [vmem:[#allocation2] sm:$0xff]  ;;  %744 = vmatpush1.msra.mxu0 %v147_v58 }
  0x87   :  { %v396_v61 = vld [vmem:[#allocation2 + $0x808] sm:$0xff]  ;;  %v395_v63 = vld [vmem:[#allocation2 + $0x800] sm:$0xff]  ;;  %815 = vmatpush1.msra.mxu1 %v403_v59  ;;  %745 = vmatprep.subr.mxu0 %v140_v60 }
  0x88   :  { %v388_v0 = vld [vmem:[#allocation2 + $0x7c8] sm:$0xff]  ;;  %816 = vmatprep.subr.mxu1 %v396_v61  ;;  %v387_v2 = vld [vmem:[#allocation2 + $0x7c0] sm:$0xff]  ;;  %746 = vmatpush1.msra.mxu0 %v139_v62 }
  0x89   :  { %v644_v1 = vld [vmem:[#allocation2 + $0xfc8] sm:$0xff]  ;;  %v643_v3 = vld [vmem:[#allocation2 + $0xfc0] sm:$0xff]  ;;  %817 = vmatpush1.msra.mxu1 %v395_v63  ;;  %747 = vmatprep.subr.mxu0 %v388_v0 }
  0x8a   :  { %v380_v4 = vld [vmem:[#allocation2 + $0x788] sm:$0xff]  ;;  %818 = vmatprep.subr.mxu1 %v644_v1  ;;  %v379_v6 = vld [vmem:[#allocation2 + $0x780] sm:$0xff]  ;;  %748 = vmatpush2.msra.mxu0 %v387_v2 }
  0x8b   :  { %v636_v5 = vld [vmem:[#allocation2 + $0xf88] sm:$0xff]  ;;  %v635_v7 = vld [vmem:[#allocation2 + $0xf80] sm:$0xff]  ;;  %819 = vmatpush2.msra.mxu1 %v643_v3  ;;  %749 = vmatprep.subr.mxu0 %v380_v4 }
  0x8c   :  { %v372_v8 = vld [vmem:[#allocation2 + $0x748] sm:$0xff]  ;;  %820 = vmatprep.subr.mxu1 %v636_v5  ;;  %v371_v10 = vld [vmem:[#allocation2 + $0x740] sm:$0xff]  ;;  %750 = vmatpush2.msra.mxu0 %v379_v6 }
  0x8d   :  { %v628_v9 = vld [vmem:[#allocation2 + $0xf48] sm:$0xff]  ;;  %v627_v11 = vld [vmem:[#allocation2 + $0xf40] sm:$0xff]  ;;  %821 = vmatpush2.msra.mxu1 %v635_v7  ;;  %751 = vmatprep.subr.mxu0 %v372_v8 }
  0x8e   :  { %v364_v12 = vld [vmem:[#allocation2 + $0x708] sm:$0xff]  ;;  %822 = vmatprep.subr.mxu1 %v628_v9  ;;  %v363_v14 = vld [vmem:[#allocation2 + $0x700] sm:$0xff]  ;;  %752 = vmatpush2.msra.mxu0 %v371_v10 }
  0x8f   :  { %v620_v13 = vld [vmem:[#allocation2 + $0xf08] sm:$0xff]  ;;  %v619_v15 = vld [vmem:[#allocation2 + $0xf00] sm:$0xff]  ;;  %823 = vmatpush2.msra.mxu1 %v627_v11  ;;  %753 = vmatprep.subr.mxu0 %v364_v12  ;;  %v262_v12 = vld [vmem:[#allocation2 + $0x3d8] sm:$0xff] }
  0x90   :  { %v356_v16 = vld [vmem:[#allocation2 + $0x6c8] sm:$0xff]  ;;  %824 = vmatprep.subr.mxu1 %v620_v13  ;;  %v355_v18 = vld [vmem:[#allocation2 + $0x6c0] sm:$0xff]  ;;  %754 = vmatpush2.msra.mxu0 %v363_v14  ;;  %v518_v13 = vld [vmem:[#allocation2 + $0xbd8] sm:$0xff] }
  0x91   :  { %v612_v17 = vld [vmem:[#allocation2 + $0xec8] sm:$0xff]  ;;  %v611_v19 = vld [vmem:[#allocation2 + $0xec0] sm:$0xff]  ;;  %825 = vmatpush2.msra.mxu1 %v619_v15  ;;  %755 = vmatprep.subr.mxu0 %v356_v16  ;;  %v261_v14 = vld [vmem:[#allocation2 + $0x3d0] sm:$0xff] }
  0x92   :  { %v348_v20 = vld [vmem:[#allocation2 + $0x688] sm:$0xff]  ;;  %826 = vmatprep.subr.mxu1 %v612_v17  ;;  %v347_v22 = vld [vmem:[#allocation2 + $0x680] sm:$0xff]  ;;  %756 = vmatpush2.msra.mxu0 %v355_v18  ;;  %v517_v15 = vld [vmem:[#allocation2 + $0xbd0] sm:$0xff] }
  0x93   :  { %v604_v21 = vld [vmem:[#allocation2 + $0xe88] sm:$0xff]  ;;  %v603_v23 = vld [vmem:[#allocation2 + $0xe80] sm:$0xff]  ;;  %827 = vmatpush2.msra.mxu1 %v611_v19  ;;  %757 = vmatprep.subr.mxu0 %v348_v20  ;;  %v254_v16 = vld [vmem:[#allocation2 + $0x398] sm:$0xff] }
  0x94   :  { %v340_v24 = vld [vmem:[#allocation2 + $0x648] sm:$0xff]  ;;  %828 = vmatprep.subr.mxu1 %v604_v21  ;;  %v339_v26 = vld [vmem:[#allocation2 + $0x640] sm:$0xff]  ;;  %758 = vmatpush2.msra.mxu0 %v347_v22  ;;  %v510_v17 = vld [vmem:[#allocation2 + $0xb98] sm:$0xff] }
  0x95   :  { %v596_v25 = vld [vmem:[#allocation2 + $0xe48] sm:$0xff]  ;;  %v595_v27 = vld [vmem:[#allocation2 + $0xe40] sm:$0xff]  ;;  %829 = vmatpush2.msra.mxu1 %v603_v23  ;;  %759 = vmatprep.subr.mxu0 %v340_v24  ;;  %v253_v18 = vld [vmem:[#allocation2 + $0x390] sm:$0xff] }
  0x96   :  { %v332_v28 = vld [vmem:[#allocation2 + $0x608] sm:$0xff]  ;;  %830 = vmatprep.subr.mxu1 %v596_v25  ;;  %v331_v33 = vld [vmem:[#allocation2 + $0x600] sm:$0xff]  ;;  %760 = vmatpush2.msra.mxu0 %v339_v26  ;;  %v509_v19 = vld [vmem:[#allocation2 + $0xb90] sm:$0xff] }
  0x97   :  { %v588_v29 = vld [vmem:[#allocation2 + $0xe08] sm:$0xff]  ;;  %v587_v34 = vld [vmem:[#allocation2 + $0xe00] sm:$0xff]  ;;  %831 = vmatpush2.msra.mxu1 %v595_v27  ;;  %761 = vmatprep.subr.mxu0 %v332_v28  ;;  %v246_v20 = vld [vmem:[#allocation2 + $0x358] sm:$0xff] }
  0x98   :  { %v324_v35 = vld [vmem:[#allocation2 + $0x5c8] sm:$0xff]  ;;  %832 = vmatprep.subr.mxu1 %v588_v29  ;;  %v323_v37 = vld [vmem:[#allocation2 + $0x5c0] sm:$0xff]  ;;  %762 = vmatpush2.msra.mxu0 %v331_v33  ;;  %v502_v21 = vld [vmem:[#allocation2 + $0xb58] sm:$0xff] }
  0x99   :  { %v580_v36 = vld [vmem:[#allocation2 + $0xdc8] sm:$0xff]  ;;  %v579_v38 = vld [vmem:[#allocation2 + $0xdc0] sm:$0xff]  ;;  %833 = vmatpush2.msra.mxu1 %v587_v34  ;;  %763 = vmatprep.subr.mxu0 %v324_v35  ;;  %v245_v22 = vld [vmem:[#allocation2 + $0x350] sm:$0xff] }
  0x9a   :  { %v316_v39 = vld [vmem:[#allocation2 + $0x588] sm:$0xff]  ;;  %834 = vmatprep.subr.mxu1 %v580_v36  ;;  %v315_v43 = vld [vmem:[#allocation2 + $0x580] sm:$0xff]  ;;  %764 = vmatpush2.msra.mxu0 %v323_v37  ;;  %v501_v23 = vld [vmem:[#allocation2 + $0xb50] sm:$0xff] }
  0x9b   :  { %v572_v40 = vld [vmem:[#allocation2 + $0xd88] sm:$0xff]  ;;  %v571_v44 = vld [vmem:[#allocation2 + $0xd80] sm:$0xff]  ;;  %835 = vmatpush2.msra.mxu1 %v579_v38  ;;  %765 = vmatprep.subr.mxu0 %v316_v39  ;;  %v238_v24 = vld [vmem:[#allocation2 + $0x318] sm:$0xff] }
  0x9c   :  { %v308_v45 = vld [vmem:[#allocation2 + $0x548] sm:$0xff]  ;;  %836 = vmatprep.subr.mxu1 %v572_v40  ;;  %v307_v47 = vld [vmem:[#allocation2 + $0x540] sm:$0xff]  ;;  %766 = vmatpush2.msra.mxu0 %v315_v43  ;;  %v494_v25 = vld [vmem:[#allocation2 + $0xb18] sm:$0xff] }
  0x9d   :  { %v564_v46 = vld [vmem:[#allocation2 + $0xd48] sm:$0xff]  ;;  %v563_v48 = vld [vmem:[#allocation2 + $0xd40] sm:$0xff]  ;;  %837 = vmatpush2.msra.mxu1 %v571_v44  ;;  %767 = vmatprep.subr.mxu0 %v308_v45  ;;  %v237_v26 = vld [vmem:[#allocation2 + $0x310] sm:$0xff] }
  0x9e   :  { %v138_v49 = vld [vmem:[%s3592_s0] sm:$0xff]  ;;  %v300_v50 = vld [vmem:[#allocation2 + $0x508] sm:$0xff]  ;;  %838 = vmatprep.subr.mxu1 %v564_v46  ;;  %768 = vmatpush2.msra.mxu0 %v307_v47  ;;  %v493_v27 = vld [vmem:[#allocation2 + $0xb10] sm:$0xff] }
  0x9f   :  { %v556_v51 = vld [vmem:[#allocation2 + $0xd08] sm:$0xff]  ;;  %v299_v53 = vld [vmem:[#allocation2 + $0x500] sm:$0xff]  ;;  %839 = vmatpush2.msra.mxu1 %v563_v48  ;;  %v694_v57 = vcombine.high %v138_v49, %v138_v49  ;;  %769 = vmatprep.subr.mxu0 %v300_v50  ;;  %v3277_v62 = vrot.slane %v138_v49, %v700_v52  ;;  %v230_v28 = vld [vmem:[#allocation2 + $0x2d8] sm:$0xff] }
  0xa0   :  { %v555_v54 = vld [vmem:[#allocation2 + $0xd00] sm:$0xff]  ;;  %v292_v55 = vld [vmem:[#allocation2 + $0x4c8] sm:$0xff]  ;;  %840 = vmatprep.subr.mxu1 %v556_v51  ;;  %770 = vmatpush2.msra.mxu0 %v299_v53  ;;  %v486_v29 = vld [vmem:[#allocation2 + $0xad8] sm:$0xff] }
  0xa1   :  { %v548_v56 = vld [vmem:[#allocation2 + $0xcc8] sm:$0xff]  ;;  %v291_v58 = vld [vmem:[#allocation2 + $0x4c0] sm:$0xff]  ;;  %841 = vmatpush2.msra.mxu1 %v555_v54  ;;  %771 = vmatprep.subr.mxu0 %v292_v55  ;;  %v3279_v3 = vrot.slane %v694_v57, %v700_v52  ;;  %v3283_v8 = vcombine.high %v3277_v62, %v3277_v62  ;;  %v478_v33 = vld [vmem:[#allocation2 + $0xa98] sm:$0xff] }
  0xa2   :  { %v547_v59 = vld [vmem:[#allocation2 + $0xcc0] sm:$0xff]  ;;  %v284_v60 = vld [vmem:[#allocation2 + $0x488] sm:$0xff]  ;;  %842 = vmatprep.subr.mxu1 %v548_v56  ;;  %772 = vmatpush2.msra.mxu0 %v291_v58  ;;  %v221_v34 = vld [vmem:[#allocation2 + $0x290] sm:$0xff] }
  0xa3   :  { %v540_v61 = vld [vmem:[#allocation2 + $0xc88] sm:$0xff]  ;;  %v283_v63 = vld [vmem:[#allocation2 + $0x480] sm:$0xff]  ;;  %843 = vmatpush2.msra.mxu1 %v547_v59  ;;  %773 = vmatprep.subr.mxu0 %v284_v60  ;;  %v3287_v11 = vcombine.high %v3279_v3, %v3279_v3  ;;  %v477_v35 = vld [vmem:[#allocation2 + $0xa90] sm:$0xff] }
  0xa4   :  { %v539_v0 = vld [vmem:[#allocation2 + $0xc80] sm:$0xff]  ;;  %v276_v1 = vld [vmem:[#allocation2 + $0x448] sm:$0xff]  ;;  %844 = vmatprep.subr.mxu1 %v540_v61  ;;  %774 = vmatpush2.msra.mxu0 %v283_v63  ;;  %v214_v36 = vld [vmem:[#allocation2 + $0x258] sm:$0xff] }
  0xa5   :  { %v532_v2 = vld [vmem:[#allocation2 + $0xc48] sm:$0xff]  ;;  %v275_v4 = vld [vmem:[#allocation2 + $0x440] sm:$0xff]  ;;  %845 = vmatpush2.msra.mxu1 %v539_v0  ;;  %775 = vmatprep.subr.mxu0 %v276_v1  ;;  %v470_v37 = vld [vmem:[#allocation2 + $0xa58] sm:$0xff] }
  0xa6   :  { %v531_v5 = vld [vmem:[#allocation2 + $0xc40] sm:$0xff]  ;;  %v268_v6 = vld [vmem:[#allocation2 + $0x408] sm:$0xff]  ;;  %846 = vmatprep.subr.mxu1 %v532_v2  ;;  %776 = vmatpush2.msra.mxu0 %v275_v4  ;;  %v213_v38 = vld [vmem:[#allocation2 + $0x250] sm:$0xff] }
  0xa7   :  { %v524_v7 = vld [vmem:[#allocation2 + $0xc08] sm:$0xff]  ;;  %v267_v9 = vld [vmem:[#allocation2 + $0x400] sm:$0xff]  ;;  %847 = vmatpush2.msra.mxu1 %v531_v5  ;;  %777 = vmatprep.subr.mxu0 %v268_v6  ;;  %v469_v39 = vld [vmem:[#allocation2 + $0xa50] sm:$0xff] }
  0xa8   :  { %v523_v10 = vld [vmem:[#allocation2 + $0xc00] sm:$0xff]  ;;  %848 = vmatprep.subr.mxu1 %v524_v7  ;;  %778 = vmatpush2.msra.mxu0 %v267_v9  ;;  %v206_v40 = vld [vmem:[#allocation2 + $0x218] sm:$0xff]  ;;  %v205_v43 = vld [vmem:[#allocation2 + $0x210] sm:$0xff] }
  0xa9   :  { %779 = vmatprep.mubr.f32.mxu0 %v3283_v8  ;;  %849 = vmatpush2.msra.mxu1 %v523_v10  ;;  %v461_v44 = vld [vmem:[#allocation2 + $0xa10] sm:$0xff]  ;;  %v198_v45 = vld [vmem:[#allocation2 + $0x1d8] sm:$0xff] }
  0xaa   :  { %780 = vmatmul.mubr.f32.vlgmr.msra.gmra.mxu0 %v3277_v62  ;;  %850 = vmatprep.mubr.f32.mxu1 %v3287_v11  ;;  %v454_v46 = vld [vmem:[#allocation2 + $0x9d8] sm:$0xff]  ;;  %v197_v47 = vld [vmem:[#allocation2 + $0x1d0] sm:$0xff] }
  0xab   :  { %857 = vmatprep.subr.mxu0 %v262_v12  ;;  %928 = vmatprep.subr.mxu1 %v518_v13  ;;  %v453_v48 = vld [vmem:[#allocation2 + $0x9d0] sm:$0xff]  ;;  %v190_v49 = vld [vmem:[#allocation2 + $0x198] sm:$0xff] }
  0xac   :  { %851 = vmatmul.mubr.f32.vlgmr.msra.gmra.mxu1 %v3279_v3  ;;  %858 = vmatpush1.msra.mxu0 %v261_v14  ;;  %v446_v50 = vld [vmem:[#allocation2 + $0x998] sm:$0xff]  ;;  %v189_v51 = vld [vmem:[#allocation2 + $0x190] sm:$0xff] }
  0xad   :  { %929 = vmatpush1.msra.mxu1 %v517_v15  ;;  %859 = vmatprep.subr.mxu0 %v254_v16  ;;  %v445_v52 = vld [vmem:[#allocation2 + $0x990] sm:$0xff]  ;;  %v182_v53 = vld [vmem:[#allocation2 + $0x158] sm:$0xff] }
  0xae   :  { %930 = vmatprep.subr.mxu1 %v510_v17  ;;  %860 = vmatpush1.msra.mxu0 %v253_v18  ;;  %v438_v54 = vld [vmem:[#allocation2 + $0x958] sm:$0xff]  ;;  %v181_v55 = vld [vmem:[#allocation2 + $0x150] sm:$0xff] }
  0xaf   :  { %931 = vmatpush1.msra.mxu1 %v509_v19  ;;  %861 = vmatprep.subr.mxu0 %v246_v20  ;;  %v437_v56 = vld [vmem:[#allocation2 + $0x950] sm:$0xff]  ;;  %v174_v57 = vld [vmem:[#allocation2 + $0x118] sm:$0xff] }
  0xb0   :  { %932 = vmatprep.subr.mxu1 %v502_v21  ;;  %862 = vmatpush1.msra.mxu0 %v245_v22  ;;  %v430_v58 = vld [vmem:[#allocation2 + $0x918] sm:$0xff]  ;;  %v173_v59 = vld [vmem:[#allocation2 + $0x110] sm:$0xff] }
  0xb1   :  { %933 = vmatpush1.msra.mxu1 %v501_v23  ;;  %863 = vmatprep.subr.mxu0 %v238_v24  ;;  %v429_v60 = vld [vmem:[#allocation2 + $0x910] sm:$0xff]  ;;  %v166_v61 = vld [vmem:[#allocation2 + $0xd8] sm:$0xff] }
  0xb2   :  { %934 = vmatprep.subr.mxu1 %v494_v25  ;;  %864 = vmatpush1.msra.mxu0 %v237_v26  ;;  %v422_v63 = vld [vmem:[#allocation2 + $0x8d8] sm:$0xff]  ;;  %v165_v0 = vld [vmem:[#allocation2 + $0xd0] sm:$0xff] }
  0xb3   :  { %935 = vmatpush1.msra.mxu1 %v493_v27  ;;  %865 = vmatprep.subr.mxu0 %v230_v28  ;;  %v421_v1 = vld [vmem:[#allocation2 + $0x8d0] sm:$0xff]  ;;  %v158_v2 = vld [vmem:[#allocation2 + $0x98] sm:$0xff] }
  0xb4   :  { %936 = vmatprep.subr.mxu1 %v486_v29  ;;  %866 = vmatpush1.msra.mxu0 %v229_v30  ;;  %v414_v4 = vld [vmem:[#allocation2 + $0x898] sm:$0xff]  ;;  %v157_v5 = vld [vmem:[#allocation2 + $0x90] sm:$0xff] }
  0xb5   :  { %937 = vmatpush1.msra.mxu1 %v485_v31  ;;  %867 = vmatprep.subr.mxu0 %v222_v32  ;;  %v413_v6 = vld [vmem:[#allocation2 + $0x890] sm:$0xff]  ;;  %v150_v7 = vld [vmem:[#allocation2 + $0x58] sm:$0xff] }
  0xb6   :  { %938 = vmatprep.subr.mxu1 %v478_v33  ;;  %868 = vmatpush1.msra.mxu0 %v221_v34  ;;  %v406_v9 = vld [vmem:[#allocation2 + $0x858] sm:$0xff]  ;;  %v149_v10 = vld [vmem:[#allocation2 + $0x50] sm:$0xff] }
  0xb7   :  { %939 = vmatpush1.msra.mxu1 %v477_v35  ;;  %869 = vmatprep.subr.mxu0 %v214_v36  ;;  %v405_v12 = vld [vmem:[#allocation2 + $0x850] sm:$0xff]  ;;  %v142_v13 = vld [vmem:[#allocation2 + $0x18] sm:$0xff] }
  0xb8   :  { %940 = vmatprep.subr.mxu1 %v470_v37  ;;  %870 = vmatpush1.msra.mxu0 %v213_v38  ;;  %v398_v14 = vld [vmem:[#allocation2 + $0x818] sm:$0xff]  ;;  %v141_v15 = vld [vmem:[#allocation2 + $0x10] sm:$0xff] }
  0xb9   :  { %941 = vmatpush1.msra.mxu1 %v469_v39  ;;  %871 = vmatprep.subr.mxu0 %v206_v40  ;;  %v397_v16 = vld [vmem:[#allocation2 + $0x810] sm:$0xff]  ;;  %v390_v17 = vld [vmem:[#allocation2 + $0x7d8] sm:$0xff] }
  0xba   :  { %942 = vmatprep.subr.mxu1 %v462_v42  ;;  %872 = vmatpush1.msra.mxu0 %v205_v43  ;;  %v646_v18 = vld [vmem:[#allocation2 + $0xfd8] sm:$0xff]  ;;  %v389_v19 = vld [vmem:[#allocation2 + $0x7d0] sm:$0xff] }
  0xbb   :  { %943 = vmatpush1.msra.mxu1 %v461_v44  ;;  %873 = vmatprep.subr.mxu0 %v198_v45  ;;  %v645_v20 = vld [vmem:[#allocation2 + $0xfd0] sm:$0xff]  ;;  %v382_v21 = vld [vmem:[#allocation2 + $0x798] sm:$0xff] }
  0xbc   :  { %944 = vmatprep.subr.mxu1 %v454_v46  ;;  %874 = vmatpush1.msra.mxu0 %v197_v47  ;;  %v638_v22 = vld [vmem:[#allocation2 + $0xf98] sm:$0xff]  ;;  %v381_v23 = vld [vmem:[#allocation2 + $0x790] sm:$0xff] }
  0xbd   :  { %945 = vmatpush1.msra.mxu1 %v453_v48  ;;  %875 = vmatprep.subr.mxu0 %v190_v49  ;;  %v637_v24 = vld [vmem:[#allocation2 + $0xf90] sm:$0xff]  ;;  %v374_v25 = vld [vmem:[#allocation2 + $0x758] sm:$0xff] }
  0xbe   :  { %946 = vmatprep.subr.mxu1 %v446_v50  ;;  %876 = vmatpush1.msra.mxu0 %v189_v51  ;;  %v630_v26 = vld [vmem:[#allocation2 + $0xf58] sm:$0xff]  ;;  %v373_v27 = vld [vmem:[#allocation2 + $0x750] sm:$0xff] }
  0xbf   :  { %947 = vmatpush1.msra.mxu1 %v445_v52  ;;  %877 = vmatprep.subr.mxu0 %v182_v53  ;;  %v629_v28 = vld [vmem:[#allocation2 + $0xf50] sm:$0xff]  ;;  %v366_v29 = vld [vmem:[#allocation2 + $0x718] sm:$0xff] }
  0xc0   :  { %948 = vmatprep.subr.mxu1 %v438_v54  ;;  %878 = vmatpush1.msra.mxu0 %v181_v55  ;;  %v622_v30 = vld [vmem:[#allocation2 + $0xf18] sm:$0xff]  ;;  %v365_v31 = vld [vmem:[#allocation2 + $0x710] sm:$0xff] }
  0xc1   :  { %949 = vmatpush1.msra.mxu1 %v437_v56  ;;  %879 = vmatprep.subr.mxu0 %v174_v57  ;;  %v621_v32 = vld [vmem:[#allocation2 + $0xf10] sm:$0xff]  ;;  %v358_v33 = vld [vmem:[#allocation2 + $0x6d8] sm:$0xff] }
  0xc2   :  { %950 = vmatprep.subr.mxu1 %v430_v58  ;;  %880 = vmatpush1.msra.mxu0 %v173_v59  ;;  %v614_v34 = vld [vmem:[#allocation2 + $0xed8] sm:$0xff]  ;;  %v357_v35 = vld [vmem:[#allocation2 + $0x6d0] sm:$0xff] }
  0xc3   :  { %951 = vmatpush1.msra.mxu1 %v429_v60  ;;  %881 = vmatprep.subr.mxu0 %v166_v61  ;;  %v613_v36 = vld [vmem:[#allocation2 + $0xed0] sm:$0xff]  ;;  %v350_v37 = vld [vmem:[#allocation2 + $0x698] sm:$0xff] }
  0xc4   :  { %952 = vmatprep.subr.mxu1 %v422_v63  ;;  %882 = vmatpush1.msra.mxu0 %v165_v0  ;;  %v606_v38 = vld [vmem:[#allocation2 + $0xe98] sm:$0xff]  ;;  %v349_v39 = vld [vmem:[#allocation2 + $0x690] sm:$0xff] }
  0xc5   :  { %953 = vmatpush1.msra.mxu1 %v421_v1  ;;  %883 = vmatprep.subr.mxu0 %v158_v2  ;;  %v605_v40 = vld [vmem:[#allocation2 + $0xe90] sm:$0xff]  ;;  %v342_v42 = vld [vmem:[#allocation2 + $0x658] sm:$0xff] }
  0xc6   :  { %954 = vmatprep.subr.mxu1 %v414_v4  ;;  %884 = vmatpush1.msra.mxu0 %v157_v5  ;;  %v598_v43 = vld [vmem:[#allocation2 + $0xe58] sm:$0xff]  ;;  %v341_v44 = vld [vmem:[#allocation2 + $0x650] sm:$0xff] }
  0xc7   :  { %955 = vmatpush1.msra.mxu1 %v413_v6  ;;  %885 = vmatprep.subr.mxu0 %v150_v7  ;;  %v597_v45 = vld [vmem:[#allocation2 + $0xe50] sm:$0xff]  ;;  %v334_v46 = vld [vmem:[#allocation2 + $0x618] sm:$0xff] }
  0xc8   :  { %956 = vmatprep.subr.mxu1 %v406_v9  ;;  %886 = vmatpush1.msra.mxu0 %v149_v10  ;;  %v590_v47 = vld [vmem:[#allocation2 + $0xe18] sm:$0xff]  ;;  %v333_v48 = vld [vmem:[#allocation2 + $0x610] sm:$0xff] }
  0xc9   :  { %957 = vmatpush1.msra.mxu1 %v405_v12  ;;  %887 = vmatprep.subr.mxu0 %v142_v13  ;;  %v589_v49 = vld [vmem:[#allocation2 + $0xe10] sm:$0xff]  ;;  %v326_v50 = vld [vmem:[#allocation2 + $0x5d8] sm:$0xff] }
  0xca   :  { %958 = vmatprep.subr.mxu1 %v398_v14  ;;  %888 = vmatpush1.msra.mxu0 %v141_v15  ;;  %v582_v51 = vld [vmem:[#allocation2 + $0xdd8] sm:$0xff]  ;;  %v325_v52 = vld [vmem:[#allocation2 + $0x5d0] sm:$0xff] }
  0xcb   :  { %959 = vmatpush1.msra.mxu1 %v397_v16  ;;  %889 = vmatprep.subr.mxu0 %v390_v17  ;;  %v581_v53 = vld [vmem:[#allocation2 + $0xdd0] sm:$0xff]  ;;  %v318_v54 = vld [vmem:[#allocation2 + $0x598] sm:$0xff] }
  0xcc   :  { %960 = vmatprep.subr.mxu1 %v646_v18  ;;  %890 = vmatpush2.msra.mxu0 %v389_v19  ;;  %v574_v55 = vld [vmem:[#allocation2 + $0xd98] sm:$0xff]  ;;  %v317_v56 = vld [vmem:[#allocation2 + $0x590] sm:$0xff] }
  0xcd   :  { %961 = vmatpush2.msra.mxu1 %v645_v20  ;;  %891 = vmatprep.subr.mxu0 %v382_v21  ;;  %v573_v57 = vld [vmem:[#allocation2 + $0xd90] sm:$0xff]  ;;  %v310_v58 = vld [vmem:[#allocation2 + $0x558] sm:$0xff] }
  0xce   :  { %962 = vmatprep.subr.mxu1 %v638_v22  ;;  %892 = vmatpush2.msra.mxu0 %v381_v23  ;;  %v566_v59 = vld [vmem:[#allocation2 + $0xd58] sm:$0xff]  ;;  %v309_v60 = vld [vmem:[#allocation2 + $0x550] sm:$0xff]  ;;  %v264_v22 = vld [vmem:[#allocation2 + $0x3e8] sm:$0xff] }
  0xcf   :  { %963 = vmatpush2.msra.mxu1 %v637_v24  ;;  %893 = vmatprep.subr.mxu0 %v374_v25  ;;  %v565_v61 = vld [vmem:[#allocation2 + $0xd50] sm:$0xff]  ;;  %v302_v63 = vld [vmem:[#allocation2 + $0x518] sm:$0xff]  ;;  %v520_v23 = vld [vmem:[#allocation2 + $0xbe8] sm:$0xff] }
  0xd0   :  { %964 = vmatprep.subr.mxu1 %v630_v26  ;;  %894 = vmatpush2.msra.mxu0 %v373_v27  ;;  %v558_v0 = vld [vmem:[#allocation2 + $0xd18] sm:$0xff]  ;;  %v301_v1 = vld [vmem:[#allocation2 + $0x510] sm:$0xff]  ;;  %v263_v24 = vld [vmem:[#allocation2 + $0x3e0] sm:$0xff] }
  0xd1   :  { %965 = vmatpush2.msra.mxu1 %v629_v28  ;;  %895 = vmatprep.subr.mxu0 %v366_v29  ;;  %v557_v2 = vld [vmem:[#allocation2 + $0xd10] sm:$0xff]  ;;  %v294_v4 = vld [vmem:[#allocation2 + $0x4d8] sm:$0xff]  ;;  %v519_v25 = vld [vmem:[#allocation2 + $0xbe0] sm:$0xff] }
  0xd2   :  { %966 = vmatprep.subr.mxu1 %v622_v30  ;;  %896 = vmatpush2.msra.mxu0 %v365_v31  ;;  %v550_v5 = vld [vmem:[#allocation2 + $0xcd8] sm:$0xff]  ;;  %v293_v6 = vld [vmem:[#allocation2 + $0x4d0] sm:$0xff]  ;;  %v256_v26 = vld [vmem:[#allocation2 + $0x3a8] sm:$0xff] }
  0xd3   :  { %967 = vmatpush2.msra.mxu1 %v621_v32  ;;  %897 = vmatprep.subr.mxu0 %v358_v33  ;;  %v549_v7 = vld [vmem:[#allocation2 + $0xcd0] sm:$0xff]  ;;  %v286_v9 = vld [vmem:[#allocation2 + $0x498] sm:$0xff]  ;;  %v512_v27 = vld [vmem:[#allocation2 + $0xba8] sm:$0xff] }
  0xd4   :  { %968 = vmatprep.subr.mxu1 %v614_v34  ;;  %898 = vmatpush2.msra.mxu0 %v357_v35  ;;  %v542_v10 = vld [vmem:[#allocation2 + $0xc98] sm:$0xff]  ;;  %v285_v12 = vld [vmem:[#allocation2 + $0x490] sm:$0xff]  ;;  %v255_v28 = vld [vmem:[#allocation2 + $0x3a0] sm:$0xff] }
  0xd5   :  { %969 = vmatpush2.msra.mxu1 %v613_v36  ;;  %899 = vmatprep.subr.mxu0 %v350_v37  ;;  %v541_v13 = vld [vmem:[#allocation2 + $0xc90] sm:$0xff]  ;;  %v278_v14 = vld [vmem:[#allocation2 + $0x458] sm:$0xff]  ;;  %v511_v29 = vld [vmem:[#allocation2 + $0xba0] sm:$0xff] }
  0xd6   :  { %970 = vmatprep.subr.mxu1 %v606_v38  ;;  %900 = vmatpush2.msra.mxu0 %v349_v39  ;;  %v534_v15 = vld [vmem:[#allocation2 + $0xc58] sm:$0xff]  ;;  %v277_v16 = vld [vmem:[#allocation2 + $0x450] sm:$0xff]  ;;  %v248_v30 = vld [vmem:[#allocation2 + $0x368] sm:$0xff] }
  0xd7   :  { %971 = vmatpush2.msra.mxu1 %v605_v40  ;;  %901 = vmatprep.subr.mxu0 %v342_v42  ;;  %v533_v17 = vld [vmem:[#allocation2 + $0xc50] sm:$0xff]  ;;  %v270_v18 = vld [vmem:[#allocation2 + $0x418] sm:$0xff]  ;;  %v504_v31 = vld [vmem:[#allocation2 + $0xb68] sm:$0xff] }
  0xd8   :  { %972 = vmatprep.subr.mxu1 %v598_v43  ;;  %902 = vmatpush2.msra.mxu0 %v341_v44  ;;  %v526_v19 = vld [vmem:[#allocation2 + $0xc18] sm:$0xff]  ;;  %v269_v20 = vld [vmem:[#allocation2 + $0x410] sm:$0xff]  ;;  %v247_v32 = vld [vmem:[#allocation2 + $0x360] sm:$0xff] }
  0xd9   :  { %973 = vmatpush2.msra.mxu1 %v597_v45  ;;  %903 = vmatprep.subr.mxu0 %v334_v46  ;;  %v525_v21 = vld [vmem:[#allocation2 + $0xc10] sm:$0xff]  ;;  %v503_v33 = vld [vmem:[#allocation2 + $0xb60] sm:$0xff]  ;;  %v240_v34 = vld [vmem:[#allocation2 + $0x328] sm:$0xff] }
  0xda   :  { %974 = vmatprep.subr.mxu1 %v590_v47  ;;  %904 = vmatpush2.msra.mxu0 %v333_v48  ;;  %v496_v35 = vld [vmem:[#allocation2 + $0xb28] sm:$0xff]  ;;  %v239_v36 = vld [vmem:[#allocation2 + $0x320] sm:$0xff] }
  0xdb   :  { %975 = vmatpush2.msra.mxu1 %v589_v49  ;;  %905 = vmatprep.subr.mxu0 %v326_v50  ;;  %v495_v37 = vld [vmem:[#allocation2 + $0xb20] sm:$0xff]  ;;  %v232_v38 = vld [vmem:[#allocation2 + $0x2e8] sm:$0xff] }
  0xdc   :  { %976 = vmatprep.subr.mxu1 %v582_v51  ;;  %906 = vmatpush2.msra.mxu0 %v325_v52  ;;  %v488_v39 = vld [vmem:[#allocation2 + $0xae8] sm:$0xff]  ;;  %v231_v40 = vld [vmem:[#allocation2 + $0x2e0] sm:$0xff] }
  0xdd   :  { %977 = vmatpush2.msra.mxu1 %v581_v53  ;;  %907 = vmatprep.subr.mxu0 %v318_v54  ;;  %v487_v42 = vld [vmem:[#allocation2 + $0xae0] sm:$0xff]  ;;  %v224_v43 = vld [vmem:[#allocation2 + $0x2a8] sm:$0xff] }
  0xde   :  { %978 = vmatprep.subr.mxu1 %v574_v55  ;;  %908 = vmatpush2.msra.mxu0 %v317_v56  ;;  %v480_v44 = vld [vmem:[#allocation2 + $0xaa8] sm:$0xff]  ;;  %v223_v45 = vld [vmem:[#allocation2 + $0x2a0] sm:$0xff] }
  0xdf   :  { %979 = vmatpush2.msra.mxu1 %v573_v57  ;;  %909 = vmatprep.subr.mxu0 %v310_v58  ;;  %v479_v46 = vld [vmem:[#allocation2 + $0xaa0] sm:$0xff]  ;;  %v216_v47 = vld [vmem:[#allocation2 + $0x268] sm:$0xff] }
  0xe0   :  { %980 = vmatprep.subr.mxu1 %v566_v59  ;;  %910 = vmatpush2.msra.mxu0 %v309_v60  ;;  %v472_v48 = vld [vmem:[#allocation2 + $0xa68] sm:$0xff]  ;;  %v215_v49 = vld [vmem:[#allocation2 + $0x260] sm:$0xff] }
  0xe1   :  { %981 = vmatpush2.msra.mxu1 %v565_v61  ;;  %911 = vmatprep.subr.mxu0 %v302_v63  ;;  %v471_v50 = vld [vmem:[#allocation2 + $0xa60] sm:$0xff]  ;;  %v208_v51 = vld [vmem:[#allocation2 + $0x228] sm:$0xff] }
  0xe2   :  { %982 = vmatprep.subr.mxu1 %v558_v0  ;;  %912 = vmatpush2.msra.mxu0 %v301_v1  ;;  %v464_v52 = vld [vmem:[#allocation2 + $0xa28] sm:$0xff]  ;;  %v207_v53 = vld [vmem:[#allocation2 + $0x220] sm:$0xff] }
  0xe3   :  { %983 = vmatpush2.msra.mxu1 %v557_v2  ;;  %913 = vmatprep.subr.mxu0 %v294_v4  ;;  %v463_v54 = vld [vmem:[#allocation2 + $0xa20] sm:$0xff]  ;;  %v200_v55 = vld [vmem:[#allocation2 + $0x1e8] sm:$0xff] }
  0xe4   :  { %984 = vmatprep.subr.mxu1 %v550_v5  ;;  %914 = vmatpush2.msra.mxu0 %v293_v6  ;;  %v456_v56 = vld [vmem:[#allocation2 + $0x9e8] sm:$0xff]  ;;  %v199_v57 = vld [vmem:[#allocation2 + $0x1e0] sm:$0xff] }
  0xe5   :  { %985 = vmatpush2.msra.mxu1 %v549_v7  ;;  %915 = vmatprep.subr.mxu0 %v286_v9  ;;  %v455_v58 = vld [vmem:[#allocation2 + $0x9e0] sm:$0xff]  ;;  %v192_v59 = vld [vmem:[#allocation2 + $0x1a8] sm:$0xff] }
  0xe6   :  { %986 = vmatprep.subr.mxu1 %v542_v10  ;;  %916 = vmatpush2.msra.mxu0 %v285_v12  ;;  %v448_v60 = vld [vmem:[#allocation2 + $0x9a8] sm:$0xff]  ;;  %v191_v61 = vld [vmem:[#allocation2 + $0x1a0] sm:$0xff] }
  0xe7   :  { %987 = vmatpush2.msra.mxu1 %v541_v13  ;;  %917 = vmatprep.subr.mxu0 %v278_v14  ;;  %v447_v63 = vld [vmem:[#allocation2 + $0x9a0] sm:$0xff]  ;;  %v184_v0 = vld [vmem:[#allocation2 + $0x168] sm:$0xff] }
  0xe8   :  { %988 = vmatprep.subr.mxu1 %v534_v15  ;;  %918 = vmatpush2.msra.mxu0 %v277_v16  ;;  %v440_v1 = vld [vmem:[#allocation2 + $0x968] sm:$0xff]  ;;  %v183_v2 = vld [vmem:[#allocation2 + $0x160] sm:$0xff] }
  0xe9   :  { %989 = vmatpush2.msra.mxu1 %v533_v17  ;;  %919 = vmatprep.subr.mxu0 %v270_v18  ;;  %v439_v4 = vld [vmem:[#allocation2 + $0x960] sm:$0xff]  ;;  %v176_v5 = vld [vmem:[#allocation2 + $0x128] sm:$0xff] }
  0xea   :  { %990 = vmatprep.subr.mxu1 %v526_v19  ;;  %920 = vmatpush2.msra.mxu0 %v269_v20  ;;  %v432_v6 = vld [vmem:[#allocation2 + $0x928] sm:$0xff]  ;;  %v175_v7 = vld [vmem:[#allocation2 + $0x120] sm:$0xff] }
  0xeb   :  { %921 = vmatprep.mubr.f32.mxu0 %v3283_v8  ;;  %991 = vmatpush2.msra.mxu1 %v525_v21  ;;  %v431_v9 = vld [vmem:[#allocation2 + $0x920] sm:$0xff]  ;;  %v168_v10 = vld [vmem:[#allocation2 + $0xe8] sm:$0xff] }
  0xec   :  { %922 = vmatmul.mubr.f32.vlgmr.msra.gmra.mxu0 %v3277_v62  ;;  %992 = vmatprep.mubr.f32.mxu1 %v3287_v11  ;;  %v424_v12 = vld [vmem:[#allocation2 + $0x8e8] sm:$0xff]  ;;  %v167_v13 = vld [vmem:[#allocation2 + $0xe0] sm:$0xff] }
  0xed   :  { %999 = vmatprep.subr.mxu0 %v264_v22  ;;  %1070 = vmatprep.subr.mxu1 %v520_v23  ;;  %v423_v14 = vld [vmem:[#allocation2 + $0x8e0] sm:$0xff]  ;;  %v160_v15 = vld [vmem:[#allocation2 + $0xa8] sm:$0xff] }
  0xee   :  { %993 = vmatmul.mubr.f32.vlgmr.msra.gmra.mxu1 %v3279_v3  ;;  %1000 = vmatpush1.msra.mxu0 %v263_v24  ;;  %v416_v16 = vld [vmem:[#allocation2 + $0x8a8] sm:$0xff]  ;;  %v159_v17 = vld [vmem:[#allocation2 + $0xa0] sm:$0xff] }
  0xef   :  { %1071 = vmatpush1.msra.mxu1 %v519_v25  ;;  %1001 = vmatprep.subr.mxu0 %v256_v26  ;;  %v415_v18 = vld [vmem:[#allocation2 + $0x8a0] sm:$0xff]  ;;  %v152_v19 = vld [vmem:[#allocation2 + $0x68] sm:$0xff] }
  0xf0   :  { %1072 = vmatprep.subr.mxu1 %v512_v27  ;;  %1002 = vmatpush1.msra.mxu0 %v255_v28  ;;  %v408_v20 = vld [vmem:[#allocation2 + $0x868] sm:$0xff]  ;;  %v151_v21 = vld [vmem:[#allocation2 + $0x60] sm:$0xff] }
  0xf1   :  { %1073 = vmatpush1.msra.mxu1 %v511_v29  ;;  %1003 = vmatprep.subr.mxu0 %v248_v30  ;;  %v407_v22 = vld [vmem:[#allocation2 + $0x860] sm:$0xff]  ;;  %v144_v23 = vld [vmem:[#allocation2 + $0x28] sm:$0xff] }
  0xf2   :  { %1074 = vmatprep.subr.mxu1 %v504_v31  ;;  %1004 = vmatpush1.msra.mxu0 %v247_v32  ;;  %v400_v24 = vld [vmem:[#allocation2 + $0x828] sm:$0xff]  ;;  %v143_v25 = vld [vmem:[#allocation2 + $0x20] sm:$0xff] }
  0xf3   :  { %1075 = vmatpush1.msra.mxu1 %v503_v33  ;;  %1005 = vmatprep.subr.mxu0 %v240_v34  ;;  %v399_v26 = vld [vmem:[#allocation2 + $0x820] sm:$0xff]  ;;  %v392_v27 = vld [vmem:[#allocation2 + $0x7e8] sm:$0xff] }
  0xf4   :  { %1076 = vmatprep.subr.mxu1 %v496_v35  ;;  %1006 = vmatpush1.msra.mxu0 %v239_v36  ;;  %v648_v28 = vld [vmem:[#allocation2 + $0xfe8] sm:$0xff]  ;;  %v391_v29 = vld [vmem:[#allocation2 + $0x7e0] sm:$0xff] }
  0xf5   :  { %1077 = vmatpush1.msra.mxu1 %v495_v37  ;;  %1007 = vmatprep.subr.mxu0 %v232_v38  ;;  %v647_v30 = vld [vmem:[#allocation2 + $0xfe0] sm:$0xff]  ;;  %v384_v31 = vld [vmem:[#allocation2 + $0x7a8] sm:$0xff] }
  0xf6   :  { %1078 = vmatprep.subr.mxu1 %v488_v39  ;;  %1008 = vmatpush1.msra.mxu0 %v231_v40  ;;  %v640_v32 = vld [vmem:[#allocation2 + $0xfa8] sm:$0xff]  ;;  %v383_v33 = vld [vmem:[#allocation2 + $0x7a0] sm:$0xff] }
  0xf7   :  { %1079 = vmatpush1.msra.mxu1 %v487_v42  ;;  %1009 = vmatprep.subr.mxu0 %v224_v43  ;;  %v639_v34 = vld [vmem:[#allocation2 + $0xfa0] sm:$0xff]  ;;  %v376_v35 = vld [vmem:[#allocation2 + $0x768] sm:$0xff] }
  0xf8   :  { %1080 = vmatprep.subr.mxu1 %v480_v44  ;;  %1010 = vmatpush1.msra.mxu0 %v223_v45  ;;  %v632_v36 = vld [vmem:[#allocation2 + $0xf68] sm:$0xff]  ;;  %v375_v37 = vld [vmem:[#allocation2 + $0x760] sm:$0xff] }
  0xf9   :  { %1081 = vmatpush1.msra.mxu1 %v479_v46  ;;  %1011 = vmatprep.subr.mxu0 %v216_v47  ;;  %v631_v38 = vld [vmem:[#allocation2 + $0xf60] sm:$0xff]  ;;  %v368_v39 = vld [vmem:[#allocation2 + $0x728] sm:$0xff] }
  0xfa   :  { %1082 = vmatprep.subr.mxu1 %v472_v48  ;;  %1012 = vmatpush1.msra.mxu0 %v215_v49  ;;  %v624_v40 = vld [vmem:[#allocation2 + $0xf28] sm:$0xff]  ;;  %v367_v42 = vld [vmem:[#allocation2 + $0x720] sm:$0xff] }
  0xfb   :  { %1083 = vmatpush1.msra.mxu1 %v471_v50  ;;  %1013 = vmatprep.subr.mxu0 %v208_v51  ;;  %v623_v43 = vld [vmem:[#allocation2 + $0xf20] sm:$0xff]  ;;  %v360_v44 = vld [vmem:[#allocation2 + $0x6e8] sm:$0xff] }
  0xfc   :  { %1084 = vmatprep.subr.mxu1 %v464_v52  ;;  %1014 = vmatpush1.msra.mxu0 %v207_v53  ;;  %v616_v45 = vld [vmem:[#allocation2 + $0xee8] sm:$0xff]  ;;  %v359_v46 = vld [vmem:[#allocation2 + $0x6e0] sm:$0xff] }
  0xfd   :  { %1085 = vmatpush1.msra.mxu1 %v463_v54  ;;  %1015 = vmatprep.subr.mxu0 %v200_v55  ;;  %v615_v47 = vld [vmem:[#allocation2 + $0xee0] sm:$0xff]  ;;  %v352_v48 = vld [vmem:[#allocation2 + $0x6a8] sm:$0xff] }
  0xfe   :  { %1086 = vmatprep.subr.mxu1 %v456_v56  ;;  %1016 = vmatpush1.msra.mxu0 %v199_v57  ;;  %v608_v49 = vld [vmem:[#allocation2 + $0xea8] sm:$0xff]  ;;  %v351_v50 = vld [vmem:[#allocation2 + $0x6a0] sm:$0xff] }
  0xff   :  { %1087 = vmatpush1.msra.mxu1 %v455_v58  ;;  %1017 = vmatprep.subr.mxu0 %v192_v59  ;;  %v607_v51 = vld [vmem:[#allocation2 + $0xea0] sm:$0xff]  ;;  %v344_v52 = vld [vmem:[#allocation2 + $0x668] sm:$0xff] }
 0x100   :  { %1088 = vmatprep.subr.mxu1 %v448_v60  ;;  %1018 = vmatpush1.msra.mxu0 %v191_v61  ;;  %v600_v53 = vld [vmem:[#allocation2 + $0xe68] sm:$0xff]  ;;  %v343_v54 = vld [vmem:[#allocation2 + $0x660] sm:$0xff] }
 0x101   :  { %1089 = vmatpush1.msra.mxu1 %v447_v63  ;;  %1019 = vmatprep.subr.mxu0 %v184_v0  ;;  %v599_v55 = vld [vmem:[#allocation2 + $0xe60] sm:$0xff]  ;;  %v336_v56 = vld [vmem:[#allocation2 + $0x628] sm:$0xff] }
 0x102   :  { %1090 = vmatprep.subr.mxu1 %v440_v1  ;;  %1020 = vmatpush1.msra.mxu0 %v183_v2  ;;  %v592_v57 = vld [vmem:[#allocation2 + $0xe28] sm:$0xff]  ;;  %v335_v58 = vld [vmem:[#allocation2 + $0x620] sm:$0xff] }
 0x103   :  { %1091 = vmatpush1.msra.mxu1 %v439_v4  ;;  %1021 = vmatprep.subr.mxu0 %v176_v5  ;;  %v591_v59 = vld [vmem:[#allocation2 + $0xe20] sm:$0xff]  ;;  %v328_v60 = vld [vmem:[#allocation2 + $0x5e8] sm:$0xff] }
 0x104   :  { %1092 = vmatprep.subr.mxu1 %v432_v6  ;;  %1022 = vmatpush1.msra.mxu0 %v175_v7  ;;  %v584_v61 = vld [vmem:[#allocation2 + $0xde8] sm:$0xff]  ;;  %v327_v63 = vld [vmem:[#allocation2 + $0x5e0] sm:$0xff] }
 0x105   :  { %1093 = vmatpush1.msra.mxu1 %v431_v9  ;;  %1023 = vmatprep.subr.mxu0 %v168_v10  ;;  %v583_v0 = vld [vmem:[#allocation2 + $0xde0] sm:$0xff]  ;;  %v320_v1 = vld [vmem:[#allocation2 + $0x5a8] sm:$0xff] }
 0x106   :  { %1094 = vmatprep.subr.mxu1 %v424_v12  ;;  %1024 = vmatpush1.msra.mxu0 %v167_v13  ;;  %v576_v2 = vld [vmem:[#allocation2 + $0xda8] sm:$0xff]  ;;  %v319_v4 = vld [vmem:[#allocation2 + $0x5a0] sm:$0xff] }
 0x107   :  { %1095 = vmatpush1.msra.mxu1 %v423_v14  ;;  %1025 = vmatprep.subr.mxu0 %v160_v15  ;;  %v575_v5 = vld [vmem:[#allocation2 + $0xda0] sm:$0xff]  ;;  %v312_v6 = vld [vmem:[#allocation2 + $0x568] sm:$0xff] }
 0x108   :  { %1096 = vmatprep.subr.mxu1 %v416_v16  ;;  %1026 = vmatpush1.msra.mxu0 %v159_v17  ;;  %v568_v7 = vld [vmem:[#allocation2 + $0xd68] sm:$0xff]  ;;  %v311_v9 = vld [vmem:[#allocation2 + $0x560] sm:$0xff] }
 0x109   :  { %1097 = vmatpush1.msra.mxu1 %v415_v18  ;;  %1027 = vmatprep.subr.mxu0 %v152_v19  ;;  %v567_v10 = vld [vmem:[#allocation2 + $0xd60] sm:$0xff]  ;;  %v304_v12 = vld [vmem:[#allocation2 + $0x528] sm:$0xff] }
 0x10a   :  { %1098 = vmatprep.subr.mxu1 %v408_v20  ;;  %1028 = vmatpush1.msra.mxu0 %v151_v21  ;;  %v560_v13 = vld [vmem:[#allocation2 + $0xd28] sm:$0xff]  ;;  %v303_v14 = vld [vmem:[#allocation2 + $0x520] sm:$0xff] }
 0x10b   :  { %1099 = vmatpush1.msra.mxu1 %v407_v22  ;;  %1029 = vmatprep.subr.mxu0 %v144_v23  ;;  %v559_v15 = vld [vmem:[#allocation2 + $0xd20] sm:$0xff]  ;;  %v296_v16 = vld [vmem:[#allocation2 + $0x4e8] sm:$0xff] }
 0x10c   :  { %1100 = vmatprep.subr.mxu1 %v400_v24  ;;  %1030 = vmatpush1.msra.mxu0 %v143_v25  ;;  %v552_v17 = vld [vmem:[#allocation2 + $0xce8] sm:$0xff]  ;;  %v295_v18 = vld [vmem:[#allocation2 + $0x4e0] sm:$0xff] }
 0x10d   :  { %1101 = vmatpush1.msra.mxu1 %v399_v26  ;;  %1031 = vmatprep.subr.mxu0 %v392_v27  ;;  %v551_v19 = vld [vmem:[#allocation2 + $0xce0] sm:$0xff]  ;;  %v288_v20 = vld [vmem:[#allocation2 + $0x4a8] sm:$0xff] }
 0x10e   :  { %1102 = vmatprep.subr.mxu1 %v648_v28  ;;  %1032 = vmatpush2.msra.mxu0 %v391_v29  ;;  %v544_v21 = vld [vmem:[#allocation2 + $0xca8] sm:$0xff]  ;;  %v287_v22 = vld [vmem:[#allocation2 + $0x4a0] sm:$0xff] }
 0x10f   :  { %1103 = vmatpush2.msra.mxu1 %v647_v30  ;;  %1033 = vmatprep.subr.mxu0 %v384_v31  ;;  %v543_v23 = vld [vmem:[#allocation2 + $0xca0] sm:$0xff]  ;;  %v280_v24 = vld [vmem:[#allocation2 + $0x468] sm:$0xff] }
 0x110   :  { %1104 = vmatprep.subr.mxu1 %v640_v32  ;;  %1034 = vmatpush2.msra.mxu0 %v383_v33  ;;  %v536_v25 = vld [vmem:[#allocation2 + $0xc68] sm:$0xff]  ;;  %v279_v26 = vld [vmem:[#allocation2 + $0x460] sm:$0xff]  ;;  %v266_v32 = vld [vmem:[#allocation2 + $0x3f8] sm:$0xff] }
 0x111   :  { %1105 = vmatpush2.msra.mxu1 %v639_v34  ;;  %1035 = vmatprep.subr.mxu0 %v376_v35  ;;  %v535_v27 = vld [vmem:[#allocation2 + $0xc60] sm:$0xff]  ;;  %v272_v28 = vld [vmem:[#allocation2 + $0x428] sm:$0xff]  ;;  %v522_v33 = vld [vmem:[#allocation2 + $0xbf8] sm:$0xff] }
 0x112   :  { %1106 = vmatprep.subr.mxu1 %v632_v36  ;;  %1036 = vmatpush2.msra.mxu0 %v375_v37  ;;  %v528_v29 = vld [vmem:[#allocation2 + $0xc28] sm:$0xff]  ;;  %v271_v30 = vld [vmem:[#allocation2 + $0x420] sm:$0xff]  ;;  %v265_v34 = vld [vmem:[#allocation2 + $0x3f0] sm:$0xff] }
 0x113   :  { %1107 = vmatpush2.msra.mxu1 %v631_v38  ;;  %1037 = vmatprep.subr.mxu0 %v368_v39  ;;  %v527_v31 = vld [vmem:[#allocation2 + $0xc20] sm:$0xff]  ;;  %v521_v35 = vld [vmem:[#allocation2 + $0xbf0] sm:$0xff]  ;;  %v258_v36 = vld [vmem:[#allocation2 + $0x3b8] sm:$0xff] }
 0x114   :  { %1108 = vmatprep.subr.mxu1 %v624_v40  ;;  %1038 = vmatpush2.msra.mxu0 %v367_v42  ;;  %v514_v37 = vld [vmem:[#allocation2 + $0xbb8] sm:$0xff]  ;;  %v257_v38 = vld [vmem:[#allocation2 + $0x3b0] sm:$0xff] }
 0x115   :  { %1109 = vmatpush2.msra.mxu1 %v623_v43  ;;  %1039 = vmatprep.subr.mxu0 %v360_v44  ;;  %v513_v39 = vld [vmem:[#allocation2 + $0xbb0] sm:$0xff]  ;;  %v250_v40 = vld [vmem:[#allocation2 + $0x378] sm:$0xff] }
 0x116   :  { %1110 = vmatprep.subr.mxu1 %v616_v45  ;;  %1040 = vmatpush2.msra.mxu0 %v359_v46  ;;  %v506_v42 = vld [vmem:[#allocation2 + $0xb78] sm:$0xff]  ;;  %v249_v43 = vld [vmem:[#allocation2 + $0x370] sm:$0xff] }
 0x117   :  { %1111 = vmatpush2.msra.mxu1 %v615_v47  ;;  %1041 = vmatprep.subr.mxu0 %v352_v48  ;;  %v505_v44 = vld [vmem:[#allocation2 + $0xb70] sm:$0xff]  ;;  %v242_v45 = vld [vmem:[#allocation2 + $0x338] sm:$0xff] }
 0x118   :  { %1112 = vmatprep.subr.mxu1 %v608_v49  ;;  %1042 = vmatpush2.msra.mxu0 %v351_v50  ;;  %v498_v46 = vld [vmem:[#allocation2 + $0xb38] sm:$0xff]  ;;  %v241_v47 = vld [vmem:[#allocation2 + $0x330] sm:$0xff] }
 0x119   :  { %1113 = vmatpush2.msra.mxu1 %v607_v51  ;;  %1043 = vmatprep.subr.mxu0 %v344_v52  ;;  %v497_v48 = vld [vmem:[#allocation2 + $0xb30] sm:$0xff]  ;;  %v234_v49 = vld [vmem:[#allocation2 + $0x2f8] sm:$0xff] }
 0x11a   :  { %1114 = vmatprep.subr.mxu1 %v600_v53  ;;  %1044 = vmatpush2.msra.mxu0 %v343_v54  ;;  %v490_v50 = vld [vmem:[#allocation2 + $0xaf8] sm:$0xff]  ;;  %v233_v51 = vld [vmem:[#allocation2 + $0x2f0] sm:$0xff] }
 0x11b   :  { %1115 = vmatpush2.msra.mxu1 %v599_v55  ;;  %1045 = vmatprep.subr.mxu0 %v336_v56  ;;  %v489_v52 = vld [vmem:[#allocation2 + $0xaf0] sm:$0xff]  ;;  %v226_v53 = vld [vmem:[#allocation2 + $0x2b8] sm:$0xff] }
 0x11c   :  { %1116 = vmatprep.subr.mxu1 %v592_v57  ;;  %1046 = vmatpush2.msra.mxu0 %v335_v58  ;;  %v482_v54 = vld [vmem:[#allocation2 + $0xab8] sm:$0xff]  ;;  %v225_v55 = vld [vmem:[#allocation2 + $0x2b0] sm:$0xff] }
 0x11d   :  { %1117 = vmatpush2.msra.mxu1 %v591_v59  ;;  %1047 = vmatprep.subr.mxu0 %v328_v60  ;;  %v481_v56 = vld [vmem:[#allocation2 + $0xab0] sm:$0xff]  ;;  %v218_v57 = vld [vmem:[#allocation2 + $0x278] sm:$0xff] }
 0x11e   :  { %1118 = vmatprep.subr.mxu1 %v584_v61  ;;  %1048 = vmatpush2.msra.mxu0 %v327_v63  ;;  %v474_v58 = vld [vmem:[#allocation2 + $0xa78] sm:$0xff]  ;;  %v217_v59 = vld [vmem:[#allocation2 + $0x270] sm:$0xff] }
 0x11f   :  { %1119 = vmatpush2.msra.mxu1 %v583_v0  ;;  %1049 = vmatprep.subr.mxu0 %v320_v1  ;;  %v473_v60 = vld [vmem:[#allocation2 + $0xa70] sm:$0xff]  ;;  %v210_v61 = vld [vmem:[#allocation2 + $0x238] sm:$0xff] }
 0x120   :  { %1120 = vmatprep.subr.mxu1 %v576_v2  ;;  %1050 = vmatpush2.msra.mxu0 %v319_v4  ;;  %v466_v63 = vld [vmem:[#allocation2 + $0xa38] sm:$0xff]  ;;  %v209_v0 = vld [vmem:[#allocation2 + $0x230] sm:$0xff] }
 0x121   :  { %1121 = vmatpush2.msra.mxu1 %v575_v5  ;;  %1051 = vmatprep.subr.mxu0 %v312_v6  ;;  %v465_v1 = vld [vmem:[#allocation2 + $0xa30] sm:$0xff]  ;;  %v202_v2 = vld [vmem:[#allocation2 + $0x1f8] sm:$0xff] }
 0x122   :  { %1122 = vmatprep.subr.mxu1 %v568_v7  ;;  %1052 = vmatpush2.msra.mxu0 %v311_v9  ;;  %v458_v4 = vld [vmem:[#allocation2 + $0x9f8] sm:$0xff]  ;;  %v201_v5 = vld [vmem:[#allocation2 + $0x1f0] sm:$0xff] }
 0x123   :  { %1123 = vmatpush2.msra.mxu1 %v567_v10  ;;  %1053 = vmatprep.subr.mxu0 %v304_v12  ;;  %v457_v6 = vld [vmem:[#allocation2 + $0x9f0] sm:$0xff]  ;;  %v194_v7 = vld [vmem:[#allocation2 + $0x1b8] sm:$0xff] }
 0x124   :  { %1124 = vmatprep.subr.mxu1 %v560_v13  ;;  %1054 = vmatpush2.msra.mxu0 %v303_v14  ;;  %v450_v9 = vld [vmem:[#allocation2 + $0x9b8] sm:$0xff]  ;;  %v193_v10 = vld [vmem:[#allocation2 + $0x1b0] sm:$0xff] }
 0x125   :  { %1125 = vmatpush2.msra.mxu1 %v559_v15  ;;  %1055 = vmatprep.subr.mxu0 %v296_v16  ;;  %v449_v12 = vld [vmem:[#allocation2 + $0x9b0] sm:$0xff]  ;;  %v186_v13 = vld [vmem:[#allocation2 + $0x178] sm:$0xff] }
 0x126   :  { %1126 = vmatprep.subr.mxu1 %v552_v17  ;;  %1056 = vmatpush2.msra.mxu0 %v295_v18  ;;  %v442_v14 = vld [vmem:[#allocation2 + $0x978] sm:$0xff]  ;;  %v185_v15 = vld [vmem:[#allocation2 + $0x170] sm:$0xff] }
 0x127   :  { %1127 = vmatpush2.msra.mxu1 %v551_v19  ;;  %1057 = vmatprep.subr.mxu0 %v288_v20  ;;  %v441_v16 = vld [vmem:[#allocation2 + $0x970] sm:$0xff]  ;;  %v178_v17 = vld [vmem:[#allocation2 + $0x138] sm:$0xff] }
 0x128   :  { %1128 = vmatprep.subr.mxu1 %v544_v21  ;;  %1058 = vmatpush2.msra.mxu0 %v287_v22  ;;  %v434_v18 = vld [vmem:[#allocation2 + $0x938] sm:$0xff]  ;;  %v177_v19 = vld [vmem:[#allocation2 + $0x130] sm:$0xff] }
 0x129   :  { %1129 = vmatpush2.msra.mxu1 %v543_v23  ;;  %1059 = vmatprep.subr.mxu0 %v280_v24  ;;  %v433_v20 = vld [vmem:[#allocation2 + $0x930] sm:$0xff]  ;;  %v170_v21 = vld [vmem:[#allocation2 + $0xf8] sm:$0xff] }
 0x12a   :  { %1130 = vmatprep.subr.mxu1 %v536_v25  ;;  %1060 = vmatpush2.msra.mxu0 %v279_v26  ;;  %v426_v22 = vld [vmem:[#allocation2 + $0x8f8] sm:$0xff]  ;;  %v169_v23 = vld [vmem:[#allocation2 + $0xf0] sm:$0xff] }
 0x12b   :  { %1131 = vmatpush2.msra.mxu1 %v535_v27  ;;  %1061 = vmatprep.subr.mxu0 %v272_v28  ;;  %v425_v24 = vld [vmem:[#allocation2 + $0x8f0] sm:$0xff]  ;;  %v162_v25 = vld [vmem:[#allocation2 + $0xb8] sm:$0xff] }
 0x12c   :  { %1132 = vmatprep.subr.mxu1 %v528_v29  ;;  %1062 = vmatpush2.msra.mxu0 %v271_v30  ;;  %v418_v26 = vld [vmem:[#allocation2 + $0x8b8] sm:$0xff]  ;;  %v161_v27 = vld [vmem:[#allocation2 + $0xb0] sm:$0xff] }
 0x12d   :  { %1063 = vmatprep.mubr.f32.mxu0 %v3283_v8  ;;  %1133 = vmatpush2.msra.mxu1 %v527_v31  ;;  %v417_v28 = vld [vmem:[#allocation2 + $0x8b0] sm:$0xff]  ;;  %v154_v29 = vld [vmem:[#allocation2 + $0x78] sm:$0xff] }
 0x12e   :  { %1064 = vmatmul.mubr.f32.vlgmr.msra.gmra.mxu0 %v3277_v62  ;;  %1134 = vmatprep.mubr.f32.mxu1 %v3287_v11  ;;  %v410_v30 = vld [vmem:[#allocation2 + $0x878] sm:$0xff]  ;;  %v153_v31 = vld [vmem:[#allocation2 + $0x70] sm:$0xff] }
 0x12f   :  { %1141 = vmatprep.subr.mxu0 %v266_v32  ;;  %1212 = vmatprep.subr.mxu1 %v522_v33  ;;  %v409_v32 = vld [vmem:[#allocation2 + $0x870] sm:$0xff]  ;;  %v146_v33 = vld [vmem:[#allocation2 + $0x38] sm:$0xff] }
 0x130   :  { %1135 = vmatmul.mubr.f32.vlgmr.msra.gmra.mxu1 %v3279_v3  ;;  %1142 = vmatpush1.msra.mxu0 %v265_v34  ;;  %v402_v34 = vld [vmem:[#allocation2 + $0x838] sm:$0xff] }
 0x131   :  { %1213 = vmatpush1.msra.mxu1 %v521_v35  ;;  %1143 = vmatprep.subr.mxu0 %v258_v36  ;;  %v145_v35 = vld [vmem:[#allocation2 + $0x30] sm:$0xff] }
 0x132   :  { %1214 = vmatprep.subr.mxu1 %v514_v37  ;;  %1144 = vmatpush1.msra.mxu0 %v257_v38  ;;  %v401_v36 = vld [vmem:[#allocation2 + $0x830] sm:$0xff]  ;;  %v394_v37 = vld [vmem:[#allocation2 + $0x7f8] sm:$0xff] }
 0x133   :  { %1215 = vmatpush1.msra.mxu1 %v513_v39  ;;  %1145 = vmatprep.subr.mxu0 %v250_v40  ;;  %v650_v38 = vld [vmem:[#allocation2 + $0xff8] sm:$0xff]  ;;  %v393_v39 = vld [vmem:[#allocation2 + $0x7f0] sm:$0xff] }
 0x134   :  { %1216 = vmatprep.subr.mxu1 %v506_v42  ;;  %1146 = vmatpush1.msra.mxu0 %v249_v43  ;;  %v649_v40 = vld [vmem:[#allocation2 + $0xff0] sm:$0xff]  ;;  %v386_v42 = vld [vmem:[#allocation2 + $0x7b8] sm:$0xff] }
 0x135   :  { %1217 = vmatpush1.msra.mxu1 %v505_v44  ;;  %1147 = vmatprep.subr.mxu0 %v242_v45  ;;  %v642_v43 = vld [vmem:[#allocation2 + $0xfb8] sm:$0xff]  ;;  %v385_v44 = vld [vmem:[#allocation2 + $0x7b0] sm:$0xff] }
 0x136   :  { %1218 = vmatprep.subr.mxu1 %v498_v46  ;;  %1148 = vmatpush1.msra.mxu0 %v241_v47  ;;  %v641_v45 = vld [vmem:[#allocation2 + $0xfb0] sm:$0xff]  ;;  %v378_v46 = vld [vmem:[#allocation2 + $0x778] sm:$0xff] }
 0x137   :  { %1219 = vmatpush1.msra.mxu1 %v497_v48  ;;  %1149 = vmatprep.subr.mxu0 %v234_v49  ;;  %v634_v47 = vld [vmem:[#allocation2 + $0xf78] sm:$0xff]  ;;  %v377_v48 = vld [vmem:[#allocation2 + $0x770] sm:$0xff] }
 0x138   :  { %1220 = vmatprep.subr.mxu1 %v490_v50  ;;  %1150 = vmatpush1.msra.mxu0 %v233_v51  ;;  %v633_v49 = vld [vmem:[#allocation2 + $0xf70] sm:$0xff]  ;;  %v370_v50 = vld [vmem:[#allocation2 + $0x738] sm:$0xff] }
 0x139   :  { %1221 = vmatpush1.msra.mxu1 %v489_v52  ;;  %1151 = vmatprep.subr.mxu0 %v226_v53  ;;  %v626_v51 = vld [vmem:[#allocation2 + $0xf38] sm:$0xff]  ;;  %v369_v52 = vld [vmem:[#allocation2 + $0x730] sm:$0xff] }
 0x13a   :  { %1222 = vmatprep.subr.mxu1 %v482_v54  ;;  %1152 = vmatpush1.msra.mxu0 %v225_v55  ;;  %v625_v53 = vld [vmem:[#allocation2 + $0xf30] sm:$0xff]  ;;  %v362_v54 = vld [vmem:[#allocation2 + $0x6f8] sm:$0xff] }
 0x13b   :  { %1223 = vmatpush1.msra.mxu1 %v481_v56  ;;  %1153 = vmatprep.subr.mxu0 %v218_v57  ;;  %v618_v55 = vld [vmem:[#allocation2 + $0xef8] sm:$0xff]  ;;  %v361_v56 = vld [vmem:[#allocation2 + $0x6f0] sm:$0xff] }
 0x13c   :  { %1224 = vmatprep.subr.mxu1 %v474_v58  ;;  %1154 = vmatpush1.msra.mxu0 %v217_v59  ;;  %v617_v57 = vld [vmem:[#allocation2 + $0xef0] sm:$0xff]  ;;  %v354_v58 = vld [vmem:[#allocation2 + $0x6b8] sm:$0xff] }
 0x13d   :  { %1225 = vmatpush1.msra.mxu1 %v473_v60  ;;  %1155 = vmatprep.subr.mxu0 %v210_v61  ;;  %v610_v59 = vld [vmem:[#allocation2 + $0xeb8] sm:$0xff]  ;;  %v353_v60 = vld [vmem:[#allocation2 + $0x6b0] sm:$0xff] }
 0x13e   :  { %1226 = vmatprep.subr.mxu1 %v466_v63  ;;  %1156 = vmatpush1.msra.mxu0 %v209_v0  ;;  %v609_v61 = vld [vmem:[#allocation2 + $0xeb0] sm:$0xff]  ;;  %v346_v63 = vld [vmem:[#allocation2 + $0x678] sm:$0xff] }
 0x13f   :  { %1227 = vmatpush1.msra.mxu1 %v465_v1  ;;  %1157 = vmatprep.subr.mxu0 %v202_v2  ;;  %v602_v0 = vld [vmem:[#allocation2 + $0xe78] sm:$0xff]  ;;  %v345_v1 = vld [vmem:[#allocation2 + $0x670] sm:$0xff] }
 0x140   :  { %1228 = vmatprep.subr.mxu1 %v458_v4  ;;  %1158 = vmatpush1.msra.mxu0 %v201_v5  ;;  %v601_v2 = vld [vmem:[#allocation2 + $0xe70] sm:$0xff]  ;;  %v338_v4 = vld [vmem:[#allocation2 + $0x638] sm:$0xff] }
 0x141   :  { %1229 = vmatpush1.msra.mxu1 %v457_v6  ;;  %1159 = vmatprep.subr.mxu0 %v194_v7  ;;  %v594_v5 = vld [vmem:[#allocation2 + $0xe38] sm:$0xff]  ;;  %v337_v6 = vld [vmem:[#allocation2 + $0x630] sm:$0xff] }
 0x142   :  { %1230 = vmatprep.subr.mxu1 %v450_v9  ;;  %1160 = vmatpush1.msra.mxu0 %v193_v10  ;;  %v593_v7 = vld [vmem:[#allocation2 + $0xe30] sm:$0xff]  ;;  %v330_v9 = vld [vmem:[#allocation2 + $0x5f8] sm:$0xff] }
 0x143   :  { %1231 = vmatpush1.msra.mxu1 %v449_v12  ;;  %1161 = vmatprep.subr.mxu0 %v186_v13  ;;  %v586_v10 = vld [vmem:[#allocation2 + $0xdf8] sm:$0xff]  ;;  %v329_v12 = vld [vmem:[#allocation2 + $0x5f0] sm:$0xff] }
 0x144   :  { %1232 = vmatprep.subr.mxu1 %v442_v14  ;;  %1162 = vmatpush1.msra.mxu0 %v185_v15  ;;  %v585_v13 = vld [vmem:[#allocation2 + $0xdf0] sm:$0xff]  ;;  %v322_v14 = vld [vmem:[#allocation2 + $0x5b8] sm:$0xff] }
 0x145   :  { %1233 = vmatpush1.msra.mxu1 %v441_v16  ;;  %1163 = vmatprep.subr.mxu0 %v178_v17  ;;  %v578_v15 = vld [vmem:[#allocation2 + $0xdb8] sm:$0xff]  ;;  %v321_v16 = vld [vmem:[#allocation2 + $0x5b0] sm:$0xff] }
 0x146   :  { %1234 = vmatprep.subr.mxu1 %v434_v18  ;;  %1164 = vmatpush1.msra.mxu0 %v177_v19  ;;  %v577_v17 = vld [vmem:[#allocation2 + $0xdb0] sm:$0xff]  ;;  %v314_v18 = vld [vmem:[#allocation2 + $0x578] sm:$0xff] }
 0x147   :  { %1235 = vmatpush1.msra.mxu1 %v433_v20  ;;  %1165 = vmatprep.subr.mxu0 %v170_v21  ;;  %v570_v19 = vld [vmem:[#allocation2 + $0xd78] sm:$0xff]  ;;  %v313_v20 = vld [vmem:[#allocation2 + $0x570] sm:$0xff] }
 0x148   :  { %1236 = vmatprep.subr.mxu1 %v426_v22  ;;  %1166 = vmatpush1.msra.mxu0 %v169_v23  ;;  %v569_v21 = vld [vmem:[#allocation2 + $0xd70] sm:$0xff]  ;;  %v306_v22 = vld [vmem:[#allocation2 + $0x538] sm:$0xff] }
 0x149   :  { %1237 = vmatpush1.msra.mxu1 %v425_v24  ;;  %1167 = vmatprep.subr.mxu0 %v162_v25  ;;  %v562_v23 = vld [vmem:[#allocation2 + $0xd38] sm:$0xff]  ;;  %v655_v24 = vsub.s32 0, %v3271_v41  ;;  %v305_v25 = vld [vmem:[#allocation2 + $0x530] sm:$0xff] }
 0x14a   :  { %1238 = vmatprep.subr.mxu1 %v418_v26  ;;  %1168 = vmatpush1.msra.mxu0 %v161_v27  ;;  %v561_v26 = vld [vmem:[#allocation2 + $0xd30] sm:$0xff]  ;;  %v3302_v27 = vld [vmem:[#allocation5] sm:$0xff] }
 0x14b   :  { %1239 = vmatpush1.msra.mxu1 %v417_v28  ;;  %1169 = vmatprep.subr.mxu0 %v154_v29  ;;  %v298_v28 = vld [vmem:[#allocation2 + $0x4f8] sm:$0xff] }
 0x14c   :  { %1240 = vmatprep.subr.mxu1 %v410_v30  ;;  %1170 = vmatpush1.msra.mxu0 %v153_v31  ;;  %v554_v29 = vld [vmem:[#allocation2 + $0xcf8] sm:$0xff]  ;;  %v659_v30 = vsub.s32 1, %v3271_v41  ;;  %v297_v31 = vld [vmem:[#allocation2 + $0x4f0] sm:$0xff] }
 0x14d   :  { %1241 = vmatpush1.msra.mxu1 %v409_v32  ;;  %1171 = vmatprep.subr.mxu0 %v146_v33  ;;  %v553_v32 = vld [vmem:[#allocation2 + $0xcf0] sm:$0xff]  ;;  %v290_v33 = vld [vmem:[#allocation2 + $0x4b8] sm:$0xff] }
 0x14e   :  { %1242 = vmatprep.subr.mxu1 %v402_v34  ;;  %1172 = vmatpush1.msra.mxu0 %v145_v35  ;;  %v546_v34 = vld [vmem:[#allocation2 + $0xcb8] sm:$0xff]  ;;  %v656_v35 = vrot.slane %v3302_v27, %v655_v24 }
 0x14f   :  { %1243 = vmatpush1.msra.mxu1 %v401_v36  ;;  %1173 = vmatprep.subr.mxu0 %v394_v37  ;;  %v289_v36 = vld [vmem:[#allocation2 + $0x4b0] sm:$0xff] }
 0x150   :  { %1244 = vmatprep.subr.mxu1 %v650_v38  ;;  %1174 = vmatpush2.msra.mxu0 %v393_v39  ;;  %v545_v37 = vld [vmem:[#allocation2 + $0xcb0] sm:$0xff]  ;;  %v282_v38 = vld [vmem:[#allocation2 + $0x478] sm:$0xff] }
 0x151   :  { %1245 = vmatpush2.msra.mxu1 %v649_v40  ;;  %1175 = vmatprep.subr.mxu0 %v386_v42  ;;  %v538_v39 = vld [vmem:[#allocation2 + $0xc78] sm:$0xff]  ;;  %v660_v40 = vrot.slane %v3302_v27, %v659_v30  ;;  %v281_v42 = vld [vmem:[#allocation2 + $0x470] sm:$0xff] }
 0x152   :  { %1246 = vmatprep.subr.mxu1 %v642_v43  ;;  %1176 = vmatpush2.msra.mxu0 %v385_v44  ;;  %v537_v43 = vld [vmem:[#allocation2 + $0xc70] sm:$0xff] }
 0x153   :  { %1247 = vmatpush2.msra.mxu1 %v641_v45  ;;  %1177 = vmatprep.subr.mxu0 %v378_v46  ;;  %v274_v45 = vld [vmem:[#allocation2 + $0x438] sm:$0xff] }
 0x154   :  { %1248 = vmatprep.subr.mxu1 %v634_v47  ;;  %1178 = vmatpush2.msra.mxu0 %v377_v48  ;;  %v530_v46 = vld [vmem:[#allocation2 + $0xc38] sm:$0xff]  ;;  %v273_v48 = vld [vmem:[#allocation2 + $0x430] sm:$0xff] }
 0x155   :  { %1249 = vmatpush2.msra.mxu1 %v633_v49  ;;  %1179 = vmatprep.subr.mxu0 %v370_v50 }
 0x156   :  { %1250 = vmatprep.subr.mxu1 %v626_v51  ;;  %1180 = vmatpush2.msra.mxu0 %v369_v52  ;;  %v529_v51 = vld [vmem:[#allocation2 + $0xc30] sm:$0xff] }
 0x157   :  { %1251 = vmatpush2.msra.mxu1 %v625_v53  ;;  %1181 = vmatprep.subr.mxu0 %v362_v54 }
 0x158   :  { %1252 = vmatprep.subr.mxu1 %v618_v55  ;;  %1182 = vmatpush2.msra.mxu0 %v361_v56  ;;  %v1368_v55 = vld [vmem:[#allocation7 + $0x1e8] sm:$0xff] }
 0x159   :  { %1253 = vmatpush2.msra.mxu1 %v617_v57  ;;  %1183 = vmatprep.subr.mxu0 %v354_v58  ;;  %v1496_v57 = vld [vmem:[#allocation7 + $0x5e8] sm:$0xff]  ;;  %v1367_v58 = vld [vmem:[#allocation7 + $0x1e0] sm:$0xff] }
 0x15a   :  { %1254 = vmatprep.subr.mxu1 %v610_v59  ;;  %1184 = vmatpush2.msra.mxu0 %v353_v60  ;;  %v1495_v59 = vld [vmem:[#allocation7 + $0x5e0] sm:$0xff]  ;;  %v1364_v60 = vld [vmem:[#allocation7 + $0x1c8] sm:$0xff] }
 0x15b   :  { %1255 = vmatpush2.msra.mxu1 %v609_v61  ;;  %1185 = vmatprep.subr.mxu0 %v346_v63  ;;  %v1363_v63 = vld [vmem:[#allocation7 + $0x1c0] sm:$0xff] }
 0x15c   :  { %1256 = vmatprep.subr.mxu1 %v602_v0  ;;  %1186 = vmatpush2.msra.mxu0 %v345_v1  ;;  %v1492_v0 = vld [vmem:[#allocation7 + $0x5c8] sm:$0xff] }
 0x15d   :  { %1257 = vmatpush2.msra.mxu1 %v601_v2  ;;  %1187 = vmatprep.subr.mxu0 %v338_v4  ;;  %v1491_v2 = vld [vmem:[#allocation7 + $0x5c0] sm:$0xff] }
 0x15e   :  { %1258 = vmatprep.subr.mxu1 %v594_v5  ;;  %1188 = vmatpush2.msra.mxu0 %v337_v6  ;;  %v1487_v4 = vld [vmem:[#allocation7 + $0x5a0] sm:$0xff]  ;;  %v1484_v6 = vld [vmem:[#allocation7 + $0x588] sm:$0xff] }
 0x15f   :  { %1259 = vmatpush2.msra.mxu1 %v593_v7  ;;  %1189 = vmatprep.subr.mxu0 %v330_v9  ;;  %v1355_v5 = vld [vmem:[#allocation7 + $0x180] sm:$0xff]  ;;  %v1352_v7 = vld [vmem:[#allocation7 + $0x168] sm:$0xff] }
 0x160   :  { %1260 = vmatprep.subr.mxu1 %v586_v10  ;;  %1190 = vmatpush2.msra.mxu0 %v329_v12  ;;  %v1483_v9 = vld [vmem:[#allocation7 + $0x580] sm:$0xff]  ;;  %v1480_v12 = vld [vmem:[#allocation7 + $0x568] sm:$0xff] }
 0x161   :  { %1261 = vmatpush2.msra.mxu1 %v585_v13  ;;  %1191 = vmatprep.subr.mxu0 %v322_v14  ;;  %v1351_v10 = vld [vmem:[#allocation7 + $0x160] sm:$0xff]  ;;  %v1348_v13 = vld [vmem:[#allocation7 + $0x148] sm:$0xff] }
 0x162   :  { %1262 = vmatprep.subr.mxu1 %v578_v15  ;;  %1192 = vmatpush2.msra.mxu0 %v321_v16  ;;  %v1479_v14 = vld [vmem:[#allocation7 + $0x560] sm:$0xff]  ;;  %v1476_v16 = vld [vmem:[#allocation7 + $0x548] sm:$0xff] }
 0x163   :  { %1263 = vmatpush2.msra.mxu1 %v577_v17  ;;  %1193 = vmatprep.subr.mxu0 %v314_v18  ;;  %v1347_v15 = vld [vmem:[#allocation7 + $0x140] sm:$0xff]  ;;  %v1344_v17 = vld [vmem:[#allocation7 + $0x128] sm:$0xff] }
 0x164   :  { %1264 = vmatprep.subr.mxu1 %v570_v19  ;;  %1194 = vmatpush2.msra.mxu0 %v313_v20  ;;  %v1475_v18 = vld [vmem:[#allocation7 + $0x540] sm:$0xff]  ;;  %v1472_v20 = vld [vmem:[#allocation7 + $0x528] sm:$0xff] }
 0x165   :  { %1265 = vmatpush2.msra.mxu1 %v569_v21  ;;  %1195 = vmatprep.subr.mxu0 %v306_v22  ;;  %v1343_v19 = vld [vmem:[#allocation7 + $0x120] sm:$0xff]  ;;  %v1340_v21 = vld [vmem:[#allocation7 + $0x108] sm:$0xff] }
 0x166   :  { %1266 = vmatprep.subr.mxu1 %v562_v23  ;;  %1196 = vmatpush2.msra.mxu0 %v305_v25  ;;  %v1471_v22 = vld [vmem:[#allocation7 + $0x520] sm:$0xff]  ;;  %v1468_v25 = vld [vmem:[#allocation7 + $0x508] sm:$0xff] }
 0x167   :  { %1267 = vmatpush2.msra.mxu1 %v561_v26  ;;  %1197 = vmatprep.subr.mxu0 %v298_v28  ;;  %v1339_v23 = vld [vmem:[#allocation7 + $0x100] sm:$0xff]  ;;  %v1336_v26 = vld [vmem:[#allocation7 + $0xe8] sm:$0xff] }
 0x168   :  { %1268 = vmatprep.subr.mxu1 %v554_v29  ;;  %1198 = vmatpush2.msra.mxu0 %v297_v31  ;;  %v1467_v28 = vld [vmem:[#allocation7 + $0x500] sm:$0xff]  ;;  %v1464_v31 = vld [vmem:[#allocation7 + $0x4e8] sm:$0xff] }
 0x169   :  { %1269 = vmatpush2.msra.mxu1 %v553_v32  ;;  %1199 = vmatprep.subr.mxu0 %v290_v33  ;;  %v1335_v29 = vld [vmem:[#allocation7 + $0xe0] sm:$0xff]  ;;  %v1332_v32 = vld [vmem:[#allocation7 + $0xc8] sm:$0xff] }
 0x16a   :  { %1270 = vmatprep.subr.mxu1 %v546_v34  ;;  %v781_v44 = vpop.f32.mrf.mxu0  ;;  %1200 = vmatpush2.msra.mxu0 %v289_v36  ;;  %v1463_v33 = vld [vmem:[#allocation7 + $0x4e0] sm:$0xff]  ;;  %v1328_v36 = vld [vmem:[#allocation7 + $0xa8] sm:$0xff] }
 0x16b   :  { %1271 = vmatpush2.msra.mxu1 %v545_v37  ;;  %v782_v47 = vadd.f32 %v781_v44, %v656_v35  ;;  %1201 = vmatprep.subr.mxu0 %v282_v38  ;;  %v1331_v34 = vld [vmem:[#allocation7 + $0xc0] sm:$0xff]  ;;  %v1460_v35 = vld [vmem:[#allocation7 + $0x4c8] sm:$0xff] }
 0x16c   :  { %1272 = vmatprep.subr.mxu1 %v538_v39  ;;  %v852_v49 = vpop.f32.mrf.mxu1  ;;  %v783_v50 = vpop.f32.mrf.mxu0  ;;  %1202 = vmatpush2.msra.mxu0 %v281_v42  ;;  %v1459_v37 = vld [vmem:[#allocation7 + $0x4c0] sm:$0xff]  ;;  %v1456_v39 = vld [vmem:[#allocation7 + $0x4a8] sm:$0xff] }
 0x16d   :  { %1273 = vmatpush2.msra.mxu1 %v537_v43  ;;  %v3311_v52 = vadd.f32 %v852_v49, %v782_v47  ;;  %v784_v53 = vadd.f32 %v783_v50, %v660_v40  ;;  %1203 = vmatprep.subr.mxu0 %v274_v45  ;;  %v1327_v38 = vld [vmem:[#allocation7 + $0xa0] sm:$0xff]  ;;  %v1324_v40 = vld [vmem:[#allocation7 + $0x88] sm:$0xff] }
 0x16e   :  { %1274 = vmatprep.subr.mxu1 %v530_v46  ;;  %v854_v54 = vpop.f32.mrf.mxu1  ;;  %1204 = vmatpush2.msra.mxu0 %v273_v48  ;;  %v1455_v42 = vld [vmem:[#allocation7 + $0x4a0] sm:$0xff]  ;;  %v1452_v44 = vld [vmem:[#allocation7 + $0x488] sm:$0xff] }
 0x16f   :  { %1205 = vmatprep.mubr.f32.mxu0 %v3283_v8  ;;  %v855_v56 = vadd.f32 %v854_v54, %v784_v53  ;;  %1275 = vmatpush2.msra.mxu1 %v529_v51  ;;  %v1360_v8 = vld [vmem:[#allocation7 + $0x1a8] sm:$0xff]  ;;  %v1323_v43 = vld [vmem:[#allocation7 + $0x80] sm:$0xff]  ;;  %vm1283_vm1 = vcmp.ge.f32.partialorder %v3311_v52, 0.0 }
 0x170   :  { %1276 = vmatprep.mubr.f32.mxu1 %v3287_v11  ;;  %1206 = vmatmul.mubr.f32.vlgmr.msra.gmra.mxu0 %v3277_v62  ;;  %v1359_v11 = vld [vmem:[#allocation7 + $0x1a0] sm:$0xff]  ;;  %v1488_v62 = vld [vmem:[#allocation7 + $0x5a8] sm:$0xff] }
 0x171   :  { %1277 = vmatmul.mubr.f32.vlgmr.msra.gmra.mxu1 %v3279_v3  ;;  %v1292_v61 = vmul.f32 0.01, %v855_v56  ;;  %vm1284_vm0 = vcmp.ge.f32.partialorder %v855_v56, 0.0  ;;  %1841 = vmatprep.subr.mxu0 %v1368_v55  ;;  %v1356_v3 = vld [vmem:[#allocation7 + $0x188] sm:$0xff]  ;;  %v1451_v46 = vld [vmem:[#allocation7 + $0x480] sm:$0xff] }
 0x172   :  { %1912 = vmatprep.subr.mxu1 %v1496_v57  ;;  %1842 = vmatpush1.msra.mxu0 %v1367_v58  ;;  %v1320_v45 = vld [vmem:[#allocation7 + $0x68] sm:$0xff]  ;;  %v1319_v47 = vld [vmem:[#allocation7 + $0x60] sm:$0xff] }
 0x173   :  { %v3317_v1 = vsel %vm1284_vm0, %v855_v56, %v1292_v61  ;;  %1913 = vmatpush1.msra.mxu1 %v1495_v59  ;;  %1843 = vmatprep.subr.mxu0 %v1364_v60  ;;  %v1448_v48 = vld [vmem:[#allocation7 + $0x468] sm:$0xff]  ;;  %v1447_v50 = vld [vmem:[#allocation7 + $0x460] sm:$0xff] }
 0x174   :  { %1905 = vmatprep.mubr.f32.mxu0 %v3317_v1  ;;  %1844 = vmatpush1.msra.mxu0 %v1363_v63  ;;  %v1316_v49 = vld [vmem:[#allocation7 + $0x48] sm:$0xff]  ;;  %v1315_v51 = vld [vmem:[#allocation7 + $0x40] sm:$0xff] }
 0x175   :  { %1914 = vmatprep.subr.mxu1 %v1492_v0  ;;  %1845 = vmatprep.subr.mxu0 %v1360_v8  ;;  %v1444_v53 = vld [vmem:[#allocation7 + $0x448] sm:$0xff]  ;;  %v1443_v55 = vld [vmem:[#allocation7 + $0x440] sm:$0xff] }
 0x176   :  { %1915 = vmatpush1.msra.mxu1 %v1491_v2  ;;  %1846 = vmatpush1.msra.mxu0 %v1359_v11  ;;  %v1312_v54 = vld [vmem:[#allocation7 + $0x28] sm:$0xff]  ;;  %v1311_v56 = vld [vmem:[#allocation7 + $0x20] sm:$0xff] }
 0x177   :  { %1916 = vmatprep.subr.mxu1 %v1488_v62  ;;  %1847 = vmatprep.subr.mxu0 %v1356_v3  ;;  %v1440_v57 = vld [vmem:[#allocation7 + $0x428] sm:$0xff]  ;;  %v1439_v59 = vld [vmem:[#allocation7 + $0x420] sm:$0xff] }
 0x178   :  { %1917 = vmatpush1.msra.mxu1 %v1487_v4  ;;  %1848 = vmatpush1.msra.mxu0 %v1355_v5  ;;  %v1308_v58 = vld [vmem:[#allocation7 + $0x8] sm:$0xff]  ;;  %v1307_v60 = vld [vmem:[#allocation7] sm:$0xff] }
 0x179   :  { %1918 = vmatprep.subr.mxu1 %v1484_v6  ;;  %1849 = vmatprep.subr.mxu0 %v1352_v7  ;;  %v1436_v61 = vld [vmem:[#allocation7 + $0x408] sm:$0xff]  ;;  %v1435_v0 = vld [vmem:[#allocation7 + $0x400] sm:$0xff] }
 0x17a   :  { %1919 = vmatpush1.msra.mxu1 %v1483_v9  ;;  %1850 = vmatpush1.msra.mxu0 %v1351_v10  ;;  %v1432_v63 = vld [vmem:[#allocation7 + $0x3e8] sm:$0xff]  ;;  %v1431_v8 = vld [vmem:[#allocation7 + $0x3e0] sm:$0xff] }
 0x17b   :  { %1920 = vmatprep.subr.mxu1 %v1480_v12  ;;  %1851 = vmatprep.subr.mxu0 %v1348_v13  ;;  %v1560_v2 = vld [vmem:[#allocation7 + $0x7e8] sm:$0xff]  ;;  %v1559_v62 = vld [vmem:[#allocation7 + $0x7e0] sm:$0xff] }
 0x17c   :  { %1921 = vmatpush1.msra.mxu1 %v1479_v14  ;;  %1852 = vmatpush1.msra.mxu0 %v1347_v15  ;;  %v1428_v11 = vld [vmem:[#allocation7 + $0x3c8] sm:$0xff]  ;;  %v1427_v3 = vld [vmem:[#allocation7 + $0x3c0] sm:$0xff] }
 0x17d   :  { %1922 = vmatprep.subr.mxu1 %v1476_v16  ;;  %1853 = vmatprep.subr.mxu0 %v1344_v17  ;;  %v1556_v4 = vld [vmem:[#allocation7 + $0x7c8] sm:$0xff]  ;;  %v1555_v6 = vld [vmem:[#allocation7 + $0x7c0] sm:$0xff] }
 0x17e   :  { %1923 = vmatpush1.msra.mxu1 %v1475_v18  ;;  %1854 = vmatpush1.msra.mxu0 %v1343_v19  ;;  %v1424_v5 = vld [vmem:[#allocation7 + $0x3a8] sm:$0xff]  ;;  %v1423_v7 = vld [vmem:[#allocation7 + $0x3a0] sm:$0xff] }
 0x17f   :  { %1924 = vmatprep.subr.mxu1 %v1472_v20  ;;  %1855 = vmatprep.subr.mxu0 %v1340_v21  ;;  %v1552_v9 = vld [vmem:[#allocation7 + $0x7a8] sm:$0xff]  ;;  %v1551_v12 = vld [vmem:[#allocation7 + $0x7a0] sm:$0xff] }
 0x180   :  { %1925 = vmatpush1.msra.mxu1 %v1471_v22  ;;  %1856 = vmatpush1.msra.mxu0 %v1339_v23  ;;  %v1420_v10 = vld [vmem:[#allocation7 + $0x388] sm:$0xff]  ;;  %v1419_v13 = vld [vmem:[#allocation7 + $0x380] sm:$0xff] }
 0x181   :  { %1926 = vmatprep.subr.mxu1 %v1468_v25  ;;  %1857 = vmatprep.subr.mxu0 %v1336_v26  ;;  %v1548_v14 = vld [vmem:[#allocation7 + $0x788] sm:$0xff]  ;;  %v1547_v16 = vld [vmem:[#allocation7 + $0x780] sm:$0xff] }
 0x182   :  { %1927 = vmatpush1.msra.mxu1 %v1467_v28  ;;  %1858 = vmatpush1.msra.mxu0 %v1335_v29  ;;  %v1416_v15 = vld [vmem:[#allocation7 + $0x368] sm:$0xff]  ;;  %v1415_v17 = vld [vmem:[#allocation7 + $0x360] sm:$0xff] }
 0x183   :  { %1928 = vmatprep.subr.mxu1 %v1464_v31  ;;  %1859 = vmatprep.subr.mxu0 %v1332_v32  ;;  %v1544_v18 = vld [vmem:[#allocation7 + $0x768] sm:$0xff]  ;;  %v1543_v20 = vld [vmem:[#allocation7 + $0x760] sm:$0xff] }
 0x184   :  { %1929 = vmatpush1.msra.mxu1 %v1463_v33  ;;  %1860 = vmatpush1.msra.mxu0 %v1331_v34  ;;  %v1412_v19 = vld [vmem:[#allocation7 + $0x348] sm:$0xff]  ;;  %v1411_v21 = vld [vmem:[#allocation7 + $0x340] sm:$0xff] }
 0x185   :  { %1930 = vmatprep.subr.mxu1 %v1460_v35  ;;  %1861 = vmatprep.subr.mxu0 %v1328_v36  ;;  %v1540_v22 = vld [vmem:[#allocation7 + $0x748] sm:$0xff]  ;;  %v1539_v25 = vld [vmem:[#allocation7 + $0x740] sm:$0xff] }
 0x186   :  { %1931 = vmatpush1.msra.mxu1 %v1459_v37  ;;  %1862 = vmatpush1.msra.mxu0 %v1327_v38  ;;  %v1408_v23 = vld [vmem:[#allocation7 + $0x328] sm:$0xff]  ;;  %v1407_v26 = vld [vmem:[#allocation7 + $0x320] sm:$0xff] }
 0x187   :  { %1932 = vmatprep.subr.mxu1 %v1456_v39  ;;  %1863 = vmatprep.subr.mxu0 %v1324_v40  ;;  %v1536_v28 = vld [vmem:[#allocation7 + $0x728] sm:$0xff]  ;;  %v1535_v31 = vld [vmem:[#allocation7 + $0x720] sm:$0xff] }
 0x188   :  { %1933 = vmatpush1.msra.mxu1 %v1455_v42  ;;  %1864 = vmatpush1.msra.mxu0 %v1323_v43  ;;  %v1404_v29 = vld [vmem:[#allocation7 + $0x308] sm:$0xff]  ;;  %v1403_v32 = vld [vmem:[#allocation7 + $0x300] sm:$0xff] }
 0x189   :  { %1934 = vmatprep.subr.mxu1 %v1452_v44  ;;  %1865 = vmatprep.subr.mxu0 %v1320_v45  ;;  %v1532_v33 = vld [vmem:[#allocation7 + $0x708] sm:$0xff]  ;;  %v1531_v35 = vld [vmem:[#allocation7 + $0x700] sm:$0xff] }
 0x18a   :  { %1935 = vmatpush1.msra.mxu1 %v1451_v46  ;;  %1866 = vmatpush1.msra.mxu0 %v1319_v47  ;;  %v1400_v34 = vld [vmem:[#allocation7 + $0x2e8] sm:$0xff]  ;;  %v1399_v36 = vld [vmem:[#allocation7 + $0x2e0] sm:$0xff] }
 0x18b   :  { %1936 = vmatprep.subr.mxu1 %v1448_v48  ;;  %1867 = vmatprep.subr.mxu0 %v1316_v49  ;;  %v1528_v37 = vld [vmem:[#allocation7 + $0x6e8] sm:$0xff]  ;;  %v1527_v39 = vld [vmem:[#allocation7 + $0x6e0] sm:$0xff]  ;;  %v663_v48 = vsub.s32 2, %v3271_v41 }
 0x18c   :  { %1937 = vmatpush1.msra.mxu1 %v1447_v50  ;;  %1868 = vmatpush1.msra.mxu0 %v1315_v51  ;;  %v1396_v38 = vld [vmem:[#allocation7 + $0x2c8] sm:$0xff]  ;;  %v1395_v40 = vld [vmem:[#allocation7 + $0x2c0] sm:$0xff] }
 0x18d   :  { %1938 = vmatprep.subr.mxu1 %v1444_v53  ;;  %1869 = vmatprep.subr.mxu0 %v1312_v54  ;;  %v1524_v42 = vld [vmem:[#allocation7 + $0x6c8] sm:$0xff]  ;;  %v1523_v44 = vld [vmem:[#allocation7 + $0x6c0] sm:$0xff]  ;;  %v667_v54 = vsub.s32 3, %v3271_v41 }
 0x18e   :  { %1939 = vmatpush1.msra.mxu1 %v1443_v55  ;;  %1870 = vmatpush1.msra.mxu0 %v1311_v56  ;;  %v1392_v43 = vld [vmem:[#allocation7 + $0x2a8] sm:$0xff]  ;;  %v1391_v45 = vld [vmem:[#allocation7 + $0x2a0] sm:$0xff] }
 0x18f   :  { %1940 = vmatprep.subr.mxu1 %v1440_v57  ;;  %1871 = vmatprep.subr.mxu0 %v1308_v58  ;;  %v1520_v46 = vld [vmem:[#allocation7 + $0x6a8] sm:$0xff]  ;;  %v1519_v49 = vld [vmem:[#allocation7 + $0x6a0] sm:$0xff] }
 0x190   :  { %1941 = vmatpush1.msra.mxu1 %v1439_v59  ;;  %1872 = vmatpush1.msra.mxu0 %v1307_v60  ;;  %v1388_v47 = vld [vmem:[#allocation7 + $0x288] sm:$0xff]  ;;  %v1387_v50 = vld [vmem:[#allocation7 + $0x280] sm:$0xff]  ;;  %v664_v59 = vrot.slane %v3302_v27, %v663_v48 }
 0x191   :  { %1942 = vmatprep.subr.mxu1 %v1436_v61  ;;  %1873 = vmatprep.subr.mxu0 %v1432_v63  ;;  %v1516_v51 = vld [vmem:[#allocation7 + $0x688] sm:$0xff]  ;;  %v1515_v55 = vld [vmem:[#allocation7 + $0x680] sm:$0xff] }
 0x192   :  { %1943 = vmatpush1.msra.mxu1 %v1435_v0  ;;  %1874 = vmatpush2.msra.mxu0 %v1431_v8  ;;  %v1384_v53 = vld [vmem:[#allocation7 + $0x268] sm:$0xff]  ;;  %v1383_v56 = vld [vmem:[#allocation7 + $0x260] sm:$0xff]  ;;  %v668_v8 = vrot.slane %v3302_v27, %v667_v54 }
 0x193   :  { %1944 = vmatprep.subr.mxu1 %v1560_v2  ;;  %1875 = vmatprep.subr.mxu0 %v1428_v11  ;;  %v1512_v57 = vld [vmem:[#allocation7 + $0x668] sm:$0xff]  ;;  %v1511_v60 = vld [vmem:[#allocation7 + $0x660] sm:$0xff] }
 0x194   :  { %1945 = vmatpush2.msra.mxu1 %v1559_v62  ;;  %1876 = vmatpush2.msra.mxu0 %v1427_v3  ;;  %v1380_v58 = vld [vmem:[#allocation7 + $0x248] sm:$0xff]  ;;  %v1379_v61 = vld [vmem:[#allocation7 + $0x240] sm:$0xff] }
 0x195   :  { %1946 = vmatprep.subr.mxu1 %v1556_v4  ;;  %1877 = vmatprep.subr.mxu0 %v1424_v5  ;;  %v1508_v63 = vld [vmem:[#allocation7 + $0x648] sm:$0xff]  ;;  %v1507_v2 = vld [vmem:[#allocation7 + $0x640] sm:$0xff]  ;;  %v1291_v4 = vmul.f32 0.01, %v3311_v52 }
 0x196   :  { %1947 = vmatpush2.msra.mxu1 %v1555_v6  ;;  %1878 = vmatpush2.msra.mxu0 %v1423_v7  ;;  %v1376_v0 = vld [vmem:[#allocation7 + $0x228] sm:$0xff]  ;;  %v1375_v11 = vld [vmem:[#allocation7 + $0x220] sm:$0xff] }
 0x197   :  { %1948 = vmatprep.subr.mxu1 %v1552_v9  ;;  %1879 = vmatprep.subr.mxu0 %v1420_v10  ;;  %v1504_v3 = vld [vmem:[#allocation7 + $0x628] sm:$0xff]  ;;  %v1503_v7 = vld [vmem:[#allocation7 + $0x620] sm:$0xff] }
 0x198   :  { %1949 = vmatpush2.msra.mxu1 %v1551_v12  ;;  %1880 = vmatpush2.msra.mxu0 %v1419_v13  ;;  %v1372_v5 = vld [vmem:[#allocation7 + $0x208] sm:$0xff]  ;;  %v1371_v9 = vld [vmem:[#allocation7 + $0x200] sm:$0xff] }
 0x199   :  { %1950 = vmatprep.subr.mxu1 %v1548_v14  ;;  %1881 = vmatprep.subr.mxu0 %v1416_v15  ;;  %v1500_v12 = vld [vmem:[#allocation7 + $0x608] sm:$0xff]  ;;  %v1499_v15 = vld [vmem:[#allocation7 + $0x600] sm:$0xff] }
 0x19a   :  { %1951 = vmatpush2.msra.mxu1 %v1547_v16  ;;  %1882 = vmatpush2.msra.mxu0 %v1415_v17  ;;  %v1624_v17 = vld [vmem:[#allocation7 + $0x9e8] sm:$0xff] }
 0x19b   :  { %1952 = vmatprep.subr.mxu1 %v1544_v18  ;;  %1883 = vmatprep.subr.mxu0 %v1412_v19  ;;  %v1752_v18 = vld [vmem:[#allocation7 + $0xde8] sm:$0xff]  ;;  %v3333_v19 = vsel %vm1283_vm1, %v3311_v52, %v1291_v4  ;;  %v1615_v52 = vld [vmem:[#allocation7 + $0x9a0] sm:$0xff] }
 0x19c   :  { %1953 = vmatpush2.msra.mxu1 %v1543_v20  ;;  %1884 = vmatpush2.msra.mxu0 %v1411_v21  ;;  %v1623_v21 = vld [vmem:[#allocation7 + $0x9e0] sm:$0xff]  ;;  %v1580_v4 = vld [vmem:[#allocation7 + $0x888] sm:$0xff] }
 0x19d   :  { %1954 = vmatprep.subr.mxu1 %v1540_v22  ;;  %1885 = vmatprep.subr.mxu0 %v1408_v23  ;;  %v1620_v23 = vld [vmem:[#allocation7 + $0x9c8] sm:$0xff] }
 0x19e   :  { %1955 = vmatpush2.msra.mxu1 %v1539_v25  ;;  %1886 = vmatpush2.msra.mxu0 %v1407_v26  ;;  %v1619_v26 = vld [vmem:[#allocation7 + $0x9c0] sm:$0xff] }
 0x19f   :  { %1956 = vmatprep.subr.mxu1 %v1536_v28  ;;  %1887 = vmatprep.subr.mxu0 %v1404_v29  ;;  %v1616_v28 = vld [vmem:[#allocation7 + $0x9a8] sm:$0xff] }
 0x1a0   :  { %1957 = vmatpush2.msra.mxu1 %v1535_v31  ;;  %1888 = vmatpush2.msra.mxu0 %v1403_v32  ;;  %v1751_v31 = vld [vmem:[#allocation7 + $0xde0] sm:$0xff] }
 0x1a1   :  { %1958 = vmatprep.subr.mxu1 %v1532_v33  ;;  %1889 = vmatprep.subr.mxu0 %v1400_v34  ;;  %v1612_v33 = vld [vmem:[#allocation7 + $0x988] sm:$0xff] }
 0x1a2   :  { %1959 = vmatpush2.msra.mxu1 %v1531_v35  ;;  %1890 = vmatpush2.msra.mxu0 %v1399_v36  ;;  %v1748_v34 = vld [vmem:[#allocation7 + $0xdc8] sm:$0xff]  ;;  %v1611_v35 = vld [vmem:[#allocation7 + $0x980] sm:$0xff] }
 0x1a3   :  { %1960 = vmatprep.subr.mxu1 %v1528_v37  ;;  %1891 = vmatprep.subr.mxu0 %v1396_v38  ;;  %v1747_v36 = vld [vmem:[#allocation7 + $0xdc0] sm:$0xff]  ;;  %v1608_v37 = vld [vmem:[#allocation7 + $0x968] sm:$0xff] }
 0x1a4   :  { %1961 = vmatpush2.msra.mxu1 %v1527_v39  ;;  %1892 = vmatpush2.msra.mxu0 %v1395_v40  ;;  %v1744_v38 = vld [vmem:[#allocation7 + $0xda8] sm:$0xff]  ;;  %v1607_v39 = vld [vmem:[#allocation7 + $0x960] sm:$0xff] }
 0x1a5   :  { %1962 = vmatprep.subr.mxu1 %v1524_v42  ;;  %1893 = vmatprep.subr.mxu0 %v1392_v43  ;;  %v1743_v40 = vld [vmem:[#allocation7 + $0xda0] sm:$0xff]  ;;  %v1604_v42 = vld [vmem:[#allocation7 + $0x948] sm:$0xff] }
 0x1a6   :  { %1963 = vmatpush2.msra.mxu1 %v1523_v44  ;;  %1894 = vmatpush2.msra.mxu0 %v1391_v45  ;;  %v1740_v43 = vld [vmem:[#allocation7 + $0xd88] sm:$0xff]  ;;  %v1603_v44 = vld [vmem:[#allocation7 + $0x940] sm:$0xff] }
 0x1a7   :  { %1964 = vmatprep.subr.mxu1 %v1520_v46  ;;  %1895 = vmatprep.subr.mxu0 %v1388_v47  ;;  %v1739_v45 = vld [vmem:[#allocation7 + $0xd80] sm:$0xff]  ;;  %v1600_v46 = vld [vmem:[#allocation7 + $0x928] sm:$0xff] }
 0x1a8   :  { %1965 = vmatpush2.msra.mxu1 %v1519_v49  ;;  %1896 = vmatpush2.msra.mxu0 %v1387_v50  ;;  %v1736_v47 = vld [vmem:[#allocation7 + $0xd68] sm:$0xff]  ;;  %v1599_v49 = vld [vmem:[#allocation7 + $0x920] sm:$0xff] }
 0x1a9   :  { %1966 = vmatprep.subr.mxu1 %v1516_v51  ;;  %1897 = vmatprep.subr.mxu0 %v1384_v53  ;;  %v1735_v50 = vld [vmem:[#allocation7 + $0xd60] sm:$0xff]  ;;  %v1596_v51 = vld [vmem:[#allocation7 + $0x908] sm:$0xff] }
 0x1aa   :  { %1967 = vmatpush2.msra.mxu1 %v1515_v55  ;;  %1898 = vmatpush2.msra.mxu0 %v1383_v56  ;;  %v1732_v53 = vld [vmem:[#allocation7 + $0xd48] sm:$0xff]  ;;  %v1595_v55 = vld [vmem:[#allocation7 + $0x900] sm:$0xff] }
 0x1ab   :  { %1968 = vmatprep.subr.mxu1 %v1512_v57  ;;  %1899 = vmatprep.subr.mxu0 %v1380_v58  ;;  %v1731_v56 = vld [vmem:[#allocation7 + $0xd40] sm:$0xff]  ;;  %v1592_v57 = vld [vmem:[#allocation7 + $0x8e8] sm:$0xff] }
 0x1ac   :  { %v923_v62 = vpop.f32.mrf.mxu0  ;;  %1969 = vmatpush2.msra.mxu1 %v1511_v60  ;;  %1900 = vmatpush2.msra.mxu0 %v1379_v61  ;;  %v1728_v58 = vld [vmem:[#allocation7 + $0xd28] sm:$0xff]  ;;  %v1727_v60 = vld [vmem:[#allocation7 + $0xd20] sm:$0xff] }
 0x1ad   :  { %v924_v6 = vadd.f32 %v923_v62, %v664_v59  ;;  %1970 = vmatprep.subr.mxu1 %v1508_v63  ;;  %1901 = vmatprep.subr.mxu0 %v1376_v0  ;;  %v1591_v59 = vld [vmem:[#allocation7 + $0x8e0] sm:$0xff]  ;;  %v1588_v61 = vld [vmem:[#allocation7 + $0x8c8] sm:$0xff] }
 0x1ae   :  { %v994_v10 = vpop.f32.mrf.mxu1  ;;  %v925_v27 = vpop.f32.mrf.mxu0  ;;  %1971 = vmatpush2.msra.mxu1 %v1507_v2  ;;  %1902 = vmatpush2.msra.mxu0 %v1375_v11  ;;  %v1724_v63 = vld [vmem:[#allocation7 + $0xd08] sm:$0xff]  ;;  %v1587_v0 = vld [vmem:[#allocation7 + $0x8c0] sm:$0xff] }
 0x1af   :  { %v995_v13 = vadd.f32 %v994_v10, %v924_v6  ;;  %v926_v14 = vadd.f32 %v925_v27, %v668_v8  ;;  %1972 = vmatprep.subr.mxu1 %v1504_v3  ;;  %1903 = vmatprep.subr.mxu0 %v1372_v5  ;;  %v1723_v8 = vld [vmem:[#allocation7 + $0xd00] sm:$0xff]  ;;  %v1584_v2 = vld [vmem:[#allocation7 + $0x8a8] sm:$0xff] }
 0x1b0   :  { %v996_v16 = vpop.f32.mrf.mxu1  ;;  %1973 = vmatpush2.msra.mxu1 %v1503_v7  ;;  %1904 = vmatpush2.msra.mxu0 %v1371_v9  ;;  %v1720_v11 = vld [vmem:[#allocation7 + $0xce8] sm:$0xff]  ;;  %v1583_v62 = vld [vmem:[#allocation7 + $0x8a0] sm:$0xff] }
 0x1b1   :  { %v997_v20 = vadd.f32 %v996_v16, %v926_v14  ;;  %1974 = vmatprep.subr.mxu1 %v1500_v12  ;;  %1906 = vmatmul.mubr.f32.vlgmr.msra.gmra.mxu0 %v3333_v19  ;;  %v1293_v22 = vmul.f32 0.01, %v995_v13  ;;  %vm1285_vm2 = vcmp.ge.f32.partialorder %v995_v13, 0.0  ;;  %v1719_v3 = vld [vmem:[#allocation7 + $0xce0] sm:$0xff]  ;;  %v1716_v5 = vld [vmem:[#allocation7 + $0xcc8] sm:$0xff] }
 0x1b2   :  { %1975 = vmatpush2.msra.mxu1 %v1499_v15  ;;  %1983 = vmatprep.subr.mxu0 %v1624_v17  ;;  %v1579_v6 = vld [vmem:[#allocation7 + $0x880] sm:$0xff]  ;;  %v1576_v9 = vld [vmem:[#allocation7 + $0x868] sm:$0xff] }
 0x1b3   :  { %v1294_v25 = vmul.f32 0.01, %v997_v20  ;;  %vm1286_vm3 = vcmp.ge.f32.partialorder %v997_v20, 0.0  ;;  %2054 = vmatprep.subr.mxu1 %v1752_v18  ;;  %1984 = vmatpush1.msra.mxu0 %v1623_v21  ;;  %v3339_v32 = vsel %vm1285_vm2, %v995_v13, %v1293_v22  ;;  %v1715_v7 = vld [vmem:[#allocation7 + $0xcc0] sm:$0xff]  ;;  %v1712_v10 = vld [vmem:[#allocation7 + $0xca8] sm:$0xff] }
 0x1b4   :  { %1985 = vmatprep.subr.mxu0 %v1620_v23  ;;  %v1575_v27 = vld [vmem:[#allocation7 + $0x860] sm:$0xff]  ;;  %v1572_v13 = vld [vmem:[#allocation7 + $0x848] sm:$0xff] }
 0x1b5   :  { %v3336_v29 = vsel %vm1286_vm3, %v997_v20, %v1294_v25  ;;  %1986 = vmatpush1.msra.mxu0 %v1619_v26  ;;  %v1711_v12 = vld [vmem:[#allocation7 + $0xca0] sm:$0xff]  ;;  %v1708_v14 = vld [vmem:[#allocation7 + $0xc88] sm:$0xff] }
 0x1b6   :  { %1976 = vmatprep.mubr.f32.mxu1 %v3336_v29  ;;  %1987 = vmatprep.subr.mxu0 %v1616_v28  ;;  %v1571_v15 = vld [vmem:[#allocation7 + $0x840] sm:$0xff]  ;;  %v1568_v17 = vld [vmem:[#allocation7 + $0x828] sm:$0xff] }
 0x1b7   :  { %1977 = vmatmul.mubr.f32.vlgmr.msra.gmra.mxu1 %v3339_v32  ;;  %1988 = vmatpush1.msra.mxu0 %v1615_v52  ;;  %v1707_v16 = vld [vmem:[#allocation7 + $0xc80] sm:$0xff]  ;;  %v1704_v18 = vld [vmem:[#allocation7 + $0xc68] sm:$0xff] }
 0x1b8   :  { %2055 = vmatpush1.msra.mxu1 %v1751_v31  ;;  %1989 = vmatprep.subr.mxu0 %v1612_v33  ;;  %v1567_v20 = vld [vmem:[#allocation7 + $0x820] sm:$0xff]  ;;  %v1564_v22 = vld [vmem:[#allocation7 + $0x808] sm:$0xff] }
 0x1b9   :  { %2056 = vmatprep.subr.mxu1 %v1748_v34  ;;  %1990 = vmatpush1.msra.mxu0 %v1611_v35  ;;  %v1703_v21 = vld [vmem:[#allocation7 + $0xc60] sm:$0xff]  ;;  %v1700_v23 = vld [vmem:[#allocation7 + $0xc48] sm:$0xff] }
 0x1ba   :  { %2057 = vmatpush1.msra.mxu1 %v1747_v36  ;;  %1991 = vmatprep.subr.mxu0 %v1608_v37  ;;  %v1563_v25 = vld [vmem:[#allocation7 + $0x800] sm:$0xff]  ;;  %v1688_v28 = vld [vmem:[#allocation7 + $0xbe8] sm:$0xff] }
 0x1bb   :  { %2058 = vmatprep.subr.mxu1 %v1744_v38  ;;  %1992 = vmatpush1.msra.mxu0 %v1607_v39  ;;  %v1699_v26 = vld [vmem:[#allocation7 + $0xc40] sm:$0xff]  ;;  %v1696_v52 = vld [vmem:[#allocation7 + $0xc28] sm:$0xff] }
 0x1bc   :  { %2059 = vmatpush1.msra.mxu1 %v1743_v40  ;;  %1993 = vmatprep.subr.mxu0 %v1604_v42  ;;  %v1687_v31 = vld [vmem:[#allocation7 + $0xbe0] sm:$0xff]  ;;  %v1684_v34 = vld [vmem:[#allocation7 + $0xbc8] sm:$0xff] }
 0x1bd   :  { %2060 = vmatprep.subr.mxu1 %v1740_v43  ;;  %1994 = vmatpush1.msra.mxu0 %v1603_v44  ;;  %v1695_v33 = vld [vmem:[#allocation7 + $0xc20] sm:$0xff]  ;;  %v1692_v35 = vld [vmem:[#allocation7 + $0xc08] sm:$0xff] }
 0x1be   :  { %2061 = vmatpush1.msra.mxu1 %v1739_v45  ;;  %1995 = vmatprep.subr.mxu0 %v1600_v46  ;;  %v1683_v36 = vld [vmem:[#allocation7 + $0xbc0] sm:$0xff]  ;;  %v1680_v38 = vld [vmem:[#allocation7 + $0xba8] sm:$0xff] }
 0x1bf   :  { %2062 = vmatprep.subr.mxu1 %v1736_v47  ;;  %1996 = vmatpush1.msra.mxu0 %v1599_v49  ;;  %v1691_v37 = vld [vmem:[#allocation7 + $0xc00] sm:$0xff]  ;;  %v1816_v39 = vld [vmem:[#allocation7 + $0xfe8] sm:$0xff] }
 0x1c0   :  { %2063 = vmatpush1.msra.mxu1 %v1735_v50  ;;  %1997 = vmatprep.subr.mxu0 %v1596_v51  ;;  %v1679_v40 = vld [vmem:[#allocation7 + $0xba0] sm:$0xff]  ;;  %v1676_v43 = vld [vmem:[#allocation7 + $0xb88] sm:$0xff] }
 0x1c1   :  { %2064 = vmatprep.subr.mxu1 %v1732_v53  ;;  %1998 = vmatpush1.msra.mxu0 %v1595_v55  ;;  %v1815_v42 = vld [vmem:[#allocation7 + $0xfe0] sm:$0xff]  ;;  %v1812_v44 = vld [vmem:[#allocation7 + $0xfc8] sm:$0xff] }
 0x1c2   :  { %2065 = vmatpush1.msra.mxu1 %v1731_v56  ;;  %1999 = vmatprep.subr.mxu0 %v1592_v57  ;;  %v1675_v45 = vld [vmem:[#allocation7 + $0xb80] sm:$0xff]  ;;  %v1672_v47 = vld [vmem:[#allocation7 + $0xb68] sm:$0xff] }
 0x1c3   :  { %2066 = vmatprep.subr.mxu1 %v1728_v58  ;;  %2000 = vmatpush1.msra.mxu0 %v1591_v59  ;;  %v1811_v46 = vld [vmem:[#allocation7 + $0xfc0] sm:$0xff]  ;;  %v1808_v49 = vld [vmem:[#allocation7 + $0xfa8] sm:$0xff] }
 0x1c4   :  { %2067 = vmatpush1.msra.mxu1 %v1727_v60  ;;  %2001 = vmatprep.subr.mxu0 %v1588_v61  ;;  %v1671_v50 = vld [vmem:[#allocation7 + $0xb60] sm:$0xff]  ;;  %v1668_v53 = vld [vmem:[#allocation7 + $0xb48] sm:$0xff] }
 0x1c5   :  { %2068 = vmatprep.subr.mxu1 %v1724_v63  ;;  %2002 = vmatpush1.msra.mxu0 %v1587_v0  ;;  %v1807_v51 = vld [vmem:[#allocation7 + $0xfa0] sm:$0xff]  ;;  %v1804_v55 = vld [vmem:[#allocation7 + $0xf88] sm:$0xff] }
 0x1c6   :  { %2069 = vmatpush1.msra.mxu1 %v1723_v8  ;;  %2003 = vmatprep.subr.mxu0 %v1584_v2  ;;  %v1667_v56 = vld [vmem:[#allocation7 + $0xb40] sm:$0xff]  ;;  %v1664_v58 = vld [vmem:[#allocation7 + $0xb28] sm:$0xff] }
 0x1c7   :  { %2070 = vmatprep.subr.mxu1 %v1720_v11  ;;  %2004 = vmatpush1.msra.mxu0 %v1583_v62  ;;  %v1803_v57 = vld [vmem:[#allocation7 + $0xf80] sm:$0xff]  ;;  %v1800_v59 = vld [vmem:[#allocation7 + $0xf68] sm:$0xff] }
 0x1c8   :  { %2071 = vmatpush1.msra.mxu1 %v1719_v3  ;;  %2005 = vmatprep.subr.mxu0 %v1580_v4  ;;  %v1663_v60 = vld [vmem:[#allocation7 + $0xb20] sm:$0xff]  ;;  %v1660_v63 = vld [vmem:[#allocation7 + $0xb08] sm:$0xff] }
 0x1c9   :  { %2072 = vmatprep.subr.mxu1 %v1716_v5  ;;  %2006 = vmatpush1.msra.mxu0 %v1579_v6  ;;  %v1799_v61 = vld [vmem:[#allocation7 + $0xf60] sm:$0xff]  ;;  %v1796_v0 = vld [vmem:[#allocation7 + $0xf48] sm:$0xff] }
 0x1ca   :  { %2073 = vmatpush1.msra.mxu1 %v1715_v7  ;;  %2007 = vmatprep.subr.mxu0 %v1576_v9  ;;  %v1659_v8 = vld [vmem:[#allocation7 + $0xb00] sm:$0xff]  ;;  %v1656_v11 = vld [vmem:[#allocation7 + $0xae8] sm:$0xff] }
 0x1cb   :  { %2074 = vmatprep.subr.mxu1 %v1712_v10  ;;  %2008 = vmatpush1.msra.mxu0 %v1575_v27  ;;  %v1795_v2 = vld [vmem:[#allocation7 + $0xf40] sm:$0xff]  ;;  %v1792_v62 = vld [vmem:[#allocation7 + $0xf28] sm:$0xff] }
 0x1cc   :  { %2075 = vmatpush1.msra.mxu1 %v1711_v12  ;;  %2009 = vmatprep.subr.mxu0 %v1572_v13  ;;  %v1655_v3 = vld [vmem:[#allocation7 + $0xae0] sm:$0xff]  ;;  %v1652_v5 = vld [vmem:[#allocation7 + $0xac8] sm:$0xff] }
 0x1cd   :  { %2076 = vmatprep.subr.mxu1 %v1708_v14  ;;  %2010 = vmatpush1.msra.mxu0 %v1571_v15  ;;  %v1791_v4 = vld [vmem:[#allocation7 + $0xf20] sm:$0xff]  ;;  %v1788_v6 = vld [vmem:[#allocation7 + $0xf08] sm:$0xff] }
 0x1ce   :  { %2077 = vmatpush1.msra.mxu1 %v1707_v16  ;;  %2011 = vmatprep.subr.mxu0 %v1568_v17  ;;  %v1651_v7 = vld [vmem:[#allocation7 + $0xac0] sm:$0xff]  ;;  %v1648_v10 = vld [vmem:[#allocation7 + $0xaa8] sm:$0xff]  ;;  %v671_v16 = vsub.s32 4, %v3271_v41 }
 0x1cf   :  { %2078 = vmatprep.subr.mxu1 %v1704_v18  ;;  %2012 = vmatpush1.msra.mxu0 %v1567_v20  ;;  %v1787_v9 = vld [vmem:[#allocation7 + $0xf00] sm:$0xff]  ;;  %v1784_v27 = vld [vmem:[#allocation7 + $0xee8] sm:$0xff] }
 0x1d0   :  { %2079 = vmatpush1.msra.mxu1 %v1703_v21  ;;  %2013 = vmatprep.subr.mxu0 %v1564_v22  ;;  %v1647_v12 = vld [vmem:[#allocation7 + $0xaa0] sm:$0xff]  ;;  %v1644_v14 = vld [vmem:[#allocation7 + $0xa88] sm:$0xff]  ;;  %v675_v22 = vsub.s32 5, %v3271_v41 }
 0x1d1   :  { %2080 = vmatprep.subr.mxu1 %v1700_v23  ;;  %2014 = vmatpush1.msra.mxu0 %v1563_v25  ;;  %v1783_v13 = vld [vmem:[#allocation7 + $0xee0] sm:$0xff]  ;;  %v1780_v15 = vld [vmem:[#allocation7 + $0xec8] sm:$0xff] }
 0x1d2   :  { %2081 = vmatpush1.msra.mxu1 %v1699_v26  ;;  %2015 = vmatprep.subr.mxu0 %v1688_v28  ;;  %v1643_v17 = vld [vmem:[#allocation7 + $0xa80] sm:$0xff]  ;;  %v1640_v20 = vld [vmem:[#allocation7 + $0xa68] sm:$0xff] }
 0x1d3   :  { %2082 = vmatprep.subr.mxu1 %v1696_v52  ;;  %2016 = vmatpush2.msra.mxu0 %v1687_v31  ;;  %v1779_v18 = vld [vmem:[#allocation7 + $0xec0] sm:$0xff]  ;;  %v1776_v21 = vld [vmem:[#allocation7 + $0xea8] sm:$0xff]  ;;  %v3344_v52 = vld [vmem:[#allocation5] sm:$0xff] }
 0x1d4   :  { %2083 = vmatpush1.msra.mxu1 %v1695_v33  ;;  %2017 = vmatprep.subr.mxu0 %v1684_v34  ;;  %v1639_v23 = vld [vmem:[#allocation7 + $0xa60] sm:$0xff]  ;;  %v1636_v26 = vld [vmem:[#allocation7 + $0xa48] sm:$0xff]  ;;  %v672_v31 = vrot.slane %v3344_v52, %v671_v16  ;;  %v1338_v16 = vld [vmem:[#allocation7 + $0xf8] sm:$0xff] }
 0x1d5   :  { %2084 = vmatprep.subr.mxu1 %v1692_v35  ;;  %2018 = vmatpush2.msra.mxu0 %v1683_v36  ;;  %v1775_v25 = vld [vmem:[#allocation7 + $0xea0] sm:$0xff]  ;;  %v1772_v28 = vld [vmem:[#allocation7 + $0xe88] sm:$0xff] }
 0x1d6   :  { %2085 = vmatpush1.msra.mxu1 %v1691_v37  ;;  %2019 = vmatprep.subr.mxu0 %v1680_v38  ;;  %v1635_v33 = vld [vmem:[#allocation7 + $0xa40] sm:$0xff]  ;;  %v1632_v35 = vld [vmem:[#allocation7 + $0xa28] sm:$0xff]  ;;  %v676_v37 = vrot.slane %v3344_v52, %v675_v22  ;;  %v1329_v22 = vld [vmem:[#allocation7 + $0xb0] sm:$0xff] }
 0x1d7   :  { %2086 = vmatprep.subr.mxu1 %v1816_v39  ;;  %2020 = vmatpush2.msra.mxu0 %v1679_v40  ;;  %v1771_v34 = vld [vmem:[#allocation7 + $0xe80] sm:$0xff]  ;;  %v1768_v36 = vld [vmem:[#allocation7 + $0xe68] sm:$0xff] }
 0x1d8   :  { %2087 = vmatpush2.msra.mxu1 %v1815_v42  ;;  %2021 = vmatprep.subr.mxu0 %v1676_v43  ;;  %v1631_v38 = vld [vmem:[#allocation7 + $0xa20] sm:$0xff]  ;;  %v1628_v42 = vld [vmem:[#allocation7 + $0xa08] sm:$0xff] }
 0x1d9   :  { %2088 = vmatprep.subr.mxu1 %v1812_v44  ;;  %2022 = vmatpush2.msra.mxu0 %v1675_v45  ;;  %v1767_v39 = vld [vmem:[#allocation7 + $0xe60] sm:$0xff]  ;;  %v1764_v43 = vld [vmem:[#allocation7 + $0xe48] sm:$0xff] }
 0x1da   :  { %2089 = vmatpush2.msra.mxu1 %v1811_v46  ;;  %2023 = vmatprep.subr.mxu0 %v1672_v47  ;;  %v1627_v45 = vld [vmem:[#allocation7 + $0xa00] sm:$0xff] }
 0x1db   :  { %2090 = vmatprep.subr.mxu1 %v1808_v49  ;;  %2024 = vmatpush2.msra.mxu0 %v1671_v50  ;;  %v1763_v46 = vld [vmem:[#allocation7 + $0xe40] sm:$0xff]  ;;  %v1370_v50 = vld [vmem:[#allocation7 + $0x1f8] sm:$0xff] }
 0x1dc   :  { %2091 = vmatpush2.msra.mxu1 %v1807_v51  ;;  %2025 = vmatprep.subr.mxu0 %v1668_v53  ;;  %v1760_v51 = vld [vmem:[#allocation7 + $0xe28] sm:$0xff] }
 0x1dd   :  { %2092 = vmatprep.subr.mxu1 %v1804_v55  ;;  %2026 = vmatpush2.msra.mxu0 %v1667_v56  ;;  %v1759_v56 = vld [vmem:[#allocation7 + $0xe20] sm:$0xff] }
 0x1de   :  { %2093 = vmatpush2.msra.mxu1 %v1803_v57  ;;  %2027 = vmatprep.subr.mxu0 %v1664_v58  ;;  %v1756_v58 = vld [vmem:[#allocation7 + $0xe08] sm:$0xff] }
 0x1df   :  { %2094 = vmatprep.subr.mxu1 %v1800_v59  ;;  %2028 = vmatpush2.msra.mxu0 %v1663_v60  ;;  %v1755_v60 = vld [vmem:[#allocation7 + $0xe00] sm:$0xff] }
 0x1e0   :  { %2095 = vmatpush2.msra.mxu1 %v1799_v61  ;;  %2029 = vmatprep.subr.mxu0 %v1660_v63  ;;  %v1498_v63 = vld [vmem:[#allocation7 + $0x5f8] sm:$0xff] }
 0x1e1   :  { %2096 = vmatprep.subr.mxu1 %v1796_v0  ;;  %2030 = vmatpush2.msra.mxu0 %v1659_v8 }
 0x1e2   :  { %2097 = vmatpush2.msra.mxu1 %v1795_v2  ;;  %2031 = vmatprep.subr.mxu0 %v1656_v11  ;;  %v1369_v2 = vld [vmem:[#allocation7 + $0x1f0] sm:$0xff] }
 0x1e3   :  { %2098 = vmatprep.subr.mxu1 %v1792_v62  ;;  %2032 = vmatpush2.msra.mxu0 %v1655_v3  ;;  %v1366_v62 = vld [vmem:[#allocation7 + $0x1d8] sm:$0xff]  ;;  %v1365_v3 = vld [vmem:[#allocation7 + $0x1d0] sm:$0xff] }
 0x1e4   :  { %2099 = vmatpush2.msra.mxu1 %v1791_v4  ;;  %2033 = vmatprep.subr.mxu0 %v1652_v5  ;;  %v1362_v4 = vld [vmem:[#allocation7 + $0x1b8] sm:$0xff]  ;;  %v1361_v5 = vld [vmem:[#allocation7 + $0x1b0] sm:$0xff] }
 0x1e5   :  { %2100 = vmatprep.subr.mxu1 %v1788_v6  ;;  %2034 = vmatpush2.msra.mxu0 %v1651_v7  ;;  %v1358_v6 = vld [vmem:[#allocation7 + $0x198] sm:$0xff]  ;;  %v1357_v7 = vld [vmem:[#allocation7 + $0x190] sm:$0xff] }
 0x1e6   :  { %2101 = vmatpush2.msra.mxu1 %v1787_v9  ;;  %2035 = vmatprep.subr.mxu0 %v1648_v10  ;;  %v1354_v9 = vld [vmem:[#allocation7 + $0x178] sm:$0xff]  ;;  %v1353_v10 = vld [vmem:[#allocation7 + $0x170] sm:$0xff] }
 0x1e7   :  { %2102 = vmatprep.subr.mxu1 %v1784_v27  ;;  %2036 = vmatpush2.msra.mxu0 %v1647_v12  ;;  %v1350_v27 = vld [vmem:[#allocation7 + $0x158] sm:$0xff]  ;;  %v1349_v12 = vld [vmem:[#allocation7 + $0x150] sm:$0xff] }
 0x1e8   :  { %2103 = vmatpush2.msra.mxu1 %v1783_v13  ;;  %2037 = vmatprep.subr.mxu0 %v1644_v14  ;;  %v1346_v13 = vld [vmem:[#allocation7 + $0x138] sm:$0xff]  ;;  %v1345_v14 = vld [vmem:[#allocation7 + $0x130] sm:$0xff] }
 0x1e9   :  { %2104 = vmatprep.subr.mxu1 %v1780_v15  ;;  %2038 = vmatpush2.msra.mxu0 %v1643_v17  ;;  %v1341_v15 = vld [vmem:[#allocation7 + $0x110] sm:$0xff] }
 0x1ea   :  { %2105 = vmatpush2.msra.mxu1 %v1779_v18  ;;  %2039 = vmatprep.subr.mxu0 %v1640_v20  ;;  %v1337_v17 = vld [vmem:[#allocation7 + $0xf0] sm:$0xff]  ;;  %v1334_v18 = vld [vmem:[#allocation7 + $0xd8] sm:$0xff] }
 0x1eb   :  { %2106 = vmatprep.subr.mxu1 %v1776_v21  ;;  %2040 = vmatpush2.msra.mxu0 %v1639_v23  ;;  %v1333_v20 = vld [vmem:[#allocation7 + $0xd0] sm:$0xff]  ;;  %v1330_v21 = vld [vmem:[#allocation7 + $0xb8] sm:$0xff] }
 0x1ec   :  { %2107 = vmatpush2.msra.mxu1 %v1775_v25  ;;  %2041 = vmatprep.subr.mxu0 %v1636_v26  ;;  %v1326_v23 = vld [vmem:[#allocation7 + $0x98] sm:$0xff]  ;;  %v1325_v25 = vld [vmem:[#allocation7 + $0x90] sm:$0xff] }
 0x1ed   :  { %2108 = vmatprep.subr.mxu1 %v1772_v28  ;;  %2042 = vmatpush2.msra.mxu0 %v1635_v33  ;;  %v1322_v26 = vld [vmem:[#allocation7 + $0x78] sm:$0xff]  ;;  %v1321_v28 = vld [vmem:[#allocation7 + $0x70] sm:$0xff] }
 0x1ee   :  { %v1065_v40 = vpop.f32.mrf.mxu0  ;;  %2109 = vmatpush2.msra.mxu1 %v1771_v34  ;;  %2043 = vmatprep.subr.mxu0 %v1632_v35  ;;  %v1317_v33 = vld [vmem:[#allocation7 + $0x50] sm:$0xff]  ;;  %v1314_v34 = vld [vmem:[#allocation7 + $0x38] sm:$0xff] }
 0x1ef   :  { %v1066_v44 = vadd.f32 %v1065_v40, %v672_v31  ;;  %2110 = vmatprep.subr.mxu1 %v1768_v36  ;;  %2044 = vmatpush2.msra.mxu0 %v1631_v38  ;;  %v1318_v31 = vld [vmem:[#allocation7 + $0x58] sm:$0xff]  ;;  %v1313_v35 = vld [vmem:[#allocation7 + $0x30] sm:$0xff] }
 0x1f0   :  { %v1136_v47 = vpop.f32.mrf.mxu1  ;;  %v1067_v49 = vpop.f32.mrf.mxu0  ;;  %2111 = vmatpush2.msra.mxu1 %v1767_v39  ;;  %2045 = vmatprep.subr.mxu0 %v1628_v42  ;;  %v1310_v36 = vld [vmem:[#allocation7 + $0x18] sm:$0xff]  ;;  %v1433_v39 = vld [vmem:[#allocation7 + $0x3f0] sm:$0xff] }
 0x1f1   :  { %v1137_v53 = vadd.f32 %v1136_v47, %v1066_v44  ;;  %v1068_v55 = vadd.f32 %v1067_v49, %v676_v37  ;;  %2112 = vmatprep.subr.mxu1 %v1764_v43  ;;  %2046 = vmatpush2.msra.mxu0 %v1627_v45  ;;  %v1309_v37 = vld [vmem:[#allocation7 + $0x10] sm:$0xff]  ;;  %v1434_v38 = vld [vmem:[#allocation7 + $0x3f8] sm:$0xff] }
 0x1f2   :  { %v1138_v57 = vpop.f32.mrf.mxu1  ;;  %2113 = vmatpush2.msra.mxu1 %v1763_v46  ;;  %2125 = vmatprep.subr.mxu0 %v1370_v50  ;;  %v1430_v40 = vld [vmem:[#allocation7 + $0x3d8] sm:$0xff]  ;;  %v1429_v42 = vld [vmem:[#allocation7 + $0x3d0] sm:$0xff] }
 0x1f3   :  { %v1139_v59 = vadd.f32 %v1138_v57, %v1068_v55  ;;  %2114 = vmatprep.subr.mxu1 %v1760_v51  ;;  %v1295_v61 = vmul.f32 0.01, %v1137_v53  ;;  %vm1287_vm4 = vcmp.ge.f32.partialorder %v1137_v53, 0.0  ;;  %v1426_v43 = vld [vmem:[#allocation7 + $0x3b8] sm:$0xff]  ;;  %v1425_v44 = vld [vmem:[#allocation7 + $0x3b0] sm:$0xff] }
 0x1f4   :  { %2115 = vmatpush2.msra.mxu1 %v1759_v56  ;;  %v1422_v45 = vld [vmem:[#allocation7 + $0x398] sm:$0xff]  ;;  %v1421_v46 = vld [vmem:[#allocation7 + $0x390] sm:$0xff] }
 0x1f5   :  { %v1296_v0 = vmul.f32 0.01, %v1139_v59  ;;  %vm1288_vm5 = vcmp.ge.f32.partialorder %v1139_v59, 0.0  ;;  %2116 = vmatprep.subr.mxu1 %v1756_v58  ;;  %v3351_v11 = vsel %vm1287_vm4, %v1137_v53, %v1295_v61  ;;  %v1418_v47 = vld [vmem:[#allocation7 + $0x378] sm:$0xff]  ;;  %v1417_v49 = vld [vmem:[#allocation7 + $0x370] sm:$0xff] }
 0x1f6   :  { %2117 = vmatpush2.msra.mxu1 %v1755_v60  ;;  %v1414_v50 = vld [vmem:[#allocation7 + $0x358] sm:$0xff]  ;;  %v1413_v51 = vld [vmem:[#allocation7 + $0x350] sm:$0xff] }
 0x1f7   :  { %v3348_v8 = vsel %vm1288_vm5, %v1139_v59, %v1296_v0  ;;  %2196 = vmatprep.subr.mxu1 %v1498_v63  ;;  %v1410_v53 = vld [vmem:[#allocation7 + $0x338] sm:$0xff]  ;;  %v1409_v55 = vld [vmem:[#allocation7 + $0x330] sm:$0xff]  ;;  %v679_v0 = vsub.s32 6, %v3271_v41 }
 0x1f8   :  { %2047 = vmatprep.mubr.f32.mxu0 %v3348_v8  ;;  %v1406_v56 = vld [vmem:[#allocation7 + $0x318] sm:$0xff]  ;;  %v1405_v57 = vld [vmem:[#allocation7 + $0x310] sm:$0xff] }
 0x1f9   :  { %2048 = vmatmul.mubr.f32.vlgmr.msra.gmra.mxu0 %v3351_v11  ;;  %v1402_v58 = vld [vmem:[#allocation7 + $0x2f8] sm:$0xff]  ;;  %v1401_v59 = vld [vmem:[#allocation7 + $0x2f0] sm:$0xff] }
 0x1fa   :  { %2126 = vmatpush1.msra.mxu0 %v1369_v2  ;;  %2189 = vmatprep.mubr.f32.mxu0 %v3317_v1  ;;  %v1342_v1 = vld [vmem:[#allocation7 + $0x118] sm:$0xff]  ;;  %v1397_v61 = vld [vmem:[#allocation7 + $0x2d0] sm:$0xff] }
 0x1fb   :  { %2127 = vmatprep.subr.mxu0 %v1366_v62  ;;  %v1398_v60 = vld [vmem:[#allocation7 + $0x2d8] sm:$0xff]  ;;  %v1393_v2 = vld [vmem:[#allocation7 + $0x2b0] sm:$0xff] }
 0x1fc   :  { %2128 = vmatpush1.msra.mxu0 %v1365_v3  ;;  %v1394_v63 = vld [vmem:[#allocation7 + $0x2b8] sm:$0xff]  ;;  %v683_v3 = vsub.s32 7, %v3271_v41 }
 0x1fd   :  { %2129 = vmatprep.subr.mxu0 %v1362_v4  ;;  %v1390_v62 = vld [vmem:[#allocation7 + $0x298] sm:$0xff]  ;;  %v1389_v4 = vld [vmem:[#allocation7 + $0x290] sm:$0xff] }
 0x1fe   :  { %2130 = vmatpush1.msra.mxu0 %v1361_v5  ;;  %v680_v5 = vrot.slane %v3344_v52, %v679_v0  ;;  %v1594_v0 = vld [vmem:[#allocation7 + $0x8f8] sm:$0xff] }
 0x1ff   :  { %2131 = vmatprep.subr.mxu0 %v1358_v6  ;;  %v1386_v6 = vld [vmem:[#allocation7 + $0x278] sm:$0xff] }
 0x200   :  { %2132 = vmatpush1.msra.mxu0 %v1357_v7  ;;  %v1385_v7 = vld [vmem:[#allocation7 + $0x270] sm:$0xff] }
 0x201   :  { %2133 = vmatprep.subr.mxu0 %v1354_v9  ;;  %v684_v9 = vrot.slane %v3344_v52, %v683_v3  ;;  %v1626_v52 = vld [vmem:[#allocation7 + $0x9f8] sm:$0xff] }
 0x202   :  { %2134 = vmatpush1.msra.mxu0 %v1353_v10  ;;  %v1382_v10 = vld [vmem:[#allocation7 + $0x258] sm:$0xff] }
 0x203   :  { %2135 = vmatprep.subr.mxu0 %v1350_v27  ;;  %v1466_v3 = vld [vmem:[#allocation7 + $0x4f8] sm:$0xff] }
 0x204   :  { %2136 = vmatpush1.msra.mxu0 %v1349_v12 }
 0x205   :  { %2137 = vmatprep.subr.mxu0 %v1346_v13  ;;  %v1381_v13 = vld [vmem:[#allocation7 + $0x250] sm:$0xff] }
 0x206   :  { %2138 = vmatpush1.msra.mxu0 %v1345_v14 }
 0x207   :  { %2139 = vmatprep.subr.mxu0 %v1342_v1  ;;  %v1378_v1 = vld [vmem:[#allocation7 + $0x238] sm:$0xff] }
 0x208   :  { %2140 = vmatpush1.msra.mxu0 %v1341_v15 }
 0x209   :  { %2141 = vmatprep.subr.mxu0 %v1338_v16  ;;  %v1377_v16 = vld [vmem:[#allocation7 + $0x230] sm:$0xff] }
 0x20a   :  { %2142 = vmatpush1.msra.mxu0 %v1337_v17 }
 0x20b   :  { %2143 = vmatprep.subr.mxu0 %v1334_v18 }
 0x20c   :  { %2144 = vmatpush1.msra.mxu0 %v1333_v20  ;;  %v1374_v20 = vld [vmem:[#allocation7 + $0x218] sm:$0xff] }
 0x20d   :  { %2145 = vmatprep.subr.mxu0 %v1330_v21 }
 0x20e   :  { %2146 = vmatpush1.msra.mxu0 %v1329_v22  ;;  %v1373_v22 = vld [vmem:[#allocation7 + $0x210] sm:$0xff] }
 0x20f   :  { %2147 = vmatprep.subr.mxu0 %v1326_v23 }
 0x210   :  { %2148 = vmatpush1.msra.mxu0 %v1325_v25 }
 0x211   :  { %2149 = vmatprep.subr.mxu0 %v1322_v26  ;;  %v1625_v26 = vld [vmem:[#allocation7 + $0x9f0] sm:$0xff] }
 0x212   :  { %2150 = vmatpush1.msra.mxu0 %v1321_v28 }
 0x213   :  { %2151 = vmatprep.subr.mxu0 %v1318_v31  ;;  %v1622_v31 = vld [vmem:[#allocation7 + $0x9d8] sm:$0xff] }
 0x214   :  { %2152 = vmatpush1.msra.mxu0 %v1317_v33  ;;  %v1621_v33 = vld [vmem:[#allocation7 + $0x9d0] sm:$0xff] }
 0x215   :  { %2153 = vmatprep.subr.mxu0 %v1314_v34 }
 0x216   :  { %2154 = vmatpush1.msra.mxu0 %v1313_v35  ;;  %v1497_v35 = vld [vmem:[#allocation7 + $0x5f0] sm:$0xff] }
 0x217   :  { %2155 = vmatprep.subr.mxu0 %v1310_v36 }
 0x218   :  { %2156 = vmatpush1.msra.mxu0 %v1309_v37  ;;  %v1494_v37 = vld [vmem:[#allocation7 + $0x5d8] sm:$0xff] }
 0x219   :  { %2157 = vmatprep.subr.mxu0 %v1434_v38  ;;  %v1618_v38 = vld [vmem:[#allocation7 + $0x9b8] sm:$0xff] }
 0x21a   :  { %2158 = vmatpush2.msra.mxu0 %v1433_v39  ;;  %v1493_v39 = vld [vmem:[#allocation7 + $0x5d0] sm:$0xff] }
 0x21b   :  { %2159 = vmatprep.subr.mxu0 %v1430_v40  ;;  %v1490_v40 = vld [vmem:[#allocation7 + $0x5b8] sm:$0xff] }
 0x21c   :  { %2160 = vmatpush2.msra.mxu0 %v1429_v42  ;;  %v1614_v42 = vld [vmem:[#allocation7 + $0x998] sm:$0xff] }
 0x21d   :  { %2161 = vmatprep.subr.mxu0 %v1426_v43  ;;  %v1613_v43 = vld [vmem:[#allocation7 + $0x990] sm:$0xff] }
 0x21e   :  { %2162 = vmatpush2.msra.mxu0 %v1425_v44  ;;  %v1486_v44 = vld [vmem:[#allocation7 + $0x598] sm:$0xff] }
 0x21f   :  { %2163 = vmatprep.subr.mxu0 %v1422_v45  ;;  %v1610_v45 = vld [vmem:[#allocation7 + $0x978] sm:$0xff] }
 0x220   :  { %2164 = vmatpush2.msra.mxu0 %v1421_v46  ;;  %v1485_v46 = vld [vmem:[#allocation7 + $0x590] sm:$0xff] }
 0x221   :  { %2165 = vmatprep.subr.mxu0 %v1418_v47  ;;  %v1609_v47 = vld [vmem:[#allocation7 + $0x970] sm:$0xff] }
 0x222   :  { %2166 = vmatpush2.msra.mxu0 %v1417_v49  ;;  %v1482_v49 = vld [vmem:[#allocation7 + $0x578] sm:$0xff] }
 0x223   :  { %2167 = vmatprep.subr.mxu0 %v1414_v50  ;;  %v1606_v50 = vld [vmem:[#allocation7 + $0x958] sm:$0xff] }
 0x224   :  { %2168 = vmatpush2.msra.mxu0 %v1413_v51  ;;  %v1605_v51 = vld [vmem:[#allocation7 + $0x950] sm:$0xff] }
 0x225   :  { %2169 = vmatprep.subr.mxu0 %v1410_v53  ;;  %v1478_v53 = vld [vmem:[#allocation7 + $0x558] sm:$0xff] }
 0x226   :  { %2170 = vmatpush2.msra.mxu0 %v1409_v55  ;;  %v1602_v55 = vld [vmem:[#allocation7 + $0x938] sm:$0xff] }
 0x227   :  { %2171 = vmatprep.subr.mxu0 %v1406_v56  ;;  %v1477_v56 = vld [vmem:[#allocation7 + $0x550] sm:$0xff] }
 0x228   :  { %2172 = vmatpush2.msra.mxu0 %v1405_v57  ;;  %v1601_v57 = vld [vmem:[#allocation7 + $0x930] sm:$0xff] }
 0x229   :  { %2173 = vmatprep.subr.mxu0 %v1402_v58  ;;  %v1474_v58 = vld [vmem:[#allocation7 + $0x538] sm:$0xff] }
 0x22a   :  { %2174 = vmatpush2.msra.mxu0 %v1401_v59  ;;  %v1598_v59 = vld [vmem:[#allocation7 + $0x918] sm:$0xff] }
 0x22b   :  { %2175 = vmatprep.subr.mxu0 %v1398_v60  ;;  %v1473_v60 = vld [vmem:[#allocation7 + $0x530] sm:$0xff] }
 0x22c   :  { %2176 = vmatpush2.msra.mxu0 %v1397_v61  ;;  %v1597_v61 = vld [vmem:[#allocation7 + $0x910] sm:$0xff] }
 0x22d   :  { %2177 = vmatprep.subr.mxu0 %v1394_v63  ;;  %v1470_v63 = vld [vmem:[#allocation7 + $0x518] sm:$0xff] }
 0x22e   :  { %2178 = vmatpush2.msra.mxu0 %v1393_v2  ;;  %v1469_v2 = vld [vmem:[#allocation7 + $0x510] sm:$0xff] }
 0x22f   :  { %2179 = vmatprep.subr.mxu0 %v1390_v62  ;;  %v1593_v62 = vld [vmem:[#allocation7 + $0x8f0] sm:$0xff] }
 0x230   :  { %2180 = vmatpush2.msra.mxu0 %v1389_v4  ;;  %v1207_v27 = vpop.f32.mrf.mxu0  ;;  %v1590_v4 = vld [vmem:[#allocation7 + $0x8d8] sm:$0xff] }
 0x231   :  { %v1278_v12 = vpop.f32.mrf.mxu1  ;;  %2181 = vmatprep.subr.mxu0 %v1386_v6  ;;  %v1208_v14 = vadd.f32 %v1207_v27, %v680_v5  ;;  %v1465_v5 = vld [vmem:[#allocation7 + $0x4f0] sm:$0xff] }
 0x232   :  { %2182 = vmatpush2.msra.mxu0 %v1385_v7  ;;  %v1209_v15 = vpop.f32.mrf.mxu0  ;;  %v1589_v6 = vld [vmem:[#allocation7 + $0x8d0] sm:$0xff]  ;;  %v1462_v7 = vld [vmem:[#allocation7 + $0x4d8] sm:$0xff] }
 0x233   :  { %2183 = vmatprep.subr.mxu0 %v1382_v10  ;;  %v1279_v17 = vadd.f32 %v1278_v12, %v1208_v14  ;;  %v1210_v18 = vadd.f32 %v1209_v15, %v684_v9  ;;  %v1280_v21 = vpop.f32.mrf.mxu1  ;;  %v1586_v9 = vld [vmem:[#allocation7 + $0x8b8] sm:$0xff]  ;;  %v1461_v10 = vld [vmem:[#allocation7 + $0x4d0] sm:$0xff] }
 0x234   :  { %2184 = vmatpush2.msra.mxu0 %v1381_v13  ;;  %v1585_v27 = vld [vmem:[#allocation7 + $0x8b0] sm:$0xff]  ;;  %v1458_v12 = vld [vmem:[#allocation7 + $0x4b8] sm:$0xff] }
 0x235   :  { %2185 = vmatprep.subr.mxu0 %v1378_v1  ;;  %v1281_v23 = vadd.f32 %v1280_v21, %v1210_v18  ;;  %v1297_v25 = vmul.f32 0.01, %v1279_v17  ;;  %vm1289_vm6 = vcmp.ge.f32.partialorder %v1279_v17, 0.0  ;;  %v1582_v13 = vld [vmem:[#allocation7 + $0x898] sm:$0xff]  ;;  %v1457_v14 = vld [vmem:[#allocation7 + $0x4b0] sm:$0xff] }
 0x236   :  { %2186 = vmatpush2.msra.mxu0 %v1377_v16  ;;  %v1581_v1 = vld [vmem:[#allocation7 + $0x890] sm:$0xff]  ;;  %v1454_v15 = vld [vmem:[#allocation7 + $0x498] sm:$0xff] }
 0x237   :  { %2187 = vmatprep.subr.mxu0 %v1374_v20  ;;  %v1298_v28 = vmul.f32 0.01, %v1281_v23  ;;  %vm1290_vm7 = vcmp.ge.f32.partialorder %v1281_v23, 0.0  ;;  %v3364_v36 = vsel %vm1289_vm6, %v1279_v17, %v1297_v25  ;;  %v1578_v16 = vld [vmem:[#allocation7 + $0x878] sm:$0xff]  ;;  %v1453_v17 = vld [vmem:[#allocation7 + $0x490] sm:$0xff] }
 0x238   :  { %2188 = vmatpush2.msra.mxu0 %v1373_v22  ;;  %v1577_v18 = vld [vmem:[#allocation7 + $0x870] sm:$0xff]  ;;  %v1450_v20 = vld [vmem:[#allocation7 + $0x478] sm:$0xff] }
 0x239   :  { %2190 = vmatmul.mubr.f32.vlgmr.msra.gmra.mxu0 %v3333_v19  ;;  %2267 = vmatprep.subr.mxu0 %v1626_v52  ;;  %v3360_v34 = vsel %vm1290_vm7, %v1281_v23, %v1298_v28  ;;  %v1617_v19 = vld [vmem:[#allocation7 + $0x9b0] sm:$0xff]  ;;  %v1574_v21 = vld [vmem:[#allocation7 + $0x858] sm:$0xff] }
 0x23a   :  { %2268 = vmatpush1.msra.mxu0 %v1625_v26  ;;  %2331 = vmatprep.mubr.f32.mxu0 %v3348_v8  ;;  %v1489_v8 = vld [vmem:[#allocation7 + $0x5b0] sm:$0xff]  ;;  %v1446_v52 = vld [vmem:[#allocation7 + $0x458] sm:$0xff] }
 0x23b   :  { %2118 = vmatprep.mubr.f32.mxu1 %v3360_v34  ;;  %2269 = vmatprep.subr.mxu0 %v1622_v31  ;;  %v1449_v22 = vld [vmem:[#allocation7 + $0x470] sm:$0xff]  ;;  %v1570_v25 = vld [vmem:[#allocation7 + $0x838] sm:$0xff] }
 0x23c   :  { %2119 = vmatmul.mubr.f32.vlgmr.msra.gmra.mxu1 %v3364_v36  ;;  %2270 = vmatpush1.msra.mxu0 %v1621_v33  ;;  %v1573_v23 = vld [vmem:[#allocation7 + $0x850] sm:$0xff]  ;;  %v1442_v31 = vld [vmem:[#allocation7 + $0x438] sm:$0xff] }
 0x23d   :  { %2197 = vmatpush1.msra.mxu1 %v1497_v35  ;;  %2260 = vmatprep.mubr.f32.mxu1 %v3336_v29  ;;  %v1481_v29 = vld [vmem:[#allocation7 + $0x570] sm:$0xff]  ;;  %v1566_v33 = vld [vmem:[#allocation7 + $0x818] sm:$0xff] }
 0x23e   :  { %2198 = vmatprep.subr.mxu1 %v1494_v37  ;;  %2271 = vmatprep.subr.mxu0 %v1618_v38  ;;  %v1445_v26 = vld [vmem:[#allocation7 + $0x450] sm:$0xff]  ;;  %v1438_v38 = vld [vmem:[#allocation7 + $0x418] sm:$0xff] }
 0x23f   :  { %2199 = vmatpush1.msra.mxu1 %v1493_v39  ;;  %2272 = vmatpush1.msra.mxu0 %v1617_v19  ;;  %v1569_v28 = vld [vmem:[#allocation7 + $0x830] sm:$0xff]  ;;  %v1690_v39 = vld [vmem:[#allocation7 + $0xbf8] sm:$0xff] }
 0x240   :  { %2200 = vmatprep.subr.mxu1 %v1490_v40  ;;  %2273 = vmatprep.subr.mxu0 %v1614_v42  ;;  %v1441_v35 = vld [vmem:[#allocation7 + $0x430] sm:$0xff]  ;;  %v1562_v42 = vld [vmem:[#allocation7 + $0x7f8] sm:$0xff] }
 0x241   :  { %2201 = vmatpush1.msra.mxu1 %v1489_v8  ;;  %2274 = vmatpush1.msra.mxu0 %v1613_v43  ;;  %v1565_v37 = vld [vmem:[#allocation7 + $0x810] sm:$0xff]  ;;  %v1686_v8 = vld [vmem:[#allocation7 + $0xbd8] sm:$0xff] }
 0x242   :  { %2202 = vmatprep.subr.mxu1 %v1486_v44  ;;  %2275 = vmatprep.subr.mxu0 %v1610_v45  ;;  %v1437_v19 = vld [vmem:[#allocation7 + $0x410] sm:$0xff]  ;;  %v1558_v45 = vld [vmem:[#allocation7 + $0x7d8] sm:$0xff] }
 0x243   :  { %2203 = vmatpush1.msra.mxu1 %v1485_v46  ;;  %2276 = vmatpush1.msra.mxu0 %v1609_v47  ;;  %v1689_v40 = vld [vmem:[#allocation7 + $0xbf0] sm:$0xff]  ;;  %v1682_v46 = vld [vmem:[#allocation7 + $0xbb8] sm:$0xff] }
 0x244   :  { %2204 = vmatprep.subr.mxu1 %v1482_v49  ;;  %2277 = vmatprep.subr.mxu0 %v1606_v50  ;;  %v1561_v43 = vld [vmem:[#allocation7 + $0x7f0] sm:$0xff]  ;;  %v1554_v50 = vld [vmem:[#allocation7 + $0x7b8] sm:$0xff] }
 0x245   :  { %2205 = vmatpush1.msra.mxu1 %v1481_v29  ;;  %2278 = vmatpush1.msra.mxu0 %v1605_v51  ;;  %v1685_v44 = vld [vmem:[#allocation7 + $0xbd0] sm:$0xff]  ;;  %v1678_v29 = vld [vmem:[#allocation7 + $0xb98] sm:$0xff] }
 0x246   :  { %2206 = vmatprep.subr.mxu1 %v1478_v53  ;;  %2279 = vmatprep.subr.mxu0 %v1602_v55  ;;  %v1557_v47 = vld [vmem:[#allocation7 + $0x7d0] sm:$0xff]  ;;  %v1550_v55 = vld [vmem:[#allocation7 + $0x798] sm:$0xff] }
 0x247   :  { %2207 = vmatpush1.msra.mxu1 %v1477_v56  ;;  %2280 = vmatpush1.msra.mxu0 %v1601_v57  ;;  %v1681_v49 = vld [vmem:[#allocation7 + $0xbb0] sm:$0xff]  ;;  %v1674_v56 = vld [vmem:[#allocation7 + $0xb78] sm:$0xff] }
 0x248   :  { %2208 = vmatprep.subr.mxu1 %v1474_v58  ;;  %2281 = vmatprep.subr.mxu0 %v1598_v59  ;;  %v1553_v51 = vld [vmem:[#allocation7 + $0x7b0] sm:$0xff]  ;;  %v1546_v59 = vld [vmem:[#allocation7 + $0x778] sm:$0xff] }
 0x249   :  { %2209 = vmatpush1.msra.mxu1 %v1473_v60  ;;  %2282 = vmatpush1.msra.mxu0 %v1597_v61  ;;  %v1677_v53 = vld [vmem:[#allocation7 + $0xb90] sm:$0xff]  ;;  %v1670_v60 = vld [vmem:[#allocation7 + $0xb58] sm:$0xff] }
 0x24a   :  { %2210 = vmatprep.subr.mxu1 %v1470_v63  ;;  %2283 = vmatprep.subr.mxu0 %v1594_v0  ;;  %v1549_v57 = vld [vmem:[#allocation7 + $0x790] sm:$0xff]  ;;  %v1542_v0 = vld [vmem:[#allocation7 + $0x758] sm:$0xff] }
 0x24b   :  { %2211 = vmatpush1.msra.mxu1 %v1469_v2  ;;  %2284 = vmatpush1.msra.mxu0 %v1593_v62  ;;  %v1673_v58 = vld [vmem:[#allocation7 + $0xb70] sm:$0xff]  ;;  %v1666_v2 = vld [vmem:[#allocation7 + $0xb38] sm:$0xff] }
 0x24c   :  { %2212 = vmatprep.subr.mxu1 %v1466_v3  ;;  %2285 = vmatprep.subr.mxu0 %v1590_v4  ;;  %v1545_v61 = vld [vmem:[#allocation7 + $0x770] sm:$0xff]  ;;  %v1538_v4 = vld [vmem:[#allocation7 + $0x738] sm:$0xff] }
 0x24d   :  { %2213 = vmatpush1.msra.mxu1 %v1465_v5  ;;  %2286 = vmatpush1.msra.mxu0 %v1589_v6  ;;  %v1669_v63 = vld [vmem:[#allocation7 + $0xb50] sm:$0xff]  ;;  %v1662_v5 = vld [vmem:[#allocation7 + $0xb18] sm:$0xff] }
 0x24e   :  { %2214 = vmatprep.subr.mxu1 %v1462_v7  ;;  %2287 = vmatprep.subr.mxu0 %v1586_v9  ;;  %v1541_v62 = vld [vmem:[#allocation7 + $0x750] sm:$0xff]  ;;  %v1534_v9 = vld [vmem:[#allocation7 + $0x718] sm:$0xff] }
 0x24f   :  { %2215 = vmatpush1.msra.mxu1 %v1461_v10  ;;  %2288 = vmatpush1.msra.mxu0 %v1585_v27  ;;  %v1665_v3 = vld [vmem:[#allocation7 + $0xb30] sm:$0xff]  ;;  %v1658_v10 = vld [vmem:[#allocation7 + $0xaf8] sm:$0xff] }
 0x250   :  { %2216 = vmatprep.subr.mxu1 %v1458_v12  ;;  %2289 = vmatprep.subr.mxu0 %v1582_v13  ;;  %v1537_v6 = vld [vmem:[#allocation7 + $0x730] sm:$0xff]  ;;  %v1530_v13 = vld [vmem:[#allocation7 + $0x6f8] sm:$0xff] }
 0x251   :  { %2217 = vmatpush1.msra.mxu1 %v1457_v14  ;;  %2290 = vmatpush1.msra.mxu0 %v1581_v1  ;;  %v1661_v7 = vld [vmem:[#allocation7 + $0xb10] sm:$0xff]  ;;  %v1654_v14 = vld [vmem:[#allocation7 + $0xad8] sm:$0xff] }
 0x252   :  { %2218 = vmatprep.subr.mxu1 %v1454_v15  ;;  %2291 = vmatprep.subr.mxu0 %v1578_v16  ;;  %v1533_v27 = vld [vmem:[#allocation7 + $0x710] sm:$0xff]  ;;  %v1526_v16 = vld [vmem:[#allocation7 + $0x6d8] sm:$0xff] }
 0x253   :  { %2219 = vmatpush1.msra.mxu1 %v1453_v17  ;;  %2292 = vmatpush1.msra.mxu0 %v1577_v18  ;;  %v1657_v12 = vld [vmem:[#allocation7 + $0xaf0] sm:$0xff]  ;;  %v1650_v17 = vld [vmem:[#allocation7 + $0xab8] sm:$0xff] }
 0x254   :  { %2220 = vmatprep.subr.mxu1 %v1450_v20  ;;  %2293 = vmatprep.subr.mxu0 %v1574_v21  ;;  %v1529_v1 = vld [vmem:[#allocation7 + $0x6f0] sm:$0xff]  ;;  %v1522_v21 = vld [vmem:[#allocation7 + $0x6b8] sm:$0xff] }
 0x255   :  { %2221 = vmatpush1.msra.mxu1 %v1449_v22  ;;  %2294 = vmatpush1.msra.mxu0 %v1573_v23  ;;  %v1653_v15 = vld [vmem:[#allocation7 + $0xad0] sm:$0xff]  ;;  %v1646_v22 = vld [vmem:[#allocation7 + $0xa98] sm:$0xff] }
 0x256   :  { %2222 = vmatprep.subr.mxu1 %v1446_v52  ;;  %2295 = vmatprep.subr.mxu0 %v1570_v25  ;;  %v1525_v18 = vld [vmem:[#allocation7 + $0x6d0] sm:$0xff]  ;;  %v1518_v25 = vld [vmem:[#allocation7 + $0x698] sm:$0xff] }
 0x257   :  { %2223 = vmatpush1.msra.mxu1 %v1445_v26  ;;  %2296 = vmatpush1.msra.mxu0 %v1569_v28  ;;  %v1649_v20 = vld [vmem:[#allocation7 + $0xab0] sm:$0xff]  ;;  %v1642_v26 = vld [vmem:[#allocation7 + $0xa78] sm:$0xff] }
 0x258   :  { %2224 = vmatprep.subr.mxu1 %v1442_v31  ;;  %2297 = vmatprep.subr.mxu0 %v1566_v33  ;;  %v1521_v23 = vld [vmem:[#allocation7 + $0x6b0] sm:$0xff]  ;;  %v1514_v33 = vld [vmem:[#allocation7 + $0x678] sm:$0xff] }
 0x259   :  { %2225 = vmatpush1.msra.mxu1 %v1441_v35  ;;  %2298 = vmatpush1.msra.mxu0 %v1565_v37  ;;  %v1645_v52 = vld [vmem:[#allocation7 + $0xa90] sm:$0xff]  ;;  %v1638_v35 = vld [vmem:[#allocation7 + $0xa58] sm:$0xff] }
 0x25a   :  { %2226 = vmatprep.subr.mxu1 %v1438_v38  ;;  %2299 = vmatprep.subr.mxu0 %v1690_v39  ;;  %v1517_v28 = vld [vmem:[#allocation7 + $0x690] sm:$0xff]  ;;  %v1510_v39 = vld [vmem:[#allocation7 + $0x658] sm:$0xff] }
 0x25b   :  { %2227 = vmatpush1.msra.mxu1 %v1437_v19  ;;  %2300 = vmatpush2.msra.mxu0 %v1689_v40  ;;  %v1641_v31 = vld [vmem:[#allocation7 + $0xa70] sm:$0xff]  ;;  %v1634_v19 = vld [vmem:[#allocation7 + $0xa38] sm:$0xff] }
 0x25c   :  { %2228 = vmatprep.subr.mxu1 %v1562_v42  ;;  %2301 = vmatprep.subr.mxu0 %v1686_v8  ;;  %v1513_v37 = vld [vmem:[#allocation7 + $0x670] sm:$0xff]  ;;  %v1506_v8 = vld [vmem:[#allocation7 + $0x638] sm:$0xff] }
 0x25d   :  { %2229 = vmatpush2.msra.mxu1 %v1561_v43  ;;  %2302 = vmatpush2.msra.mxu0 %v1685_v44  ;;  %v1637_v38 = vld [vmem:[#allocation7 + $0xa50] sm:$0xff]  ;;  %v1630_v43 = vld [vmem:[#allocation7 + $0xa18] sm:$0xff] }
 0x25e   :  { %2230 = vmatprep.subr.mxu1 %v1558_v45  ;;  %2303 = vmatprep.subr.mxu0 %v1682_v46  ;;  %v1509_v40 = vld [vmem:[#allocation7 + $0x650] sm:$0xff]  ;;  %v1502_v46 = vld [vmem:[#allocation7 + $0x618] sm:$0xff] }
 0x25f   :  { %2231 = vmatpush2.msra.mxu1 %v1557_v47  ;;  %2304 = vmatpush2.msra.mxu0 %v1681_v49  ;;  %v1633_v42 = vld [vmem:[#allocation7 + $0xa30] sm:$0xff] }
 0x260   :  { %2232 = vmatprep.subr.mxu1 %v1554_v50  ;;  %2305 = vmatprep.subr.mxu0 %v1678_v29  ;;  %v1505_v44 = vld [vmem:[#allocation7 + $0x630] sm:$0xff]  ;;  %v1754_v50 = vld [vmem:[#allocation7 + $0xdf8] sm:$0xff] }
 0x261   :  { %2233 = vmatpush2.msra.mxu1 %v1553_v51  ;;  %2306 = vmatpush2.msra.mxu0 %v1677_v53  ;;  %v1629_v45 = vld [vmem:[#allocation7 + $0xa10] sm:$0xff]  ;;  %v1750_v51 = vld [vmem:[#allocation7 + $0xdd8] sm:$0xff] }
 0x262   :  { %2234 = vmatprep.subr.mxu1 %v1550_v55  ;;  %2307 = vmatprep.subr.mxu0 %v1674_v56  ;;  %v1501_v47 = vld [vmem:[#allocation7 + $0x610] sm:$0xff]  ;;  %v2451_v56 = vld [vmem:[%s3597_s5 + $0xf0] sm:$0xff] }
 0x263   :  { %2235 = vmatpush2.msra.mxu1 %v1549_v57  ;;  %2308 = vmatpush2.msra.mxu0 %v1673_v58  ;;  %v2452_v49 = vld [vmem:[%s3597_s5 + $0xf8] sm:$0xff]  ;;  %v2435_v57 = vld [vmem:[%s3597_s5 + $0x70] sm:$0xff] }
 0x264   :  { %2236 = vmatprep.subr.mxu1 %v1546_v59  ;;  %2309 = vmatprep.subr.mxu0 %v1670_v60  ;;  %v1753_v29 = vld [vmem:[#allocation7 + $0xdf0] sm:$0xff]  ;;  %v1742_v59 = vld [vmem:[#allocation7 + $0xd98] sm:$0xff]  ;;  %v2434_v60 = vld [vmem:[%s3597_s5 + $0x68] sm:$0xff] }
 0x265   :  { %2237 = vmatpush2.msra.mxu1 %v1545_v61  ;;  %2310 = vmatpush2.msra.mxu0 %v1669_v63  ;;  %v2436_v53 = vld [vmem:[%s3597_s5 + $0x78] sm:$0xff]  ;;  %v2449_v61 = vld [vmem:[%s3597_s5 + $0xe0] sm:$0xff] }
 0x266   :  { %2238 = vmatprep.subr.mxu1 %v1542_v0  ;;  %2311 = vmatprep.subr.mxu0 %v1666_v2  ;;  %v1749_v55 = vld [vmem:[#allocation7 + $0xdd0] sm:$0xff]  ;;  %v1738_v63 = vld [vmem:[#allocation7 + $0xd78] sm:$0xff] }
 0x267   :  { %2239 = vmatpush2.msra.mxu1 %v1541_v62  ;;  %2312 = vmatpush2.msra.mxu0 %v1665_v3  ;;  %v1745_v58 = vld [vmem:[#allocation7 + $0xdb0] sm:$0xff]  ;;  %v2433_v0 = vld [vmem:[%s3597_s5 + $0x60] sm:$0xff] }
 0x268   :  { %2240 = vmatprep.subr.mxu1 %v1538_v4  ;;  %2313 = vmatprep.subr.mxu0 %v1662_v5  ;;  %v1737_v2 = vld [vmem:[#allocation7 + $0xd70] sm:$0xff]  ;;  %v1734_v3 = vld [vmem:[#allocation7 + $0xd58] sm:$0xff] }
 0x269   :  { %2241 = vmatpush2.msra.mxu1 %v1537_v6  ;;  %2314 = vmatpush2.msra.mxu0 %v1661_v7  ;;  %v2448_v62 = vld [vmem:[%s3597_s5 + $0xd8] sm:$0xff]  ;;  %v2447_v6 = vld [vmem:[%s3597_s5 + $0xd0] sm:$0xff]  ;;  %v1730_v7 = vld [vmem:[#allocation7 + $0xd38] sm:$0xff] }
 0x26a   :  { %2242 = vmatprep.subr.mxu1 %v1534_v9  ;;  %2315 = vmatprep.subr.mxu0 %v1658_v10  ;;  %v2432_v4 = vld [vmem:[%s3597_s5 + $0x58] sm:$0xff]  ;;  %v2431_v9 = vld [vmem:[%s3597_s5 + $0x50] sm:$0xff] }
 0x26b   :  { %2243 = vmatpush2.msra.mxu1 %v1533_v27  ;;  %2316 = vmatpush2.msra.mxu0 %v1657_v12  ;;  %v1733_v5 = vld [vmem:[#allocation7 + $0xd50] sm:$0xff]  ;;  %v2446_v27 = vld [vmem:[%s3597_s5 + $0xc8] sm:$0xff]  ;;  %v1726_v12 = vld [vmem:[#allocation7 + $0xd18] sm:$0xff] }
 0x26c   :  { %2244 = vmatprep.subr.mxu1 %v1530_v13  ;;  %2317 = vmatprep.subr.mxu0 %v1654_v14  ;;  %v1729_v10 = vld [vmem:[#allocation7 + $0xd30] sm:$0xff]  ;;  %v2430_v13 = vld [vmem:[%s3597_s5 + $0x48] sm:$0xff] }
 0x26d   :  { %2245 = vmatpush2.msra.mxu1 %v1529_v1  ;;  %2318 = vmatpush2.msra.mxu0 %v1653_v15  ;;  %v1725_v14 = vld [vmem:[#allocation7 + $0xd10] sm:$0xff]  ;;  %v2445_v1 = vld [vmem:[%s3597_s5 + $0xc0] sm:$0xff] }
 0x26e   :  { %2246 = vmatprep.subr.mxu1 %v1526_v16  ;;  %2319 = vmatprep.subr.mxu0 %v1650_v17  ;;  %v1722_v15 = vld [vmem:[#allocation7 + $0xcf8] sm:$0xff]  ;;  %v1721_v17 = vld [vmem:[#allocation7 + $0xcf0] sm:$0xff] }
 0x26f   :  { %2247 = vmatpush2.msra.mxu1 %v1525_v18  ;;  %2320 = vmatpush2.msra.mxu0 %v1649_v20  ;;  %v2429_v16 = vld [vmem:[%s3597_s5 + $0x40] sm:$0xff]  ;;  %v2444_v18 = vld [vmem:[%s3597_s5 + $0xb8] sm:$0xff] }
 0x270   :  { %2248 = vmatprep.subr.mxu1 %v1522_v21  ;;  %2321 = vmatprep.subr.mxu0 %v1646_v22  ;;  %v1718_v20 = vld [vmem:[#allocation7 + $0xcd8] sm:$0xff]  ;;  %v2428_v21 = vld [vmem:[%s3597_s5 + $0x38] sm:$0xff] }
 0x271   :  { %2249 = vmatpush2.msra.mxu1 %v1521_v23  ;;  %2322 = vmatpush2.msra.mxu0 %v1645_v52  ;;  %v1717_v22 = vld [vmem:[#allocation7 + $0xcd0] sm:$0xff]  ;;  %v2443_v23 = vld [vmem:[%s3597_s5 + $0xb0] sm:$0xff]  ;;  %v1714_v52 = vld [vmem:[#allocation7 + $0xcb8] sm:$0xff] }
 0x272   :  { %2250 = vmatprep.subr.mxu1 %v1518_v25  ;;  %2323 = vmatprep.subr.mxu0 %v1642_v26  ;;  %v2427_v25 = vld [vmem:[%s3597_s5 + $0x30] sm:$0xff]  ;;  %v1713_v26 = vld [vmem:[#allocation7 + $0xcb0] sm:$0xff] }
 0x273   :  { %2251 = vmatpush2.msra.mxu1 %v1517_v28  ;;  %2324 = vmatpush2.msra.mxu0 %v1641_v31  ;;  %v2442_v28 = vld [vmem:[%s3597_s5 + $0xa8] sm:$0xff]  ;;  %v1710_v31 = vld [vmem:[#allocation7 + $0xc98] sm:$0xff] }
 0x274   :  { %2252 = vmatprep.subr.mxu1 %v1514_v33  ;;  %2325 = vmatprep.subr.mxu0 %v1638_v35  ;;  %v2426_v33 = vld [vmem:[%s3597_s5 + $0x28] sm:$0xff]  ;;  %v1709_v35 = vld [vmem:[#allocation7 + $0xc90] sm:$0xff] }
 0x275   :  { %2253 = vmatpush2.msra.mxu1 %v1513_v37  ;;  %2326 = vmatpush2.msra.mxu0 %v1637_v38  ;;  %v2441_v37 = vld [vmem:[%s3597_s5 + $0xa0] sm:$0xff] }
 0x276   :  { %2254 = vmatprep.subr.mxu1 %v1510_v39  ;;  %2327 = vmatprep.subr.mxu0 %v1634_v19  ;;  %v1706_v38 = vld [vmem:[#allocation7 + $0xc78] sm:$0xff]  ;;  %v1705_v19 = vld [vmem:[#allocation7 + $0xc70] sm:$0xff] }
 0x277   :  { %2255 = vmatpush2.msra.mxu1 %v1509_v40  ;;  %2328 = vmatpush2.msra.mxu0 %v1633_v42  ;;  %v2425_v39 = vld [vmem:[%s3597_s5 + $0x20] sm:$0xff]  ;;  %v2440_v40 = vld [vmem:[%s3597_s5 + $0x98] sm:$0xff] }
 0x278   :  { %2256 = vmatprep.subr.mxu1 %v1506_v8  ;;  %2329 = vmatprep.subr.mxu0 %v1630_v43  ;;  %v1702_v42 = vld [vmem:[#allocation7 + $0xc58] sm:$0xff]  ;;  %v2424_v8 = vld [vmem:[%s3597_s5 + $0x18] sm:$0xff] }
 0x279   :  { %2257 = vmatpush2.msra.mxu1 %v1505_v44  ;;  %2330 = vmatpush2.msra.mxu0 %v1629_v45  ;;  %v1701_v43 = vld [vmem:[#allocation7 + $0xc50] sm:$0xff]  ;;  %v2439_v44 = vld [vmem:[%s3597_s5 + $0x90] sm:$0xff]  ;;  %v1698_v45 = vld [vmem:[#allocation7 + $0xc38] sm:$0xff] }
 0x27a   :  { %2258 = vmatprep.subr.mxu1 %v1502_v46  ;;  %2332 = vmatmul.mubr.f32.vlgmr.msra.gmra.mxu0 %v3351_v11  ;;  %v1746_v11 = vld [vmem:[#allocation7 + $0xdb8] sm:$0xff]  ;;  %v2423_v46 = vld [vmem:[%s3597_s5 + $0x10] sm:$0xff] }
 0x27b   :  { %2259 = vmatpush2.msra.mxu1 %v1501_v47  ;;  %2851 = vmatprep.subr.mxu0 %v2452_v49  ;;  %v1697_v47 = vld [vmem:[#allocation7 + $0xc30] sm:$0xff]  ;;  %v2438_v49 = vld [vmem:[%s3597_s5 + $0x88] sm:$0xff] }
 0x27c   :  { %2261 = vmatmul.mubr.f32.vlgmr.msra.gmra.mxu1 %v3339_v32  ;;  %2338 = vmatprep.subr.mxu1 %v1754_v50  ;;  %v2450_v32 = vld [vmem:[%s3597_s5 + $0xe8] sm:$0xff]  ;;  %v1694_v50 = vld [vmem:[#allocation7 + $0xc18] sm:$0xff] }
 0x27d   :  { %2339 = vmatpush1.msra.mxu1 %v1753_v29  ;;  %2402 = vmatprep.mubr.f32.mxu1 %v3360_v34  ;;  %v1741_v34 = vld [vmem:[#allocation7 + $0xd90] sm:$0xff]  ;;  %v2422_v29 = vld [vmem:[%s3597_s5 + $0x8] sm:$0xff] }
 0x27e   :  { %2340 = vmatprep.subr.mxu1 %v1750_v51  ;;  %2852 = vmatpush3.msra.mxu0 %v2436_v53  ;;  %v1693_v51 = vld [vmem:[#allocation7 + $0xc10] sm:$0xff]  ;;  %v2437_v53 = vld [vmem:[%s3597_s5 + $0x80] sm:$0xff] }
 0x27f   :  { %2341 = vmatpush1.msra.mxu1 %v1749_v55  ;;  %2853 = vmatprep.subr.mxu0 %v2451_v56  ;;  %v1818_v55 = vld [vmem:[#allocation7 + $0xff8] sm:$0xff] }
 0x280   :  { %2342 = vmatprep.subr.mxu1 %v1746_v11  ;;  %2854 = vmatpush3.msra.mxu0 %v2435_v57  ;;  %v2421_v56 = vld [vmem:[%s3597_s5] sm:$0xff]  ;;  %v1817_v11 = vld [vmem:[#allocation7 + $0xff0] sm:$0xff] }
 0x281   :  { %2343 = vmatpush1.msra.mxu1 %v1745_v58  ;;  %2855 = vmatprep.subr.mxu0 %v2450_v32  ;;  %v1814_v57 = vld [vmem:[#allocation7 + $0xfd8] sm:$0xff]  ;;  %v1813_v58 = vld [vmem:[#allocation7 + $0xfd0] sm:$0xff] }
 0x282   :  { %2344 = vmatprep.subr.mxu1 %v1742_v59  ;;  %2856 = vmatpush3.msra.mxu0 %v2434_v60  ;;  %v1810_v32 = vld [vmem:[#allocation7 + $0xfb8] sm:$0xff]  ;;  %v1809_v59 = vld [vmem:[#allocation7 + $0xfb0] sm:$0xff] }
 0x283   :  { %2345 = vmatpush1.msra.mxu1 %v1741_v34  ;;  %2857 = vmatprep.subr.mxu0 %v2449_v61  ;;  %v1806_v60 = vld [vmem:[#allocation7 + $0xf98] sm:$0xff]  ;;  %v1805_v34 = vld [vmem:[#allocation7 + $0xf90] sm:$0xff] }
 0x284   :  { %2346 = vmatprep.subr.mxu1 %v1738_v63  ;;  %2858 = vmatpush3.msra.mxu0 %v2433_v0  ;;  %v1802_v61 = vld [vmem:[#allocation7 + $0xf78] sm:$0xff]  ;;  %v1801_v63 = vld [vmem:[#allocation7 + $0xf70] sm:$0xff] }
 0x285   :  { %2347 = vmatpush1.msra.mxu1 %v1737_v2  ;;  %2859 = vmatprep.subr.mxu0 %v2448_v62  ;;  %v1798_v0 = vld [vmem:[#allocation7 + $0xf58] sm:$0xff]  ;;  %v1797_v2 = vld [vmem:[#allocation7 + $0xf50] sm:$0xff] }
 0x286   :  { %2348 = vmatprep.subr.mxu1 %v1734_v3  ;;  %2860 = vmatpush3.msra.mxu0 %v2432_v4  ;;  %v1794_v62 = vld [vmem:[#allocation7 + $0xf38] sm:$0xff]  ;;  %v1793_v3 = vld [vmem:[#allocation7 + $0xf30] sm:$0xff] }
 0x287   :  { %2349 = vmatpush1.msra.mxu1 %v1733_v5  ;;  %2861 = vmatprep.subr.mxu0 %v2447_v6  ;;  %v1790_v4 = vld [vmem:[#allocation7 + $0xf18] sm:$0xff]  ;;  %v1789_v5 = vld [vmem:[#allocation7 + $0xf10] sm:$0xff] }
 0x288   :  { %2350 = vmatprep.subr.mxu1 %v1730_v7  ;;  %2862 = vmatpush3.msra.mxu0 %v2431_v9  ;;  %v1786_v6 = vld [vmem:[#allocation7 + $0xef8] sm:$0xff]  ;;  %v1785_v7 = vld [vmem:[#allocation7 + $0xef0] sm:$0xff] }
 0x289   :  { %2351 = vmatpush1.msra.mxu1 %v1729_v10  ;;  %2863 = vmatprep.subr.mxu0 %v2446_v27  ;;  %v1782_v9 = vld [vmem:[#allocation7 + $0xed8] sm:$0xff]  ;;  %v1781_v10 = vld [vmem:[#allocation7 + $0xed0] sm:$0xff] }
 0x28a   :  { %2352 = vmatprep.subr.mxu1 %v1726_v12  ;;  %2864 = vmatpush3.msra.mxu0 %v2430_v13  ;;  %v1778_v27 = vld [vmem:[#allocation7 + $0xeb8] sm:$0xff]  ;;  %v1777_v12 = vld [vmem:[#allocation7 + $0xeb0] sm:$0xff] }
 0x28b   :  { %2353 = vmatpush1.msra.mxu1 %v1725_v14  ;;  %2865 = vmatprep.subr.mxu0 %v2445_v1  ;;  %v1774_v13 = vld [vmem:[#allocation7 + $0xe98] sm:$0xff]  ;;  %v1773_v14 = vld [vmem:[#allocation7 + $0xe90] sm:$0xff] }
 0x28c   :  { %2354 = vmatprep.subr.mxu1 %v1722_v15  ;;  %2866 = vmatpush3.msra.mxu0 %v2429_v16  ;;  %v1770_v1 = vld [vmem:[#allocation7 + $0xe78] sm:$0xff]  ;;  %v1769_v15 = vld [vmem:[#allocation7 + $0xe70] sm:$0xff] }
 0x28d   :  { %2355 = vmatpush1.msra.mxu1 %v1721_v17  ;;  %2867 = vmatprep.subr.mxu0 %v2444_v18  ;;  %v1766_v16 = vld [vmem:[#allocation7 + $0xe58] sm:$0xff]  ;;  %v1765_v17 = vld [vmem:[#allocation7 + $0xe50] sm:$0xff] }
 0x28e   :  { %2356 = vmatprep.subr.mxu1 %v1718_v20  ;;  %2868 = vmatpush3.msra.mxu0 %v2428_v21  ;;  %v1762_v18 = vld [vmem:[#allocation7 + $0xe38] sm:$0xff]  ;;  %v1761_v20 = vld [vmem:[#allocation7 + $0xe30] sm:$0xff] }
 0x28f   :  { %2357 = vmatpush1.msra.mxu1 %v1717_v22  ;;  %2869 = vmatprep.subr.mxu0 %v2443_v23  ;;  %v1758_v21 = vld [vmem:[#allocation7 + $0xe18] sm:$0xff]  ;;  %v1757_v22 = vld [vmem:[#allocation7 + $0xe10] sm:$0xff] }
 0x290   :  { %2358 = vmatprep.subr.mxu1 %v1714_v52  ;;  %2870 = vmatpush3.msra.mxu0 %v2427_v25  ;;  %v2484_v23 = vld [vmem:[%s3597_s5 + $0x1f8] sm:$0xff]  ;;  %v2483_v25 = vld [vmem:[%s3597_s5 + $0x1f0] sm:$0xff] }
 0x291   :  { %2359 = vmatpush1.msra.mxu1 %v1713_v26  ;;  %2871 = vmatprep.subr.mxu0 %v2442_v28  ;;  %v2468_v52 = vld [vmem:[%s3597_s5 + $0x178] sm:$0xff]  ;;  %v2467_v26 = vld [vmem:[%s3597_s5 + $0x170] sm:$0xff]  ;;  %v2466_v28 = vld [vmem:[%s3597_s5 + $0x168] sm:$0xff] }
 0x292   :  { %2360 = vmatprep.subr.mxu1 %v1710_v31  ;;  %2872 = vmatpush3.msra.mxu0 %v2426_v33  ;;  %v2481_v31 = vld [vmem:[%s3597_s5 + $0x1e0] sm:$0xff] }
 0x293   :  { %2361 = vmatpush1.msra.mxu1 %v1709_v35  ;;  %2873 = vmatprep.subr.mxu0 %v2441_v37  ;;  %v2465_v33 = vld [vmem:[%s3597_s5 + $0x160] sm:$0xff]  ;;  %v2480_v35 = vld [vmem:[%s3597_s5 + $0x1d8] sm:$0xff] }
 0x294   :  { %2362 = vmatprep.subr.mxu1 %v1706_v38  ;;  %2874 = vmatpush3.msra.mxu0 %v2425_v39  ;;  %v2464_v37 = vld [vmem:[%s3597_s5 + $0x158] sm:$0xff]  ;;  %v2479_v38 = vld [vmem:[%s3597_s5 + $0x1d0] sm:$0xff] }
 0x295   :  { %2363 = vmatpush1.msra.mxu1 %v1705_v19  ;;  %2875 = vmatprep.subr.mxu0 %v2440_v40  ;;  %v2463_v39 = vld [vmem:[%s3597_s5 + $0x150] sm:$0xff]  ;;  %v2478_v19 = vld [vmem:[%s3597_s5 + $0x1c8] sm:$0xff] }
 0x296   :  { %2364 = vmatprep.subr.mxu1 %v1702_v42  ;;  %2876 = vmatpush3.msra.mxu0 %v2424_v8  ;;  %v2462_v40 = vld [vmem:[%s3597_s5 + $0x148] sm:$0xff]  ;;  %v2477_v42 = vld [vmem:[%s3597_s5 + $0x1c0] sm:$0xff] }
 0x297   :  { %2365 = vmatpush1.msra.mxu1 %v1701_v43  ;;  %2877 = vmatprep.subr.mxu0 %v2439_v44  ;;  %v2461_v8 = vld [vmem:[%s3597_s5 + $0x140] sm:$0xff]  ;;  %v2476_v43 = vld [vmem:[%s3597_s5 + $0x1b8] sm:$0xff] }
 0x298   :  { %2366 = vmatprep.subr.mxu1 %v1698_v45  ;;  %2878 = vmatpush3.msra.mxu0 %v2423_v46  ;;  %v2460_v44 = vld [vmem:[%s3597_s5 + $0x138] sm:$0xff]  ;;  %v2475_v45 = vld [vmem:[%s3597_s5 + $0x1b0] sm:$0xff] }
 0x299   :  { %2367 = vmatpush1.msra.mxu1 %v1697_v47  ;;  %2879 = vmatprep.subr.mxu0 %v2438_v49  ;;  %v2459_v46 = vld [vmem:[%s3597_s5 + $0x130] sm:$0xff]  ;;  %v2474_v47 = vld [vmem:[%s3597_s5 + $0x1a8] sm:$0xff] }
 0x29a   :  { %2368 = vmatprep.subr.mxu1 %v1694_v50  ;;  %2880 = vmatpush3.msra.mxu0 %v2422_v29  ;;  %v2458_v49 = vld [vmem:[%s3597_s5 + $0x128] sm:$0xff]  ;;  %v2473_v50 = vld [vmem:[%s3597_s5 + $0x1a0] sm:$0xff] }
 0x29b   :  { %2369 = vmatpush1.msra.mxu1 %v1693_v51  ;;  %2881 = vmatprep.subr.mxu0 %v2437_v53  ;;  %v1819_v29 = vld [vmem:[#allocation8] sm:$0xf]  ;;  %v1907_v51 = vpop.f32.mrf.mxu0 }
 0x29c   :  { %2370 = vmatprep.subr.mxu1 %v1818_v55  ;;  %2882 = vmatpush3.msra.mxu0 %v2421_v56  ;;  %v1824_v53 = vrot.slane %v1819_v29, %v655_v24  ;;  %v1978_v56 = vpop.f32.mrf.mxu1  ;;  %v2472_v24 = vld [vmem:[%s3597_s5 + $0x198] sm:$0xff] }
 0x29d   :  { %2371 = vmatpush2.msra.mxu1 %v1817_v11  ;;  %v1909_v55 = vpop.f32.mrf.mxu0  ;;  %v1828_v11 = vrot.slane %v1819_v29, %v659_v30 }
 0x29e   :  { %2372 = vmatprep.subr.mxu1 %v1814_v57 }
 0x29f   :  { %2373 = vmatpush2.msra.mxu1 %v1813_v58  ;;  %v1908_v58 = vadd.f32 %v1907_v51, %v1824_v53 }
 0x2a0   :  { %2374 = vmatprep.subr.mxu1 %v1810_v32  ;;  %v1980_v32 = vpop.f32.mrf.mxu1 }
 0x2a1   :  { %2375 = vmatpush2.msra.mxu1 %v1809_v59  ;;  %v1910_v59 = vadd.f32 %v1909_v55, %v1828_v11 }
 0x2a2   :  { %2376 = vmatprep.subr.mxu1 %v1806_v60  ;;  %v1979_v60 = vadd.f32 %v1978_v56, %v1908_v58  ;;  %v2720_v58 = vld [vmem:[%s3601_s9 + $0x8] sm:$0xff] }
 0x2a3   :  { %2377 = vmatpush2.msra.mxu1 %v1805_v34 }
 0x2a4   :  { %2378 = vmatprep.subr.mxu1 %v1802_v61  ;;  %v1981_v61 = vadd.f32 %v1980_v32, %v1910_v59  ;;  %v2719_v32 = vld [vmem:[%s3601_s9] sm:$0xff]  ;;  %v2847_v59 = vld [vmem:[#allocation13] ss:$0 sm:$0xff] }
 0x2a5   :  { %2379 = vmatpush2.msra.mxu1 %v1801_v63 }
 0x2a6   :  { %2380 = vmatprep.subr.mxu1 %v1798_v0  ;;  %v2457_v0 = vld [vmem:[%s3597_s5 + $0x120] sm:$0xff] }
 0x2a7   :  { %2381 = vmatpush2.msra.mxu1 %v1797_v2 }
 0x2a8   :  { %2382 = vmatprep.subr.mxu1 %v1794_v62 }
 0x2a9   :  { %2383 = vmatpush2.msra.mxu1 %v1793_v3  ;;  %v2456_v3 = vld [vmem:[%s3597_s5 + $0x118] sm:$0xff] }
 0x2aa   :  { %2384 = vmatprep.subr.mxu1 %v1790_v4 }
 0x2ab   :  { %2385 = vmatpush2.msra.mxu1 %v1789_v5  ;;  %v2471_v5 = vld [vmem:[%s3597_s5 + $0x190] sm:$0xff] }
 0x2ac   :  { %2386 = vmatprep.subr.mxu1 %v1786_v6 }
 0x2ad   :  { %2387 = vmatpush2.msra.mxu1 %v1785_v7  ;;  %v2455_v7 = vld [vmem:[%s3597_s5 + $0x110] sm:$0xff] }
 0x2ae   :  { %2388 = vmatprep.subr.mxu1 %v1782_v9 }
 0x2af   :  { %2389 = vmatpush2.msra.mxu1 %v1781_v10  ;;  %v2470_v10 = vld [vmem:[%s3597_s5 + $0x188] sm:$0xff] }
 0x2b0   :  { %2390 = vmatprep.subr.mxu1 %v1778_v27 }
 0x2b1   :  { %2391 = vmatpush2.msra.mxu1 %v1777_v12  ;;  %v2454_v12 = vld [vmem:[%s3597_s5 + $0x108] sm:$0xff] }
 0x2b2   :  { %2392 = vmatprep.subr.mxu1 %v1774_v13  ;;  %v2469_v13 = vld [vmem:[%s3597_s5 + $0x180] sm:$0xff] }
 0x2b3   :  { %2393 = vmatpush2.msra.mxu1 %v1773_v14  ;;  %v2453_v14 = vld [vmem:[%s3597_s5 + $0x100] sm:$0xff] }
 0x2b4   :  { %2394 = vmatprep.subr.mxu1 %v1770_v1 }
 0x2b5   :  { %2395 = vmatpush2.msra.mxu1 %v1769_v15 }
 0x2b6   :  { %2396 = vmatprep.subr.mxu1 %v1766_v16 }
 0x2b7   :  { %2397 = vmatpush2.msra.mxu1 %v1765_v17  ;;  %v1832_v17 = vrot.slane %v1819_v29, %v663_v48 }
 0x2b8   :  { %2398 = vmatprep.subr.mxu1 %v1762_v18 }
 0x2b9   :  { %2399 = vmatpush2.msra.mxu1 %v1761_v20  ;;  %v2049_v57 = vpop.f32.mrf.mxu0  ;;  %v1836_v20 = vrot.slane %v1819_v29, %v667_v54 }
 0x2ba   :  { %2400 = vmatprep.subr.mxu1 %v1758_v21  ;;  %v2050_v63 = vadd.f32 %v2049_v57, %v1979_v60  ;;  %v2721_v57 = vld [vmem:[%s3601_s9 + $0x10] sm:$0xff] }
 0x2bb   :  { %2401 = vmatpush2.msra.mxu1 %v1757_v22  ;;  %v2051_v34 = vpop.f32.mrf.mxu0 }
 0x2bc   :  { %2403 = vmatmul.mubr.f32.vlgmr.msra.gmra.mxu1 %v3364_v36  ;;  %2886 = vmatprep.subr.mxu1 %v2484_v23  ;;  %v2482_v36 = vld [vmem:[%s3597_s5 + $0x1e8] sm:$0xff]  ;;  %v2052_v62 = vadd.f32 %v2051_v34, %v1981_v61 }
 0x2bd   :  { %2887 = vmatpush3.msra.mxu1 %v2468_v52 }
 0x2be   :  { %2888 = vmatprep.subr.mxu1 %v2483_v25 }
 0x2bf   :  { %2889 = vmatpush3.msra.mxu1 %v2467_v26 }
 0x2c0   :  { %2890 = vmatprep.subr.mxu1 %v2482_v36 }
 0x2c1   :  { %2891 = vmatpush3.msra.mxu1 %v2466_v28 }
 0x2c2   :  { %2892 = vmatprep.subr.mxu1 %v2481_v31 }
 0x2c3   :  { %2893 = vmatpush3.msra.mxu1 %v2465_v33 }
 0x2c4   :  { %2894 = vmatprep.subr.mxu1 %v2480_v35 }
 0x2c5   :  { %2895 = vmatpush3.msra.mxu1 %v2464_v37 }
 0x2c6   :  { %2896 = vmatprep.subr.mxu1 %v2479_v38 }
 0x2c7   :  { %2897 = vmatpush3.msra.mxu1 %v2463_v39 }
 0x2c8   :  { %2898 = vmatprep.subr.mxu1 %v2478_v19 }
 0x2c9   :  { %2899 = vmatpush3.msra.mxu1 %v2462_v40  ;;  %v3184_v40 = vmov 0.0  }
 0x2ca   :  { %2900 = vmatprep.subr.mxu1 %v2477_v42  ;;  %2931 = vmatprep.subr.mxu0 %v3184_v40  ;;  %v2636_v42 = vld [vmem:[#allocation11 + $0x18] sm:$0xff] }
 0x2cb   :  { %2901 = vmatpush3.msra.mxu1 %v2461_v8  ;;  %v2635_v8 = vld [vmem:[#allocation11 + $0x10] sm:$0xff] }
 0x2cc   :  { %2902 = vmatprep.subr.mxu1 %v2476_v43  ;;  %v2634_v43 = vld [vmem:[#allocation11 + $0x8] sm:$0xff] }
 0x2cd   :  { %2903 = vmatpush3.msra.mxu1 %v2460_v44  ;;  %v2633_v44 = vld [vmem:[#allocation11] sm:$0xff] }
 0x2ce   :  { %2904 = vmatprep.subr.mxu1 %v2475_v45  ;;  %v2722_v45 = vld [vmem:[%s3601_s9 + $0x18] sm:$0xff]  ;;  %s3186_s9 = smov [#allocation16]  }
 0x2cf   :  { %2905 = vmatpush3.msra.mxu1 %v2459_v46  ;;  %s2833_s18 = sshll.u32 %s3186_s9, 4  ;;  %s2834_s18 = int_to_ptr.vmem [resolvable:$true] %s2833_s18 }
 0x2d0   :  { %2906 = vmatprep.subr.mxu1 %v2474_v47  ;;  %s3137_s6 = scalar_lea.vmem %s2834_s18, 32  ;;  %p3142_p13 = scmp.lt.s32.totalorder %s2834_s18, %s2834_s18 }
 0x2d1   :  { %2907 = vmatpush3.msra.mxu1 %v2458_v49  ;;  %p3138_p12 = scmp.ne.s32.totalorder %s2834_s18, %s3137_s6  ;;  %p3143_p0 = scmp.lt.s32.totalorder %s3137_s6, %s3137_s6 }
 0x2d2   :  { %2908 = vmatprep.subr.mxu1 %v2473_v50  ;;  %v2846_v50 = vld [vmem:[#allocation10] ss:$0 sm:$0xff] }
 0x2d3   :  { %2909 = vmatpush3.msra.mxu1 %v2457_v0  ;;  %v2849_v0 = vld [vmem:[#allocation14] ss:$0 sm:$0xff]  ;;  %p3144_p1 = por %p3143_p0, %p3142_p13 }
 0x2d4   :  { %2910 = vmatprep.subr.mxu1 %v2472_v24 }
 0x2d5   :  { %2911 = vmatpush3.msra.mxu1 %v2456_v3  ;;  %p3145_p2 = pnand %p3144_p1, %p3138_p12 }
 0x2d6   :  { %2912 = vmatprep.subr.mxu1 %v2471_v5 }
 0x2d7   :  { %2913 = vmatpush3.msra.mxu1 %v2455_v7 }
 0x2d8   :  { %2914 = vmatprep.subr.mxu1 %v2470_v10 }
 0x2d9   :  { %2915 = vmatpush3.msra.mxu1 %v2454_v12 }
 0x2da   :  { %2916 = vmatprep.subr.mxu1 %v2469_v13 }
 0x2db   :  { %2917 = vmatpush3.msra.mxu1 %v2453_v14 }
 0x2dc   :  { %2942 = vmatprep.subr.mxu1 %v3184_v40 }
 0x2f9   :  { %v2191_v16 = vpop.f32.mrf.mxu0 }
 0x2fa   :  { %v2192_v22 = vadd.f32 %v2191_v16, %v1832_v17 }
 0x2fb   :  { %v2193_v21 = vpop.f32.mrf.mxu0 }
 0x2fc   :  { %v2120_v2 = vpop.f32.mrf.mxu1  ;;  %v2194_v52 = vadd.f32 %v2193_v21, %v1836_v20 }
 0x2fd   :  { %v2121_v30 = vadd.f32 %v2120_v2, %v2050_v63 }
 0x2fe   :  { %v2122_v4 = vpop.f32.mrf.mxu1 }
 0x2ff   :  { %v2123_v6 = vadd.f32 %v2122_v4, %v2052_v62  ;;  %vm2409_vm8 = vcmp.ge.f32.partialorder %v2121_v30, 0.0  ;;  %v2413_v9 = vmul.f32 0.01, %v2121_v30 }
 0x301   :  { %v2414_v27 = vmul.f32 0.01, %v2123_v6  ;;  %vm2410_vm9 = vcmp.ge.f32.partialorder %v2123_v6, 0.0  ;;  %v2417_v15 = vsel %vm2409_vm8, %v2121_v30, %v2413_v9 }
 0x303   :  { %v2418_v1 = vsel %vm2410_vm9, %v2123_v6, %v2414_v27 }
 0x304   :  { %2556 = vmatprep.mubr.f32.mxu0 %v2418_v1 }
 0x305   :  { %2557 = vmatmul.mubr.f32.vlgmr.msra.gmra.mxu0 %v2417_v15 }
 0x306   :  { %2932 = vmatpush3.msra.mxu0 %v2636_v42  ;;  %2939 = vmatprep.mubr.msk.f32.mxu0 %vm3185_vm12, %v3184_v40 }
 0x307   :  { %2933 = vmatprep.subr.mxu0 %v3184_v40 }
 0x308   :  { %2934 = vmatpush3.msra.mxu0 %v2635_v8 }
 0x309   :  { %2935 = vmatprep.subr.mxu0 %v3184_v40 }
 0x30a   :  { %2936 = vmatpush3.msra.mxu0 %v2634_v43 }
 0x30b   :  { %2937 = vmatprep.subr.mxu0 %v3184_v40 }
 0x30c   :  { %2938 = vmatpush3.msra.mxu0 %v2633_v44 }
 0x33a   :  { %v2333_v26 = vpop.f32.mrf.mxu0 }
 0x33c   :  { %v2262_v18 = vpop.f32.mrf.mxu1  ;;  %v2335_v31 = vpop.f32.mrf.mxu0 }
 0x33d   :  { %v2263_v25 = vadd.f32 %v2262_v18, %v2192_v22 }
 0x33e   :  { %v2264_v23 = vpop.f32.mrf.mxu1 }
 0x33f   :  { %v2265_v36 = vadd.f32 %v2264_v23, %v2194_v52  ;;  %v2334_v28 = vadd.f32 %v2333_v26, %v2263_v25 }
 0x341   :  { %v2336_v35 = vadd.f32 %v2335_v31, %v2265_v36 }
 0x37c   :  { %v2404_v33 = vpop.f32.mrf.mxu1 }
 0x37d   :  { %v2405_v37 = vadd.f32 %v2404_v33, %v2334_v28 }
 0x37e   :  { %v2406_v38 = vpop.f32.mrf.mxu1 }
 0x37f   :  { %v2407_v39 = vadd.f32 %v2406_v38, %v2336_v35  ;;  %v2415_v19 = vmul.f32 0.01, %v2405_v37  ;;  %vm2411_vm10 = vcmp.ge.f32.partialorder %v2405_v37, 0.0 }
 0x381   :  { %v2416_v48 = vmul.f32 0.01, %v2407_v39  ;;  %vm2412_vm11 = vcmp.ge.f32.partialorder %v2407_v39, 0.0  ;;  %v2419_v54 = vsel %vm2411_vm10, %v2405_v37, %v2415_v19 }
 0x383   :  { %v2420_v41 = vsel %vm2412_vm11, %v2407_v39, %v2416_v48 }
 0x384   :  { %2626 = vmatprep.mubr.f32.mxu1 %v2420_v41 }
 0x385   :  { %2627 = vmatmul.mubr.f32.vlgmr.msra.gmra.mxu1 %v2419_v54 }
 0x386   :  { %2950 = vmatprep.mubr.msk.f32.mxu1 %vm3185_vm12, %v3184_v40  ;;  %2943 = vmatpush3.msra.mxu1 %v2722_v45 }
 0x387   :  { %2944 = vmatprep.subr.mxu1 %v3184_v40 }
 0x388   :  { %2945 = vmatpush3.msra.mxu1 %v2721_v57 }
 0x389   :  { %2946 = vmatprep.subr.mxu1 %v3184_v40 }
 0x38a   :  { %2947 = vmatpush3.msra.mxu1 %v2720_v58 }
 0x38b   :  { %2948 = vmatprep.subr.mxu1 %v3184_v40 }
 0x38c   :  { %2949 = vmatpush3.msra.mxu1 %v2719_v32 }
 0x3c5   :  { %v2883_v46 = vpop.f32.mrf.mxu0 }
 0x3c7   :  { %v2884_v47 = vpop.f32.mrf.mxu0 }
 0x3c8   :  { %v2885_v49 = vadd.f32 %v2884_v47, %v2883_v46 }
 0x3ca   :  { %v2559_v53 = vadd.f32 %v2885_v49, %v2846_v50 }
 0x445   :  { %v2918_v29 = vpop.f32.mrf.mxu1 }
 0x447   :  { %v2919_v51 = vpop.f32.mrf.mxu1 }
 0x448   :  { %v2920_v55 = vadd.f32 %v2919_v51, %v2918_v29 }
 0x44a   :  { %v2629_v56 = vadd.f32 %v2920_v55, %v2559_v53 }
 0x44c   :  { %v2632_v11 = vmax.f32 %v2629_v56, 0.0 }
 0x44e   :  { %2940 = vmatmul.mubr.msk.f32.vlgmr.msra.gmra.mxu0 %vm2644_vm13, %v2632_v11 }
 0x50e   :  { %v2714_v60 = vpop.f32.mrf.mxu0 }
 0x50f   :  { %v2715_v34 = vadd.f32 %v2847_v59, %v2714_v60 }
 0x510   :  { %v2941_v61 = vpop.f32.mrf.mxu0 }
 0x511   :  { %v2718_v63 = vmax.f32 %v2715_v34, 0.0 }
 0x513   :  { %2951 = vmatmul.mubr.msk.f32.vlgmr.msra.gmra.mxu1 %vm2644_vm13, %v2718_v63 }
 0x5d3   :  { %v2799_v2 = vpop.f32.mrf.mxu1 }
 0x5d4   :  { %v2800_v24 = vadd.f32 %v2849_v0, %v2799_v2 }
 0x5d5   :  { %v2952_v62 = vpop.f32.mrf.mxu1 }
 0x5d6   :  { %v2803_v30 = vmax.f32 %v2800_v24, 0.0 }
 0x5d8   :  { %v2805_v3 = vsel %vm2804_vm14, %v2803_v30, -inf }
 0x5d9   :  { %v2806_v4 = vrot.slane %v2805_v3, 4 }
 0x5db   :  { %v2807_v5 = vmax.f32 %v2805_v3, %v2806_v4 }
 0x5dd   :  { %v2808_v6 = vrot.slane %v2807_v5, 2 }
 0x5df   :  { %v2809_v7 = vmax.f32 %v2807_v5, %v2808_v6 }
 0x5e1   :  { %v2810_v9 = vrot.slane %v2809_v7, 1 }
 0x5e3   :  { %v2811_v10 = vmax.f32 %v2809_v7, %v2810_v9 }
 0x5e5   :  { %v2812_v27 = vsub.f32 %v2803_v30, %v2811_v10 }
 0x5e7   :  { %v2813_v12 = vmul.f32 1.442695, %v2812_v27 }
 0x5e9   :  { %2972 = vpow2.f32 %v2813_v12 }
 0x5f6   :  { %v2973_v13 = vpop.eup %2972 }
 0x5f7   :  { %v2815_v14 = vsel %vm2804_vm14, %v2973_v13, 0.0 }
 0x5f8   :  { %v2816_v1 = vrot.slane %v2815_v14, 4 }
 0x5fa   :  { %v2817_v15 = vadd.f32 %v2816_v1, %v2815_v14 }
 0x5fc   :  { %v2818_v16 = vrot.slane %v2817_v15, 2 }
 0x5fe   :  { %v2819_v17 = vadd.f32 %v2818_v16, %v2817_v15 }
 0x600   :  { %v2820_v18 = vrot.slane %v2819_v17, 1 }
 0x602   :  { %v2821_v20 = vadd.f32 %v2820_v18, %v2819_v17 }
 0x604   :  { %2974 = vlog2.f32 %v2821_v20 }
 0x611   :  { %v2975_v21 = vpop.eup %2974 }
 0x612   :  { %v2823_v22 = vmul.f32 0.6931472, %v2975_v21 }
 0x614   :  { %v2824_v23 = vadd.f32 %v2823_v22, %v2811_v10 }
 0x616   :  { %v2825_v52 = vsub.f32 %v2803_v30, %v2824_v23 }
 0x618   :  { %2826 = vst.msk [vmem:[#allocation16] sm:$0x3] %vm2804_vm14, %v2825_v52 }
 0x619   :  { %3148 = shalt.err (!%p3145_p2)
}
 0x61a   :  { %2836 = dma.vmem_to_hbm [thread:$0]  %s2834_s18, 32, %s3603_s11, [#allocation4]  }
 0x61b   :  { %3167 = dma.done.wait [#allocation4], 32  }
 0x61c   :  { %3168 = vsyncadd [#allocation4], 4294967264 }
 0x61d   :  { %2840 = vsyncpa [#allocation3], 1 }
 0x61e   :  { %2841 = vsyncpa [#allocation6], 1 }
 0x61f   :  { %2842 = vsyncpa [#allocation9], 1 }
 0x620   :  { %2843 = vsyncpa [#allocation12], 1 }
 0x621   :  { %2844 = vsyncpa [#allocation15], 1 }
 0x622   :  { %2845 = vsyncpa [#allocation4], 1 }

</bundles_post_ra>
